<compile_context>
chip_gen: v7x
topology: tpu7x:2x2x1
jax: 0.10.0
libtpu: 0.0.40
codegen_flags: <defaults>
</compile_context>

<pallas_src>
import jax
import jax.numpy as jnp
from jax.experimental import pallas as pl
from jax.experimental.pallas import tpu as pltpu


# ------------------------------------------------------------------ config --
LANES = 128                           # lane-dense channel padding
MAX_ROW_TILE = 2048                   # rows per block for flattened pointwise kernels
VMEM_LIMIT_BYTES = 48 * 1024 * 1024   # safe on v7x (64 MiB physical per TC)
ACT_DTYPE = jnp.bfloat16              # inter-kernel activation / weight dtype


# ----------------------------------------------------------------- helpers --
def _make_divisible(v, divisor=8, min_value=None):
    if min_value is None:
        min_value = divisor
    new_v = max(min_value, int(v + divisor / 2) // divisor * divisor)
    if new_v < 0.9 * v:
        new_v += divisor
    return new_v


def _row_tile(n, max_tile=MAX_ROW_TILE):
    """Row tile for (rows, 128) matrices: full array if small, else a multiple of 16."""
    if n <= max_tile:
        return n
    for t in range(max_tile, 15, -16):
        if n % t == 0:
            return t
    return max_tile


def _conv_row_tile(h, w, budget=2048, max_th=64):
    """Divisor of h with TH*W bounded (keeps the im2col scratch a few MiB)."""
    best = 1
    for t in range(1, min(h, max_th) + 1):
        if h % t == 0 and t * w <= budget:
            best = t
    return best


def _mosaic_params(dim_sem):
    return pltpu.CompilerParams(dimension_semantics=tuple(dim_sem),
                                vmem_limit_bytes=VMEM_LIMIT_BYTES)


def _cost(flops, bytes_accessed, transcendentals=0):
    return pl.CostEstimate(flops=int(flops), transcendentals=int(transcendentals),
                           bytes_accessed=int(bytes_accessed))


def _pad_to(x, shape):
    pads = [(0, t - s) for s, t in zip(x.shape, shape)]
    return jnp.pad(x, pads)


def _lerp_coords(n_in, n_out):
    """align_corners=True 1-D bilinear sample coords: (frac, lo, hi)."""
    if n_in == 1:
        z = jnp.zeros((n_out,), jnp.float32)
        zi = jnp.zeros((n_out,), jnp.int32)
        return z, zi, zi
    src = jnp.arange(n_out, dtype=jnp.float32) * (n_in - 1) / (n_out - 1)
    lo = jnp.clip(jnp.floor(src).astype(jnp.int32), 0, n_in - 2)
    frac = src - lo.astype(jnp.float32)
    return frac, lo, lo + 1


# ----------------------------------------------------------------- kernels --
def _stem_kernel(x_ref, w_ref, o_ref):
    """relu(x @ w): (tm, 8) @ (8, 128) single MXU dot (Cin zero-padded 3->8)."""
    y = jnp.dot(x_ref[...], w_ref[...], preferred_element_type=jnp.float32)
    o_ref[...] = jnp.maximum(y, 0.0).astype(o_ref.dtype)


def _chain_kernel(x_ref, w1_ref, w2_ref, o_ref):
    """Fused: relu(x @ W1) @ W2 (stage2 conv + encoder classifier 1x1 conv)."""
    h = jnp.dot(x_ref[...], w1_ref[...], preferred_element_type=jnp.float32)
    h = jnp.maximum(h, 0.0).astype(jnp.bfloat16)
    y = jnp.dot(h, w2_ref[...], preferred_element_type=jnp.float32)
    o_ref[...] = y.astype(o_ref.dtype)


def _decoder_kernel_factory(classes):
    def kernel(up_ref, skip_ref, wl2_ref, vec_ref, o_ref):
        # per-channel affine vectors packed as rows of one (8, 128) f32 input:
        # 0:s_bn3 1:b_bn3 2:s_l2 3:b_l2 4:a_l2(prelu) 5:s_bn2 6:b_bn2
        s3, b3 = vec_ref[0:1], vec_ref[1:2]
        sl2, bl2, al2 = vec_ref[2:3], vec_ref[3:4], vec_ref[4:5]
        s2, b2 = vec_ref[5:6], vec_ref[6:7]

        # Dnc_stage1 = bn_3(up(Enc_final))   (upsample done in glue, bn_3 here)
        d1 = up_ref[...].astype(jnp.float32) * s3 + b3                # (TM, 128)

        # channel-padded softmax over the real `classes` lanes only.
        # max(softmax) == 1/sum(exp(x - max)) so the extra max-reduce is dropped.
        lane = jax.lax.broadcasted_iota(jnp.int32, d1.shape, dimension=1)
        d1m = jnp.where(lane < classes, d1, -1e30)
        m = jnp.max(d1m, axis=-1, keepdims=True)
        e = jnp.exp(d1m - m)                                          # padded -> 0
        conf = pl.reciprocal(jnp.sum(e, axis=-1, keepdims=True), approx=True)
        gate = 1.0 - conf                                             # stage1_gate

        # Dnc_stage2_0 = PReLU(BN(1x1 conv(skip)))
        y = jnp.dot(skip_ref[...], wl2_ref[...], preferred_element_type=jnp.float32)
        y = y * sl2 + bl2
        y = jnp.where(y >= 0.0, y, al2 * y)

        pre = y * gate + d1
        # bn_2 folded here (commutes with the following align_corners upsample)
        o_ref[...] = (pre * s2 + b2).astype(o_ref.dtype)
    return kernel


def _make_conv_kernel(TH, W, Wp, C):
    """Fused (H-direction 2x bilinear upsample + zero pad) -> im2col -> one matmul."""
    def kernel(ridx_ref, w0_ref, w1_ref,       # scalar-prefetch SMEM tables (H+2,)
               d2w_ref, w_ref,                 # (H2, Wp, C) bf16 ; (9C, C) bf16
               o_ref,                          # (TH*W, C)
               upad_ref, col_ref):             # VMEM scratch
        hb = pl.program_id(1)
        base = hb * TH

        # 1) H-direction bilinear upsample of the padded window rows into VMEM.
        #    Padded rows 0 and H+1 have zero lerp weights -> conv zero padding.
        for r in range(TH + 2):
            yp = base + r
            p0 = ridx_ref[yp]
            a0 = w0_ref[yp]
            a1 = w1_ref[yp]
            row = (d2w_ref[pl.ds(p0, 1)].astype(jnp.float32) * a0
                   + d2w_ref[pl.ds(p0 + 1, 1)].astype(jnp.float32) * a1)
            upad_ref[r:r + 1] = row.astype(jnp.bfloat16)              # (1, Wp, C)

        # 2) im2col: 9 shifted window copies into a bf16 (TH, W, 9C) buffer.
        for dy in range(3):
            for dx in range(3):
                k = dy * 3 + dx
                col_ref[:, :, k * C:(k + 1) * C] = upad_ref[dy:dy + TH, dx:dx + W, :]

        # 3) single MXU matmul against the flattened (9C, C) weight.
        x2 = col_ref[...].reshape(TH * W, 9 * C)
        y = jnp.dot(x2, w_ref[...], preferred_element_type=jnp.float32)
        o_ref[...] = y.astype(o_ref.dtype)
    return kernel


# ---------------------------------------------------------------- wrappers --
def stem_pointwise(x2d, w):
    """x2d: (N, 8) bf16 ; w: (8, 128) bf16 -> relu(x @ w), row-tiled, bf16 out."""
    n, cin = x2d.shape
    cp = w.shape[1]
    tm = _row_tile(n)
    return pl.pallas_call(
        _stem_kernel,
        out_shape=jax.ShapeDtypeStruct((n, cp), ACT_DTYPE),
        grid=(pl.cdiv(n, tm),),
        in_specs=[pl.BlockSpec((tm, cin), lambda i: (i, 0)),
                  pl.BlockSpec((cin, cp), lambda i: (0, 0))],
        out_specs=pl.BlockSpec((tm, cp), lambda i: (i, 0)),
        compiler_params=_mosaic_params(("parallel",)),
    )(x2d, w)


def fused_pointwise_chain(x2d, w1, w2):
    """relu(x @ W1) @ W2 with the intermediate kept on-chip; bf16 in/out."""
    n, cp = x2d.shape
    tm = _row_tile(n)
    return pl.pallas_call(
        _chain_kernel,
        out_shape=jax.ShapeDtypeStruct((n, cp), ACT_DTYPE),
        grid=(pl.cdiv(n, tm),),
        in_specs=[pl.BlockSpec((tm, cp), lambda i: (i, 0)),
                  pl.BlockSpec((cp, cp), lambda i: (0, 0)),
                  pl.BlockSpec((cp, cp), lambda i: (0, 0))],
        out_specs=pl.BlockSpec((tm, cp), lambda i: (i, 0)),
        compiler_params=_mosaic_params(("parallel",)),
        cost_estimate=_cost(flops=4 * n * cp * cp,
                            bytes_accessed=(2 * n * cp + 2 * cp * cp) * 2),
    )(x2d, w1, w2)


def decoder_fused(up2d, skip2d, wl2, vecs, classes):
    """Fused SINet decoder on flattened (rows, 128) bf16 activations."""
    n, cp = up2d.shape
    tm = _row_tile(n)
    row = pl.BlockSpec((tm, cp), lambda i: (i, 0))
    return pl.pallas_call(
        _decoder_kernel_factory(classes),
        out_shape=jax.ShapeDtypeStruct((n, cp), ACT_DTYPE),
        grid=(pl.cdiv(n, tm),),
        in_specs=[row, row,
                  pl.BlockSpec((cp, cp), lambda i: (0, 0)),
                  pl.BlockSpec((8, cp), lambda i: (0, 0))],
        out_specs=row,
        compiler_params=_mosaic_params(("parallel",)),
        cost_estimate=_cost(flops=2 * n * cp * cp + 12 * n * cp,
                            bytes_accessed=(3 * n * cp + cp * cp) * 2 + 8 * cp * 4,
                            transcendentals=n * cp),
    )(up2d, skip2d, wl2, vecs)


def conv3x3_up_fused(d2, w_flat, H, W):
    """y = conv3x3(up2x(d2)), stride 1, zero pad 1, no bias.

    d2: (B, H/2, W/2, C) bf16 ; w_flat: (9C, C) bf16 ; returns (B, H, W, C) bf16.
    The W-direction upsample (+ zero column border) is done in glue at HALF
    height; the H-direction upsample + zero row border happens in VMEM inside
    the kernel, so the full-resolution tensor never round-trips HBM.
    """
    B, H2, W2, C = d2.shape
    assert H == 2 * H2 and W == 2 * W2

    # ---- W-direction bilinear 2x upsample + zero column borders (half height) ----
    fx, x0, x1 = _lerp_coords(W2, W)
    d2w = (d2[:, :, x0, :].astype(jnp.float32) * (1.0 - fx)[None, None, :, None]
           + d2[:, :, x1, :].astype(jnp.float32) * fx[None, None, :, None])
    d2w = jnp.pad(d2w, ((0, 0), (0, 0), (1, 1), (0, 0))).astype(jnp.bfloat16)
    Wp = W + 2

    # ---- H-direction lerp tables for padded rows 0..H+1 (rows 0 / H+1 -> zero) ----
    fy, y0, _ = _lerp_coords(H2, H)
    z1i = jnp.zeros((1,), jnp.int32)
    z1f = jnp.zeros((1,), jnp.float32)
    ridx = jnp.concatenate([z1i, y0.astype(jnp.int32), z1i])          # (H+2,)
    w0 = jnp.concatenate([z1f, 1.0 - fy, z1f])                        # (H+2,)
    w1 = jnp.concatenate([z1f, fy, z1f])                              # (H+2,)

    TH = _conv_row_tile(H, W)
    nH = H // TH
    out = pl.pallas_call(
        _make_conv_kernel(TH, W, Wp, C),
        out_shape=jax.ShapeDtypeStruct((B, H * W, C), ACT_DTYPE),
        grid_spec=pltpu.PrefetchScalarGridSpec(
            num_scalar_prefetch=3,
            grid=(B, nH),
            in_specs=[
                # whole half-res image per batch; block index constant along h
                # so it stays VMEM-resident across the row-chunk axis.
                pl.BlockSpec((None, H2, Wp, C), lambda b, h, *_: (b, 0, 0, 0)),
                pl.BlockSpec((9 * C, C), lambda b, h, *_: (0, 0)),
            ],
            out_specs=pl.BlockSpec((None, TH * W, C), lambda b, h, *_: (b, h, 0)),
            scratch_shapes=[
                pltpu.VMEM((TH + 2, Wp, C), jnp.bfloat16),   # upsampled+padded rows
                pltpu.VMEM((TH, W, 9 * C), jnp.bfloat16),    # im2col buffer
            ]),
        compiler_params=_mosaic_params(("parallel", "arbitrary")),
        cost_estimate=_cost(flops=2 * B * H * W * 9 * C * C,
                            bytes_accessed=(B * H2 * Wp * C + 9 * C * C
                                            + B * H * W * C) * 2),
    )(ridx, w0, w1, d2w, w_flat)
    return out.reshape(B, H, W, C)


# ----------------------------------------------------- plain-JAX glue only --
def upsample_bilinear_2x(x):
    """nn.UpsamplingBilinear2d(scale_factor=2) (align_corners=True) on NHWC (f32 out)."""
    B, H, W, C = x.shape
    fy, y0, y1 = _lerp_coords(H, 2 * H)
    fx, x0, x1 = _lerp_coords(W, 2 * W)
    xf = x.astype(jnp.float32)
    rows = (xf[:, y0, :, :] * (1.0 - fy)[None, :, None, None]
            + xf[:, y1, :, :] * fy[None, :, None, None])
    out = (rows[:, :, x0, :] * (1.0 - fx)[None, None, :, None]
           + rows[:, :, x1, :] * fx[None, None, :, None])
    return out


def avg_pool(x, k):
    B, H, W, C = x.shape
    return x.reshape(B, H // k, k, W // k, k, C).mean(axis=(2, 4))


# -------------------------------------------------------------- parameters --
def _bn_affine(key, c, eps=1e-3):
    k1, k2, k3, k4 = jax.random.split(key, 4)
    gamma = 1.0 + 0.1 * jax.random.normal(k1, (c,), jnp.float32)
    beta = 0.1 * jax.random.normal(k2, (c,), jnp.float32)
    mean = 0.1 * jax.random.normal(k3, (c,), jnp.float32)
    var = 1.0 + 0.1 * jnp.abs(jax.random.normal(k4, (c,), jnp.float32))
    scale = gamma / jnp.sqrt(var + eps)
    bias = beta - mean * scale
    return scale, bias


def init_params(key, cin, classes, skip_dim, enc_dim, cp=LANES):
    ks = jax.random.split(key, 8)

    def conv_w(k, ci, co):
        return jax.random.normal(k, (ci, co), jnp.float32) / jnp.sqrt(float(ci))

    # real-size parameters
    w_stem = conv_w(ks[0], cin, skip_dim)                      # stand-in backbone
    w_stage2 = conv_w(ks[1], skip_dim, enc_dim)                # stand-in backbone
    w_cls_enc = conv_w(ks[2], enc_dim, classes)                # encoder classifier
    w_l2 = conv_w(ks[3], skip_dim, classes)                    # level2_C conv
    s_l2, b_l2 = _bn_affine(ks[4], classes)
    a_l2 = 0.25 * jnp.ones((classes,), jnp.float32)            # nn.PReLU(classes)
    s_bn3, b_bn3 = _bn_affine(ks[5], classes)
    s_bn2, b_bn2 = _bn_affine(ks[6], classes)
    w_cls_final = (jax.random.normal(ks[7], (3, 3, classes, classes), jnp.float32)
                   / jnp.sqrt(9.0 * classes))

    # all 7 per-channel affine vectors packed into one (8, 128) f32 block
    vecs = jnp.zeros((8, cp), jnp.float32)
    for i, v in enumerate([s_bn3, b_bn3, s_l2, b_l2, a_l2, s_bn2, b_bn2]):
        vecs = vecs.at[i, :classes].set(v)

    # zero-pad channel dims to 128 lanes (Cin padded to 8) and pre-cast to bf16
    w_flat = _pad_to(w_cls_final, (3, 3, cp, cp)).reshape(9 * cp, cp)
    return {
        "w_stem": _pad_to(w_stem, (8, cp)).astype(ACT_DTYPE),
        "w_stage2": _pad_to(w_stage2, (cp, cp)).astype(ACT_DTYPE),
        "w_cls_enc": _pad_to(w_cls_enc, (cp, cp)).astype(ACT_DTYPE),
        "w_l2": _pad_to(w_l2, (cp, cp)).astype(ACT_DTYPE),
        "vecs": vecs,
        "w_cls_final": w_flat.astype(ACT_DTYPE),
    }


# ------------------------------------------------------------------ forward --
def sinet_phinet_forward(x_nchw, p, classes):
    cp = LANES
    x = jnp.transpose(x_nchw, (0, 2, 3, 1)).astype(jnp.float32)   # NCHW -> NHWC
    B, H, W, Cin = x.shape
    assert H % 8 == 0 and W % 8 == 0, "input H, W must be divisible by 8"

    # ---- stand-in PhiNet backbone (skip @ H/4, encoder output @ H/8) ----
    # TODO(synk): external PhiNet backbone replaced by a deterministic stand-in.
    x4 = avg_pool(x, 4)                                           # (B,H/4,W/4,Cin)
    n4 = B * (H // 4) * (W // 4)
    x4p = _pad_to(x4, (B, H // 4, W // 4, 8)).astype(ACT_DTYPE)   # Cin 3 -> 8
    skip2d = stem_pointwise(x4p.reshape(n4, 8), p["w_stem"])      # (n4,128) bf16
    skip_img = skip2d.reshape(B, H // 4, W // 4, cp)
    x8 = avg_pool(skip_img.astype(jnp.float32), 2).astype(ACT_DTYPE)
    n8 = B * (H // 8) * (W // 8)

    # stage2 conv + PhiSINet_Encoder.classifier fused into one kernel
    enc_cls2d = fused_pointwise_chain(x8.reshape(n8, cp),
                                      p["w_stage2"], p["w_cls_enc"])
    enc_cls = enc_cls2d.reshape(B, H // 8, W // 8, cp)            # Enc_final

    # ---- SINet decoder (single fused kernel; bn_2 folded before the upsample) ----
    up_enc = upsample_bilinear_2x(enc_cls).astype(ACT_DTYPE)      # (B,H/4,W/4,128)
    pre2d = decoder_fused(up_enc.reshape(n4, cp), skip2d,
                          p["w_l2"], p["vecs"], classes)
    pre = pre2d.reshape(B, H // 4, W // 4, cp)

    d2 = upsample_bilinear_2x(pre).astype(ACT_DTYPE)              # Dnc_stage2 (H/2)
    # classifier: 2x upsample fused into the 3x3 conv kernel
    y = conv3x3_up_fused(d2, p["w_cls_final"], H, W)              # (B,H,W,128) bf16
    y = y[..., :classes].astype(jnp.float32)                      # drop lane padding
    return jnp.transpose(y, (0, 3, 1, 2))                         # back to NCHW


# ----------------------------------------------------------------------------
if __name__ == "__main__":
    key = jax.random.PRNGKey(0)
    kx, kp = jax.random.split(key)

    # module hyper-params (defaults: alpha=1, num_layers=5, skip_layer=3, divisor=1)
    classes = 20
    alpha, num_layers, skip_layer, divisor = 1.0, 5, 3, 1
    b1_filters, b2_filters = 24, 48
    skip_dim = _make_divisible(int(b1_filters * alpha), divisor=divisor)      # 24
    block_filters = b2_filters
    for i in range(4, num_layers + 1):
        if i in [5, 7]:
            block_filters *= 2
    enc_dim = _make_divisible(int(block_filters * alpha), divisor=divisor)    # 96

    # small deterministic input (NCHW, as in PyTorch)
    B, Cin, H, W = 2, 3, 16, 16
    x = jax.random.normal(kx, (B, Cin, H, W), jnp.float32)

    params = init_params(kp, Cin, classes, skip_dim, enc_dim)

    fwd = jax.jit(sinet_phinet_forward, static_argnums=(2,))
    out = jax.block_until_ready(fwd(x, params, classes))

    assert out.shape == (B, classes, H, W), out.shape
    assert bool(jnp.all(jnp.isfinite(out)))
    print("KERNEL_OK")
</pallas_src>

<mosaic_0001>
module attributes {stable_mosaic.version = 11 : i64} {
  func.func @_stem_kernel(%arg0: i32, %arg1: memref<32x8xbf16, #tpu.memory_space<vmem>>, %arg2: memref<8x128xbf16, #tpu.memory_space<vmem>>, %arg3: memref<32x128xbf16, #tpu.memory_space<vmem>>) attributes {dimension_semantics = [#tpu.dimension_semantics<parallel>], iteration_bounds = array<i64: 1>, scalar_prefetch = 0 : i64, scratch_operands = 0 : i64, tpu.core_type = #tpu.core_type<tc>, window_params = [{transform_indices = @transform_0, window_bounds = array<i64: 32, 8>}, {pipeline_mode = #tpu.pipeline_mode<synchronous>, transform_indices = @transform_1, window_bounds = array<i64: 8, 128>}, {transform_indices = @transform_2, window_bounds = array<i64: 32, 128>}]} {
    %c0 = arith.constant 0 : index
    %c0_0 = arith.constant 0 : index
    %0 = vector.load %arg1[%c0, %c0_0] : memref<32x8xbf16, #tpu.memory_space<vmem>>, vector<32x8xbf16>
    %c0_1 = arith.constant 0 : index
    %c0_2 = arith.constant 0 : index
    %1 = vector.load %arg2[%c0_1, %c0_2] : memref<8x128xbf16, #tpu.memory_space<vmem>>, vector<8x128xbf16>
    %cst = arith.constant dense<0.000000e+00> : vector<32x128xf32>
    %2 = tpu.matmul %0, %1, %cst {dimension_numbers = #tpu.dot_dimension_numbers<[1], [0], [0], [1], [0, 0, 1, 1], [], []>} : vector<32x8xbf16>, vector<8x128xbf16>, vector<32x128xf32> -> vector<32x128xf32>
    %cst_3 = arith.constant 0.000000e+00 : f32
    %3 = vector.broadcast %cst_3 : f32 to vector<32x128xf32>
    %4 = arith.maximumf %2, %3 : vector<32x128xf32>
    %5 = arith.truncf %4 : vector<32x128xf32> to vector<32x128xbf16>
    %c0_4 = arith.constant 0 : index
    %c0_5 = arith.constant 0 : index
    %6 = vector.load %arg3[%c0_4, %c0_5] : memref<32x128xbf16, #tpu.memory_space<vmem>>, vector<32x128xbf16>
    tpu.vector_store %arg3[%c0_4, %c0_5], %5 {strides = array<i32>} : memref<32x128xbf16, #tpu.memory_space<vmem>>, vector<32x128xbf16>,
    return
  }
  func.func @transform_0(%arg0: i32) -> (i32, i32) {
    %c0_i32 = arith.constant 0 : i32
    %c0_i32_0 = arith.constant 0 : i32
    return %arg0, %c0_i32 : i32, i32
  }
  func.func @transform_1(%arg0: i32) -> (i32, i32) {
    %c0_i32 = arith.constant 0 : i32
    %c0_i32_0 = arith.constant 0 : i32
    %c0_i32_1 = arith.constant 0 : i32
    return %c0_i32, %c0_i32_0 : i32, i32
  }
  func.func @transform_2(%arg0: i32) -> (i32, i32) {
    %c0_i32 = arith.constant 0 : i32
    %c0_i32_0 = arith.constant 0 : i32
    return %arg0, %c0_i32 : i32, i32
  }
}

module attributes {stable_mosaic.version = 11 : i64} {
  func.func @_chain_kernel(%arg0: i32, %arg1: memref<8x128xbf16, #tpu.memory_space<vmem>>, %arg2: memref<128x128xbf16, #tpu.memory_space<vmem>>, %arg3: memref<128x128xbf16, #tpu.memory_space<vmem>>, %arg4: memref<8x128xbf16, #tpu.memory_space<vmem>>) attributes {dimension_semantics = [#tpu.dimension_semantics<parallel>], iteration_bounds = array<i64: 1>, scalar_prefetch = 0 : i64, scratch_operands = 0 : i64, tpu.core_type = #tpu.core_type<tc>, window_params = [{transform_indices = @transform_0, window_bounds = array<i64: 8, 128>}, {pipeline_mode = #tpu.pipeline_mode<synchronous>, transform_indices = @transform_1, window_bounds = array<i64: 128, 128>}, {pipeline_mode = #tpu.pipeline_mode<synchronous>, transform_indices = @transform_2, window_bounds = array<i64: 128, 128>}, {transform_indices = @transform_3, window_bounds = array<i64: 8, 128>}]} {
    %c0 = arith.constant 0 : index
    %c0_0 = arith.constant 0 : index
    %0 = vector.load %arg1[%c0, %c0_0] : memref<8x128xbf16, #tpu.memory_space<vmem>>, vector<8x128xbf16>
    %c0_1 = arith.constant 0 : index
    %c0_2 = arith.constant 0 : index
    %1 = vector.load %arg2[%c0_1, %c0_2] : memref<128x128xbf16, #tpu.memory_space<vmem>>, vector<128x128xbf16>
    %cst = arith.constant dense<0.000000e+00> : vector<8x128xf32>
    %2 = tpu.matmul %0, %1, %cst {dimension_numbers = #tpu.dot_dimension_numbers<[1], [0], [0], [1], [0, 0, 1, 1], [], []>} : vector<8x128xbf16>, vector<128x128xbf16>, vector<8x128xf32> -> vector<8x128xf32>
    %cst_3 = arith.constant 0.000000e+00 : f32
    %3 = vector.broadcast %cst_3 : f32 to vector<8x128xf32>
    %4 = arith.maximumf %2, %3 : vector<8x128xf32>
    %5 = arith.truncf %4 : vector<8x128xf32> to vector<8x128xbf16>
    %c0_4 = arith.constant 0 : index
    %c0_5 = arith.constant 0 : index
    %6 = vector.load %arg3[%c0_4, %c0_5] : memref<128x128xbf16, #tpu.memory_space<vmem>>, vector<128x128xbf16>
    %cst_6 = arith.constant dense<0.000000e+00> : vector<8x128xf32>
    %7 = tpu.matmul %5, %6, %cst_6 {dimension_numbers = #tpu.dot_dimension_numbers<[1], [0], [0], [1], [0, 0, 1, 1], [], []>} : vector<8x128xbf16>, vector<128x128xbf16>, vector<8x128xf32> -> vector<8x128xf32>
    %8 = arith.truncf %7 : vector<8x128xf32> to vector<8x128xbf16>
    %c0_7 = arith.constant 0 : index
    %c0_8 = arith.constant 0 : index
    %9 = vector.load %arg4[%c0_7, %c0_8] : memref<8x128xbf16, #tpu.memory_space<vmem>>, vector<8x128xbf16>
    tpu.vector_store %arg4[%c0_7, %c0_8], %8 {strides = array<i32>} : memref<8x128xbf16, #tpu.memory_space<vmem>>, vector<8x128xbf16>,
    return
  }
  func.func @transform_0(%arg0: i32) -> (i32, i32) {
    %c0_i32 = arith.constant 0 : i32
    %c0_i32_0 = arith.constant 0 : i32
    return %arg0, %c0_i32 : i32, i32
  }
  func.func @transform_1(%arg0: i32) -> (i32, i32) {
    %c0_i32 = arith.constant 0 : i32
    %c0_i32_0 = arith.constant 0 : i32
    %c0_i32_1 = arith.constant 0 : i32
    return %c0_i32, %c0_i32_0 : i32, i32
  }
  func.func @transform_2(%arg0: i32) -> (i32, i32) {
    %c0_i32 = arith.constant 0 : i32
    %c0_i32_0 = arith.constant 0 : i32
    %c0_i32_1 = arith.constant 0 : i32
    return %c0_i32, %c0_i32_0 : i32, i32
  }
  func.func @transform_3(%arg0: i32) -> (i32, i32) {
    %c0_i32 = arith.constant 0 : i32
    %c0_i32_0 = arith.constant 0 : i32
    return %arg0, %c0_i32 : i32, i32
  }
}

module attributes {stable_mosaic.version = 11 : i64} {
  func.func @kernel(%arg0: i32, %arg1: memref<32x128xbf16, #tpu.memory_space<vmem>>, %arg2: memref<32x128xbf16, #tpu.memory_space<vmem>>, %arg3: memref<128x128xbf16, #tpu.memory_space<vmem>>, %arg4: memref<8x128xf32, #tpu.memory_space<vmem>>, %arg5: memref<32x128xbf16, #tpu.memory_space<vmem>>) attributes {dimension_semantics = [#tpu.dimension_semantics<parallel>], iteration_bounds = array<i64: 1>, scalar_prefetch = 0 : i64, scratch_operands = 0 : i64, tpu.core_type = #tpu.core_type<tc>, window_params = [{transform_indices = @transform_0, window_bounds = array<i64: 32, 128>}, {transform_indices = @transform_1, window_bounds = array<i64: 32, 128>}, {pipeline_mode = #tpu.pipeline_mode<synchronous>, transform_indices = @transform_2, window_bounds = array<i64: 128, 128>}, {pipeline_mode = #tpu.pipeline_mode<synchronous>, transform_indices = @transform_3, window_bounds = array<i64: 8, 128>}, {transform_indices = @transform_4, window_bounds = array<i64: 32, 128>}]} {
    %c0 = arith.constant 0 : index
    %c0_0 = arith.constant 0 : index
    %0 = vector.load %arg4[%c0, %c0_0] : memref<8x128xf32, #tpu.memory_space<vmem>>, vector<1x128xf32>
    %c1 = arith.constant 1 : index
    %c0_1 = arith.constant 0 : index
    %1 = vector.load %arg4[%c1, %c0_1] : memref<8x128xf32, #tpu.memory_space<vmem>>, vector<1x128xf32>
    %c2 = arith.constant 2 : index
    %c0_2 = arith.constant 0 : index
    %2 = vector.load %arg4[%c2, %c0_2] : memref<8x128xf32, #tpu.memory_space<vmem>>, vector<1x128xf32>
    %c3 = arith.constant 3 : index
    %c0_3 = arith.constant 0 : index
    %3 = vector.load %arg4[%c3, %c0_3] : memref<8x128xf32, #tpu.memory_space<vmem>>, vector<1x128xf32>
    %c4 = arith.constant 4 : index
    %c0_4 = arith.constant 0 : index
    %4 = vector.load %arg4[%c4, %c0_4] : memref<8x128xf32, #tpu.memory_space<vmem>>, vector<1x128xf32>
    %c5 = arith.constant 5 : index
    %c0_5 = arith.constant 0 : index
    %5 = vector.load %arg4[%c5, %c0_5] : memref<8x128xf32, #tpu.memory_space<vmem>>, vector<1x128xf32>
    %c6 = arith.constant 6 : index
    %c0_6 = arith.constant 0 : index
    %6 = vector.load %arg4[%c6, %c0_6] : memref<8x128xf32, #tpu.memory_space<vmem>>, vector<1x128xf32>
    %c0_7 = arith.constant 0 : index
    %c0_8 = arith.constant 0 : index
    %7 = vector.load %arg1[%c0_7, %c0_8] : memref<32x128xbf16, #tpu.memory_space<vmem>>, vector<32x128xbf16>
    %8 = arith.extf %7 : vector<32x128xbf16> to vector<32x128xf32>
    %9 = vector.broadcast %0 : vector<1x128xf32> to vector<32x128xf32>
    %10 = arith.mulf %8, %9 : vector<32x128xf32>
    %11 = vector.broadcast %1 : vector<1x128xf32> to vector<32x128xf32>
    %12 = arith.addf %10, %11 : vector<32x128xf32>
    %13 = tpu.iota {dimensions = array<i32: 1>} : vector<32x128xi32>
    %c20_i32 = arith.constant 20 : i32
    %14 = vector.broadcast %c20_i32 : i32 to vector<32x128xi32>
    %15 = arith.cmpi slt, %13, %14 : vector<32x128xi32>
    %cst = arith.constant -1.000000e+30 : f32
    %16 = vector.broadcast %cst : f32 to vector<32x128xf32>
    %17 = arith.select %15, %12, %16 : vector<32x128xi1>, vector<32x128xf32>
    %cst_9 = arith.constant dense<0xFF800000> : vector<32xf32>
    %18 = vector.multi_reduction <maximumf>, %17, %cst_9 [1] : vector<32x128xf32> to vector<32xf32>
    %19 = vector.shape_cast %18 : vector<32xf32> to vector<32x1xf32>
    %20 = vector.broadcast %19 : vector<32x1xf32> to vector<32x128xf32>
    %21 = arith.subf %17, %20 : vector<32x128xf32>
    %22 = math.exp %21 : vector<32x128xf32>
    %cst_10 = arith.constant dense<0.000000e+00> : vector<32xf32>
    %23 = vector.multi_reduction <add>, %22, %cst_10 [1] : vector<32x128xf32> to vector<32xf32>
    %24 = vector.shape_cast %23 : vector<32xf32> to vector<32x1xf32>
    %25 = tpu.reciprocal %24 {approx = true} : vector<32x1xf32> -> vector<32x1xf32>
    %cst_11 = arith.constant 1.000000e+00 : f32
    %26 = vector.broadcast %cst_11 : f32 to vector<32x1xf32>
    %27 = arith.subf %26, %25 : vector<32x1xf32>
    %c0_12 = arith.constant 0 : index
    %c0_13 = arith.constant 0 : index
    %28 = vector.load %arg2[%c0_12, %c0_13] : memref<32x128xbf16, #tpu.memory_space<vmem>>, vector<32x128xbf16>
    %c0_14 = arith.constant 0 : index
    %c0_15 = arith.constant 0 : index
    %29 = vector.load %arg3[%c0_14, %c0_15] : memref<128x128xbf16, #tpu.memory_space<vmem>>, vector<128x128xbf16>
    %cst_16 = arith.constant dense<0.000000e+00> : vector<32x128xf32>
    %30 = tpu.matmul %28, %29, %cst_16 {dimension_numbers = #tpu.dot_dimension_numbers<[1], [0], [0], [1], [0, 0, 1, 1], [], []>} : vector<32x128xbf16>, vector<128x128xbf16>, vector<32x128xf32> -> vector<32x128xf32>
    %31 = vector.broadcast %2 : vector<1x128xf32> to vector<32x128xf32>
    %32 = arith.mulf %30, %31 : vector<32x128xf32>
    %33 = vector.broadcast %3 : vector<1x128xf32> to vector<32x128xf32>
    %34 = arith.addf %32, %33 : vector<32x128xf32>
    %cst_17 = arith.constant 0.000000e+00 : f32
    %35 = vector.broadcast %cst_17 : f32 to vector<32x128xf32>
    %36 = arith.cmpf oge, %34, %35 : vector<32x128xf32>
    %37 = vector.broadcast %4 : vector<1x128xf32> to vector<32x128xf32>
    %38 = arith.mulf %37, %34 : vector<32x128xf32>
    %39 = arith.select %36, %34, %38 : vector<32x128xi1>, vector<32x128xf32>
    %40 = vector.broadcast %27 : vector<32x1xf32> to vector<32x128xf32>
    %41 = arith.mulf %39, %40 : vector<32x128xf32>
    %42 = arith.addf %41, %12 : vector<32x128xf32>
    %43 = vector.broadcast %5 : vector<1x128xf32> to vector<32x128xf32>
    %44 = arith.mulf %42, %43 : vector<32x128xf32>
    %45 = vector.broadcast %6 : vector<1x128xf32> to vector<32x128xf32>
    %46 = arith.addf %44, %45 : vector<32x128xf32>
    %47 = arith.truncf %46 : vector<32x128xf32> to vector<32x128xbf16>
    %c0_18 = arith.constant 0 : index
    %c0_19 = arith.constant 0 : index
    %48 = vector.load %arg5[%c0_18, %c0_19] : memref<32x128xbf16, #tpu.memory_space<vmem>>, vector<32x128xbf16>
    tpu.vector_store %arg5[%c0_18, %c0_19], %47 {strides = array<i32>} : memref<32x128xbf16, #tpu.memory_space<vmem>>, vector<32x128xbf16>,
    return
  }
  func.func @transform_0(%arg0: i32) -> (i32, i32) {
    %c0_i32 = arith.constant 0 : i32
    %c0_i32_0 = arith.constant 0 : i32
    return %arg0, %c0_i32 : i32, i32
  }
  func.func @transform_1(%arg0: i32) -> (i32, i32) {
    %c0_i32 = arith.constant 0 : i32
    %c0_i32_0 = arith.constant 0 : i32
    return %arg0, %c0_i32 : i32, i32
  }
  func.func @transform_2(%arg0: i32) -> (i32, i32) {
    %c0_i32 = arith.constant 0 : i32
    %c0_i32_0 = arith.constant 0 : i32
    %c0_i32_1 = arith.constant 0 : i32
    return %c0_i32, %c0_i32_0 : i32, i32
  }
  func.func @transform_3(%arg0: i32) -> (i32, i32) {
    %c0_i32 = arith.constant 0 : i32
    %c0_i32_0 = arith.constant 0 : i32
    %c0_i32_1 = arith.constant 0 : i32
    return %c0_i32, %c0_i32_0 : i32, i32
  }
  func.func @transform_4(%arg0: i32) -> (i32, i32) {
    %c0_i32 = arith.constant 0 : i32
    %c0_i32_0 = arith.constant 0 : i32
    return %arg0, %c0_i32 : i32, i32
  }
}

module attributes {stable_mosaic.version = 11 : i64} {
  func.func @kernel(%arg0: i32, %arg1: i32, %arg2: memref<18xi32, #tpu.memory_space<smem>>, %arg3: memref<18xf32, #tpu.memory_space<smem>>, %arg4: memref<18xf32, #tpu.memory_space<smem>>, %arg5: memref<1x8x18x128xbf16, #tpu.memory_space<vmem>>, %arg6: memref<1152x128xbf16, #tpu.memory_space<vmem>>, %arg7: memref<1x256x128xbf16, #tpu.memory_space<vmem>>, %arg8: memref<18x18x128xbf16, #tpu.memory_space<vmem>>, %arg9: memref<16x16x1152xbf16, #tpu.memory_space<vmem>>) attributes {dimension_semantics = [#tpu.dimension_semantics<parallel>, #tpu.dimension_semantics<arbitrary>], iteration_bounds = array<i64: 2, 1>, scalar_prefetch = 3 : i64, scratch_operands = 2 : i64, tpu.core_type = #tpu.core_type<tc>, window_params = [{transform_indices = @transform_0, window_bounds = array<i64: 1, 8, 18, 128>}, {pipeline_mode = #tpu.pipeline_mode<synchronous>, transform_indices = @transform_1, window_bounds = array<i64: 1152, 128>}, {transform_indices = @transform_2, window_bounds = array<i64: 1, 256, 128>}]} {
    %c16_i32 = arith.constant 16 : i32
    %0 = arith.muli %arg1, %c16_i32 : i32
    %c0_i32 = arith.constant 0 : i32
    %1 = arith.addi %0, %c0_i32 : i32
    %2 = arith.index_cast %1 : i32 to index
    %3 = memref.load %arg2[%2] : memref<18xi32, #tpu.memory_space<smem>>
    %4 = arith.index_cast %1 : i32 to index
    %5 = memref.load %arg3[%4] : memref<18xf32, #tpu.memory_space<smem>>
    %6 = arith.index_cast %1 : i32 to index
    %7 = memref.load %arg4[%6] : memref<18xf32, #tpu.memory_space<smem>>
    %c0 = arith.constant 0 : index
    %8 = arith.index_cast %3 : i32 to index
    %c0_0 = arith.constant 0 : index
    %c0_1 = arith.constant 0 : index
    %9 = vector.load %arg5[%c0, %8, %c0_0, %c0_1] : memref<1x8x18x128xbf16, #tpu.memory_space<vmem>>, vector<1x1x18x128xbf16>
    %10 = vector.shape_cast %9 : vector<1x1x18x128xbf16> to vector<1x18x128xbf16>
    %11 = arith.extf %10 : vector<1x18x128xbf16> to vector<1x18x128xf32>
    %12 = vector.broadcast %5 : f32 to vector<1x18x128xf32>
    %13 = arith.mulf %11, %12 : vector<1x18x128xf32>
    %c1_i32 = arith.constant 1 : i32
    %14 = arith.addi %3, %c1_i32 : i32
    %c0_2 = arith.constant 0 : index
    %15 = arith.index_cast %14 : i32 to index
    %c0_3 = arith.constant 0 : index
    %c0_4 = arith.constant 0 : index
    %16 = vector.load %arg5[%c0_2, %15, %c0_3, %c0_4] : memref<1x8x18x128xbf16, #tpu.memory_space<vmem>>, vector<1x1x18x128xbf16>
    %17 = vector.shape_cast %16 : vector<1x1x18x128xbf16> to vector<1x18x128xbf16>
    %18 = arith.extf %17 : vector<1x18x128xbf16> to vector<1x18x128xf32>
    %19 = vector.broadcast %7 : f32 to vector<1x18x128xf32>
    %20 = arith.mulf %18, %19 : vector<1x18x128xf32>
    %21 = arith.addf %13, %20 : vector<1x18x128xf32>
    %22 = arith.truncf %21 : vector<1x18x128xf32> to vector<1x18x128xbf16>
    %c0_5 = arith.constant 0 : index
    %c0_6 = arith.constant 0 : index
    %c0_7 = arith.constant 0 : index
    %23 = vector.load %arg8[%c0_5, %c0_6, %c0_7] : memref<18x18x128xbf16, #tpu.memory_space<vmem>>, vector<1x18x128xbf16>
    tpu.vector_store %arg8[%c0_5, %c0_6, %c0_7], %22 {strides = array<i32>} : memref<18x18x128xbf16, #tpu.memory_space<vmem>>, vector<1x18x128xbf16>,
    %c1_i32_8 = arith.constant 1 : i32
    %24 = arith.addi %0, %c1_i32_8 : i32
    %25 = arith.index_cast %24 : i32 to index
    %26 = memref.load %arg2[%25] : memref<18xi32, #tpu.memory_space<smem>>
    %27 = arith.index_cast %24 : i32 to index
    %28 = memref.load %arg3[%27] : memref<18xf32, #tpu.memory_space<smem>>
    %29 = arith.index_cast %24 : i32 to index
    %30 = memref.load %arg4[%29] : memref<18xf32, #tpu.memory_space<smem>>
    %c0_9 = arith.constant 0 : index
    %31 = arith.index_cast %26 : i32 to index
    %c0_10 = arith.constant 0 : index
    %c0_11 = arith.constant 0 : index
    %32 = vector.load %arg5[%c0_9, %31, %c0_10, %c0_11] : memref<1x8x18x128xbf16, #tpu.memory_space<vmem>>, vector<1x1x18x128xbf16>
    %33 = vector.shape_cast %32 : vector<1x1x18x128xbf16> to vector<1x18x128xbf16>
    %34 = arith.extf %33 : vector<1x18x128xbf16> to vector<1x18x128xf32>
    %35 = vector.broadcast %28 : f32 to vector<1x18x128xf32>
    %36 = arith.mulf %34, %35 : vector<1x18x128xf32>
    %c1_i32_12 = arith.constant 1 : i32
    %37 = arith.addi %26, %c1_i32_12 : i32
    %c0_13 = arith.constant 0 : index
    %38 = arith.index_cast %37 : i32 to index
    %c0_14 = arith.constant 0 : index
    %c0_15 = arith.constant 0 : index
    %39 = vector.load %arg5[%c0_13, %38, %c0_14, %c0_15] : memref<1x8x18x128xbf16, #tpu.memory_space<vmem>>, vector<1x1x18x128xbf16>
    %40 = vector.shape_cast %39 : vector<1x1x18x128xbf16> to vector<1x18x128xbf16>
    %41 = arith.extf %40 : vector<1x18x128xbf16> to vector<1x18x128xf32>
    %42 = vector.broadcast %30 : f32 to vector<1x18x128xf32>
    %43 = arith.mulf %41, %42 : vector<1x18x128xf32>
    %44 = arith.addf %36, %43 : vector<1x18x128xf32>
    %45 = arith.truncf %44 : vector<1x18x128xf32> to vector<1x18x128xbf16>
    %c1 = arith.constant 1 : index
    %c0_16 = arith.constant 0 : index
    %c0_17 = arith.constant 0 : index
    %46 = vector.load %arg8[%c1, %c0_16, %c0_17] : memref<18x18x128xbf16, #tpu.memory_space<vmem>>, vector<1x18x128xbf16>
    tpu.vector_store %arg8[%c1, %c0_16, %c0_17], %45 {strides = array<i32>} : memref<18x18x128xbf16, #tpu.memory_space<vmem>>, vector<1x18x128xbf16>,
    %c2_i32 = arith.constant 2 : i32
    %47 = arith.addi %0, %c2_i32 : i32
    %48 = arith.index_cast %47 : i32 to index
    %49 = memref.load %arg2[%48] : memref<18xi32, #tpu.memory_space<smem>>
    %50 = arith.index_cast %47 : i32 to index
    %51 = memref.load %arg3[%50] : memref<18xf32, #tpu.memory_space<smem>>
    %52 = arith.index_cast %47 : i32 to index
    %53 = memref.load %arg4[%52] : memref<18xf32, #tpu.memory_space<smem>>
    %c0_18 = arith.constant 0 : index
    %54 = arith.index_cast %49 : i32 to index
    %c0_19 = arith.constant 0 : index
    %c0_20 = arith.constant 0 : index
    %55 = vector.load %arg5[%c0_18, %54, %c0_19, %c0_20] : memref<1x8x18x128xbf16, #tpu.memory_space<vmem>>, vector<1x1x18x128xbf16>
    %56 = vector.shape_cast %55 : vector<1x1x18x128xbf16> to vector<1x18x128xbf16>
    %57 = arith.extf %56 : vector<1x18x128xbf16> to vector<1x18x128xf32>
    %58 = vector.broadcast %51 : f32 to vector<1x18x128xf32>
    %59 = arith.mulf %57, %58 : vector<1x18x128xf32>
    %c1_i32_21 = arith.constant 1 : i32
    %60 = arith.addi %49, %c1_i32_21 : i32
    %c0_22 = arith.constant 0 : index
    %61 = arith.index_cast %60 : i32 to index
    %c0_23 = arith.constant 0 : index
    %c0_24 = arith.constant 0 : index
    %62 = vector.load %arg5[%c0_22, %61, %c0_23, %c0_24] : memref<1x8x18x128xbf16, #tpu.memory_space<vmem>>, vector<1x1x18x128xbf16>
    %63 = vector.shape_cast %62 : vector<1x1x18x128xbf16> to vector<1x18x128xbf16>
    %64 = arith.extf %63 : vector<1x18x128xbf16> to vector<1x18x128xf32>
    %65 = vector.broadcast %53 : f32 to vector<1x18x128xf32>
    %66 = arith.mulf %64, %65 : vector<1x18x128xf32>
    %67 = arith.addf %59, %66 : vector<1x18x128xf32>
    %68 = arith.truncf %67 : vector<1x18x128xf32> to vector<1x18x128xbf16>
    %c2 = arith.constant 2 : index
    %c0_25 = arith.constant 0 : index
    %c0_26 = arith.constant 0 : index
    %69 = vector.load %arg8[%c2, %c0_25, %c0_26] : memref<18x18x128xbf16, #tpu.memory_space<vmem>>, vector<1x18x128xbf16>
    tpu.vector_store %arg8[%c2, %c0_25, %c0_26], %68 {strides = array<i32>} : memref<18x18x128xbf16, #tpu.memory_space<vmem>>, vector<1x18x128xbf16>,
    %c3_i32 = arith.constant 3 : i32
    %70 = arith.addi %0, %c3_i32 : i32
    %71 = arith.index_cast %70 : i32 to index
    %72 = memref.load %arg2[%71] : memref<18xi32, #tpu.memory_space<smem>>
    %73 = arith.index_cast %70 : i32 to index
    %74 = memref.load %arg3[%73] : memref<18xf32, #tpu.memory_space<smem>>
    %75 = arith.index_cast %70 : i32 to index
    %76 = memref.load %arg4[%75] : memref<18xf32, #tpu.memory_space<smem>>
    %c0_27 = arith.constant 0 : index
    %77 = arith.index_cast %72 : i32 to index
    %c0_28 = arith.constant 0 : index
    %c0_29 = arith.constant 0 : index
    %78 = vector.load %arg5[%c0_27, %77, %c0_28, %c0_29] : memref<1x8x18x128xbf16, #tpu.memory_space<vmem>>, vector<1x1x18x128xbf16>
    %79 = vector.shape_cast %78 : vector<1x1x18x128xbf16> to vector<1x18x128xbf16>
    %80 = arith.extf %79 : vector<1x18x128xbf16> to vector<1x18x128xf32>
    %81 = vector.broadcast %74 : f32 to vector<1x18x128xf32>
    %82 = arith.mulf %80, %81 : vector<1x18x128xf32>
    %c1_i32_30 = arith.constant 1 : i32
    %83 = arith.addi %72, %c1_i32_30 : i32
    %c0_31 = arith.constant 0 : index
    %84 = arith.index_cast %83 : i32 to index
    %c0_32 = arith.constant 0 : index
    %c0_33 = arith.constant 0 : index
    %85 = vector.load %arg5[%c0_31, %84, %c0_32, %c0_33] : memref<1x8x18x128xbf16, #tpu.memory_space<vmem>>, vector<1x1x18x128xbf16>
    %86 = vector.shape_cast %85 : vector<1x1x18x128xbf16> to vector<1x18x128xbf16>
    %87 = arith.extf %86 : vector<1x18x128xbf16> to vector<1x18x128xf32>
    %88 = vector.broadcast %76 : f32 to vector<1x18x128xf32>
    %89 = arith.mulf %87, %88 : vector<1x18x128xf32>
    %90 = arith.addf %82, %89 : vector<1x18x128xf32>
    %91 = arith.truncf %90 : vector<1x18x128xf32> to vector<1x18x128xbf16>
    %c3 = arith.constant 3 : index
    %c0_34 = arith.constant 0 : index
    %c0_35 = arith.constant 0 : index
    %92 = vector.load %arg8[%c3, %c0_34, %c0_35] : memref<18x18x128xbf16, #tpu.memory_space<vmem>>, vector<1x18x128xbf16>
    tpu.vector_store %arg8[%c3, %c0_34, %c0_35], %91 {strides = array<i32>} : memref<18x18x128xbf16, #tpu.memory_space<vmem>>, vector<1x18x128xbf16>,
    %c4_i32 = arith.constant 4 : i32
    %93 = arith.addi %0, %c4_i32 : i32
    %94 = arith.index_cast %93 : i32 to index
    %95 = memref.load %arg2[%94] : memref<18xi32, #tpu.memory_space<smem>>
    %96 = arith.index_cast %93 : i32 to index
    %97 = memref.load %arg3[%96] : memref<18xf32, #tpu.memory_space<smem>>
    %98 = arith.index_cast %93 : i32 to index
    %99 = memref.load %arg4[%98] : memref<18xf32, #tpu.memory_space<smem>>
    %c0_36 = arith.constant 0 : index
    %100 = arith.index_cast %95 : i32 to index
    %c0_37 = arith.constant 0 : index
    %c0_38 = arith.constant 0 : index
    %101 = vector.load %arg5[%c0_36, %100, %c0_37, %c0_38] : memref<1x8x18x128xbf16, #tpu.memory_space<vmem>>, vector<1x1x18x128xbf16>
    %102 = vector.shape_cast %101 : vector<1x1x18x128xbf16> to vector<1x18x128xbf16>
    %103 = arith.extf %102 : vector<1x18x128xbf16> to vector<1x18x128xf32>
    %104 = vector.broadcast %97 : f32 to vector<1x18x128xf32>
    %105 = arith.mulf %103, %104 : vector<1x18x128xf32>
    %c1_i32_39 = arith.constant 1 : i32
    %106 = arith.addi %95, %c1_i32_39 : i32
    %c0_40 = arith.constant 0 : index
    %107 = arith.index_cast %106 : i32 to index
    %c0_41 = arith.constant 0 : index
    %c0_42 = arith.constant 0 : index
    %108 = vector.load %arg5[%c0_40, %107, %c0_41, %c0_42] : memref<1x8x18x128xbf16, #tpu.memory_space<vmem>>, vector<1x1x18x128xbf16>
    %109 = vector.shape_cast %108 : vector<1x1x18x128xbf16> to vector<1x18x128xbf16>
    %110 = arith.extf %109 : vector<1x18x128xbf16> to vector<1x18x128xf32>
    %111 = vector.broadcast %99 : f32 to vector<1x18x128xf32>
    %112 = arith.mulf %110, %111 : vector<1x18x128xf32>
    %113 = arith.addf %105, %112 : vector<1x18x128xf32>
    %114 = arith.truncf %113 : vector<1x18x128xf32> to vector<1x18x128xbf16>
    %c4 = arith.constant 4 : index
    %c0_43 = arith.constant 0 : index
    %c0_44 = arith.constant 0 : index
    %115 = vector.load %arg8[%c4, %c0_43, %c0_44] : memref<18x18x128xbf16, #tpu.memory_space<vmem>>, vector<1x18x128xbf16>
    tpu.vector_store %arg8[%c4, %c0_43, %c0_44], %114 {strides = array<i32>} : memref<18x18x128xbf16, #tpu.memory_space<vmem>>, vector<1x18x128xbf16>,
    %c5_i32 = arith.constant 5 : i32
    %116 = arith.addi %0, %c5_i32 : i32
    %117 = arith.index_cast %116 : i32 to index
    %118 = memref.load %arg2[%117] : memref<18xi32, #tpu.memory_space<smem>>
    %119 = arith.index_cast %116 : i32 to index
    %120 = memref.load %arg3[%119] : memref<18xf32, #tpu.memory_space<smem>>
    %121 = arith.index_cast %116 : i32 to index
    %122 = memref.load %arg4[%121] : memref<18xf32, #tpu.memory_space<smem>>
    %c0_45 = arith.constant 0 : index
    %123 = arith.index_cast %118 : i32 to index
    %c0_46 = arith.constant 0 : index
    %c0_47 = arith.constant 0 : index
    %124 = vector.load %arg5[%c0_45, %123, %c0_46, %c0_47] : memref<1x8x18x128xbf16, #tpu.memory_space<vmem>>, vector<1x1x18x128xbf16>
    %125 = vector.shape_cast %124 : vector<1x1x18x128xbf16> to vector<1x18x128xbf16>
    %126 = arith.extf %125 : vector<1x18x128xbf16> to vector<1x18x128xf32>
    %127 = vector.broadcast %120 : f32 to vector<1x18x128xf32>
    %128 = arith.mulf %126, %127 : vector<1x18x128xf32>
    %c1_i32_48 = arith.constant 1 : i32
    %129 = arith.addi %118, %c1_i32_48 : i32
    %c0_49 = arith.constant 0 : index
    %130 = arith.index_cast %129 : i32 to index
    %c0_50 = arith.constant 0 : index
    %c0_51 = arith.constant 0 : index
    %131 = vector.load %arg5[%c0_49, %130, %c0_50, %c0_51] : memref<1x8x18x128xbf16, #tpu.memory_space<vmem>>, vector<1x1x18x128xbf16>
    %132 = vector.shape_cast %131 : vector<1x1x18x128xbf16> to vector<1x18x128xbf16>
    %133 = arith.extf %132 : vector<1x18x128xbf16> to vector<1x18x128xf32>
    %134 = vector.broadcast %122 : f32 to vector<1x18x128xf32>
    %135 = arith.mulf %133, %134 : vector<1x18x128xf32>
    %136 = arith.addf %128, %135 : vector<1x18x128xf32>
    %137 = arith.truncf %136 : vector<1x18x128xf32> to vector<1x18x128xbf16>
    %c5 = arith.constant 5 : index
    %c0_52 = arith.constant 0 : index
    %c0_53 = arith.constant 0 : index
    %138 = vector.load %arg8[%c5, %c0_52, %c0_53] : memref<18x18x128xbf16, #tpu.memory_space<vmem>>, vector<1x18x128xbf16>
    tpu.vector_store %arg8[%c5, %c0_52, %c0_53], %137 {strides = array<i32>} : memref<18x18x128xbf16, #tpu.memory_space<vmem>>, vector<1x18x128xbf16>,
    %c6_i32 = arith.constant 6 : i32
    %139 = arith.addi %0, %c6_i32 : i32
    %140 = arith.index_cast %139 : i32 to index
    %141 = memref.load %arg2[%140] : memref<18xi32, #tpu.memory_space<smem>>
    %142 = arith.index_cast %139 : i32 to index
    %143 = memref.load %arg3[%142] : memref<18xf32, #tpu.memory_space<smem>>
    %144 = arith.index_cast %139 : i32 to index
    %145 = memref.load %arg4[%144] : memref<18xf32, #tpu.memory_space<smem>>
    %c0_54 = arith.constant 0 : index
    %146 = arith.index_cast %141 : i32 to index
    %c0_55 = arith.constant 0 : index
    %c0_56 = arith.constant 0 : index
    %147 = vector.load %arg5[%c0_54, %146, %c0_55, %c0_56] : memref<1x8x18x128xbf16, #tpu.memory_space<vmem>>, vector<1x1x18x128xbf16>
    %148 = vector.shape_cast %147 : vector<1x1x18x128xbf16> to vector<1x18x128xbf16>
    %149 = arith.extf %148 : vector<1x18x128xbf16> to vector<1x18x128xf32>
    %150 = vector.broadcast %143 : f32 to vector<1x18x128xf32>
    %151 = arith.mulf %149, %150 : vector<1x18x128xf32>
    %c1_i32_57 = arith.constant 1 : i32
    %152 = arith.addi %141, %c1_i32_57 : i32
    %c0_58 = arith.constant 0 : index
    %153 = arith.index_cast %152 : i32 to index
    %c0_59 = arith.constant 0 : index
    %c0_60 = arith.constant 0 : index
    %154 = vector.load %arg5[%c0_58, %153, %c0_59, %c0_60] : memref<1x8x18x128xbf16, #tpu.memory_space<vmem>>, vector<1x1x18x128xbf16>
    %155 = vector.shape_cast %154 : vector<1x1x18x128xbf16> to vector<1x18x128xbf16>
    %156 = arith.extf %155 : vector<1x18x128xbf16> to vector<1x18x128xf32>
    %157 = vector.broadcast %145 : f32 to vector<1x18x128xf32>
    %158 = arith.mulf %156, %157 : vector<1x18x128xf32>
    %159 = arith.addf %151, %158 : vector<1x18x128xf32>
    %160 = arith.truncf %159 : vector<1x18x128xf32> to vector<1x18x128xbf16>
    %c6 = arith.constant 6 : index
    %c0_61 = arith.constant 0 : index
    %c0_62 = arith.constant 0 : index
    %161 = vector.load %arg8[%c6, %c0_61, %c0_62] : memref<18x18x128xbf16, #tpu.memory_space<vmem>>, vector<1x18x128xbf16>
    tpu.vector_store %arg8[%c6, %c0_61, %c0_62], %160 {strides = array<i32>} : memref<18x18x128xbf16, #tpu.memory_space<vmem>>, vector<1x18x128xbf16>,
    %c7_i32 = arith.constant 7 : i32
    %162 = arith.addi %0, %c7_i32 : i32
    %163 = arith.index_cast %162 : i32 to index
    %164 = memref.load %arg2[%163] : memref<18xi32, #tpu.memory_space<smem>>
    %165 = arith.index_cast %162 : i32 to index
    %166 = memref.load %arg3[%165] : memref<18xf32, #tpu.memory_space<smem>>
    %167 = arith.index_cast %162 : i32 to index
    %168 = memref.load %arg4[%167] : memref<18xf32, #tpu.memory_space<smem>>
    %c0_63 = arith.constant 0 : index
    %169 = arith.index_cast %164 : i32 to index
    %c0_64 = arith.constant 0 : index
    %c0_65 = arith.constant 0 : index
    %170 = vector.load %arg5[%c0_63, %169, %c0_64, %c0_65] : memref<1x8x18x128xbf16, #tpu.memory_space<vmem>>, vector<1x1x18x128xbf16>
    %171 = vector.shape_cast %170 : vector<1x1x18x128xbf16> to vector<1x18x128xbf16>
    %172 = arith.extf %171 : vector<1x18x128xbf16> to vector<1x18x128xf32>
    %173 = vector.broadcast %166 : f32 to vector<1x18x128xf32>
    %174 = arith.mulf %172, %173 : vector<1x18x128xf32>
    %c1_i32_66 = arith.constant 1 : i32
    %175 = arith.addi %164, %c1_i32_66 : i32
    %c0_67 = arith.constant 0 : index
    %176 = arith.index_cast %175 : i32 to index
    %c0_68 = arith.constant 0 : index
    %c0_69 = arith.constant 0 : index
    %177 = vector.load %arg5[%c0_67, %176, %c0_68, %c0_69] : memref<1x8x18x128xbf16, #tpu.memory_space<vmem>>, vector<1x1x18x128xbf16>
    %178 = vector.shape_cast %177 : vector<1x1x18x128xbf16> to vector<1x18x128xbf16>
    %179 = arith.extf %178 : vector<1x18x128xbf16> to vector<1x18x128xf32>
    %180 = vector.broadcast %168 : f32 to vector<1x18x128xf32>
    %181 = arith.mulf %179, %180 : vector<1x18x128xf32>
    %182 = arith.addf %174, %181 : vector<1x18x128xf32>
    %183 = arith.truncf %182 : vector<1x18x128xf32> to vector<1x18x128xbf16>
    %c7 = arith.constant 7 : index
    %c0_70 = arith.constant 0 : index
    %c0_71 = arith.constant 0 : index
    %184 = vector.load %arg8[%c7, %c0_70, %c0_71] : memref<18x18x128xbf16, #tpu.memory_space<vmem>>, vector<1x18x128xbf16>
    tpu.vector_store %arg8[%c7, %c0_70, %c0_71], %183 {strides = array<i32>} : memref<18x18x128xbf16, #tpu.memory_space<vmem>>, vector<1x18x128xbf16>,
    %c8_i32 = arith.constant 8 : i32
    %185 = arith.addi %0, %c8_i32 : i32
    %186 = arith.index_cast %185 : i32 to index
    %187 = memref.load %arg2[%186] : memref<18xi32, #tpu.memory_space<smem>>
    %188 = arith.index_cast %185 : i32 to index
    %189 = memref.load %arg3[%188] : memref<18xf32, #tpu.memory_space<smem>>
    %190 = arith.index_cast %185 : i32 to index
    %191 = memref.load %arg4[%190] : memref<18xf32, #tpu.memory_space<smem>>
    %c0_72 = arith.constant 0 : index
    %192 = arith.index_cast %187 : i32 to index
    %c0_73 = arith.constant 0 : index
    %c0_74 = arith.constant 0 : index
    %193 = vector.load %arg5[%c0_72, %192, %c0_73, %c0_74] : memref<1x8x18x128xbf16, #tpu.memory_space<vmem>>, vector<1x1x18x128xbf16>
    %194 = vector.shape_cast %193 : vector<1x1x18x128xbf16> to vector<1x18x128xbf16>
    %195 = arith.extf %194 : vector<1x18x128xbf16> to vector<1x18x128xf32>
    %196 = vector.broadcast %189 : f32 to vector<1x18x128xf32>
    %197 = arith.mulf %195, %196 : vector<1x18x128xf32>
    %c1_i32_75 = arith.constant 1 : i32
    %198 = arith.addi %187, %c1_i32_75 : i32
    %c0_76 = arith.constant 0 : index
    %199 = arith.index_cast %198 : i32 to index
    %c0_77 = arith.constant 0 : index
    %c0_78 = arith.constant 0 : index
    %200 = vector.load %arg5[%c0_76, %199, %c0_77, %c0_78] : memref<1x8x18x128xbf16, #tpu.memory_space<vmem>>, vector<1x1x18x128xbf16>
    %201 = vector.shape_cast %200 : vector<1x1x18x128xbf16> to vector<1x18x128xbf16>
    %202 = arith.extf %201 : vector<1x18x128xbf16> to vector<1x18x128xf32>
    %203 = vector.broadcast %191 : f32 to vector<1x18x128xf32>
    %204 = arith.mulf %202, %203 : vector<1x18x128xf32>
    %205 = arith.addf %197, %204 : vector<1x18x128xf32>
    %206 = arith.truncf %205 : vector<1x18x128xf32> to vector<1x18x128xbf16>
    %c8 = arith.constant 8 : index
    %c0_79 = arith.constant 0 : index
    %c0_80 = arith.constant 0 : index
    %207 = vector.load %arg8[%c8, %c0_79, %c0_80] : memref<18x18x128xbf16, #tpu.memory_space<vmem>>, vector<1x18x128xbf16>
    tpu.vector_store %arg8[%c8, %c0_79, %c0_80], %206 {strides = array<i32>} : memref<18x18x128xbf16, #tpu.memory_space<vmem>>, vector<1x18x128xbf16>,
    %c9_i32 = arith.constant 9 : i32
    %208 = arith.addi %0, %c9_i32 : i32
    %209 = arith.index_cast %208 : i32 to index
    %210 = memref.load %arg2[%209] : memref<18xi32, #tpu.memory_space<smem>>
    %211 = arith.index_cast %208 : i32 to index
    %212 = memref.load %arg3[%211] : memref<18xf32, #tpu.memory_space<smem>>
    %213 = arith.index_cast %208 : i32 to index
    %214 = memref.load %arg4[%213] : memref<18xf32, #tpu.memory_space<smem>>
    %c0_81 = arith.constant 0 : index
    %215 = arith.index_cast %210 : i32 to index
    %c0_82 = arith.constant 0 : index
    %c0_83 = arith.constant 0 : index
    %216 = vector.load %arg5[%c0_81, %215, %c0_82, %c0_83] : memref<1x8x18x128xbf16, #tpu.memory_space<vmem>>, vector<1x1x18x128xbf16>
    %217 = vector.shape_cast %216 : vector<1x1x18x128xbf16> to vector<1x18x128xbf16>
    %218 = arith.extf %217 : vector<1x18x128xbf16> to vector<1x18x128xf32>
    %219 = vector.broadcast %212 : f32 to vector<1x18x128xf32>
    %220 = arith.mulf %218, %219 : vector<1x18x128xf32>
    %c1_i32_84 = arith.constant 1 : i32
    %221 = arith.addi %210, %c1_i32_84 : i32
    %c0_85 = arith.constant 0 : index
    %222 = arith.index_cast %221 : i32 to index
    %c0_86 = arith.constant 0 : index
    %c0_87 = arith.constant 0 : index
    %223 = vector.load %arg5[%c0_85, %222, %c0_86, %c0_87] : memref<1x8x18x128xbf16, #tpu.memory_space<vmem>>, vector<1x1x18x128xbf16>
    %224 = vector.shape_cast %223 : vector<1x1x18x128xbf16> to vector<1x18x128xbf16>
    %225 = arith.extf %224 : vector<1x18x128xbf16> to vector<1x18x128xf32>
    %226 = vector.broadcast %214 : f32 to vector<1x18x128xf32>
    %227 = arith.mulf %225, %226 : vector<1x18x128xf32>
    %228 = arith.addf %220, %227 : vector<1x18x128xf32>
    %229 = arith.truncf %228 : vector<1x18x128xf32> to vector<1x18x128xbf16>
    %c9 = arith.constant 9 : index
    %c0_88 = arith.constant 0 : index
    %c0_89 = arith.constant 0 : index
    %230 = vector.load %arg8[%c9, %c0_88, %c0_89] : memref<18x18x128xbf16, #tpu.memory_space<vmem>>, vector<1x18x128xbf16>
    tpu.vector_store %arg8[%c9, %c0_88, %c0_89], %229 {strides = array<i32>} : memref<18x18x128xbf16, #tpu.memory_space<vmem>>, vector<1x18x128xbf16>,
    %c10_i32 = arith.constant 10 : i32
    %231 = arith.addi %0, %c10_i32 : i32
    %232 = arith.index_cast %231 : i32 to index
    %233 = memref.load %arg2[%232] : memref<18xi32, #tpu.memory_space<smem>>
    %234 = arith.index_cast %231 : i32 to index
    %235 = memref.load %arg3[%234] : memref<18xf32, #tpu.memory_space<smem>>
    %236 = arith.index_cast %231 : i32 to index
    %237 = memref.load %arg4[%236] : memref<18xf32, #tpu.memory_space<smem>>
    %c0_90 = arith.constant 0 : index
    %238 = arith.index_cast %233 : i32 to index
    %c0_91 = arith.constant 0 : index
    %c0_92 = arith.constant 0 : index
    %239 = vector.load %arg5[%c0_90, %238, %c0_91, %c0_92] : memref<1x8x18x128xbf16, #tpu.memory_space<vmem>>, vector<1x1x18x128xbf16>
    %240 = vector.shape_cast %239 : vector<1x1x18x128xbf16> to vector<1x18x128xbf16>
    %241 = arith.extf %240 : vector<1x18x128xbf16> to vector<1x18x128xf32>
    %242 = vector.broadcast %235 : f32 to vector<1x18x128xf32>
    %243 = arith.mulf %241, %242 : vector<1x18x128xf32>
    %c1_i32_93 = arith.constant 1 : i32
    %244 = arith.addi %233, %c1_i32_93 : i32
    %c0_94 = arith.constant 0 : index
    %245 = arith.index_cast %244 : i32 to index
    %c0_95 = arith.constant 0 : index
    %c0_96 = arith.constant 0 : index
    %246 = vector.load %arg5[%c0_94, %245, %c0_95, %c0_96] : memref<1x8x18x128xbf16, #tpu.memory_space<vmem>>, vector<1x1x18x128xbf16>
    %247 = vector.shape_cast %246 : vector<1x1x18x128xbf16> to vector<1x18x128xbf16>
    %248 = arith.extf %247 : vector<1x18x128xbf16> to vector<1x18x128xf32>
    %249 = vector.broadcast %237 : f32 to vector<1x18x128xf32>
    %250 = arith.mulf %248, %249 : vector<1x18x128xf32>
    %251 = arith.addf %243, %250 : vector<1x18x128xf32>
    %252 = arith.truncf %251 : vector<1x18x128xf32> to vector<1x18x128xbf16>
    %c10 = arith.constant 10 : index
    %c0_97 = arith.constant 0 : index
    %c0_98 = arith.constant 0 : index
    %253 = vector.load %arg8[%c10, %c0_97, %c0_98] : memref<18x18x128xbf16, #tpu.memory_space<vmem>>, vector<1x18x128xbf16>
    tpu.vector_store %arg8[%c10, %c0_97, %c0_98], %252 {strides = array<i32>} : memref<18x18x128xbf16, #tpu.memory_space<vmem>>, vector<1x18x128xbf16>,
    %c11_i32 = arith.constant 11 : i32
    %254 = arith.addi %0, %c11_i32 : i32
    %255 = arith.index_cast %254 : i32 to index
    %256 = memref.load %arg2[%255] : memref<18xi32, #tpu.memory_space<smem>>
    %257 = arith.index_cast %254 : i32 to index
    %258 = memref.load %arg3[%257] : memref<18xf32, #tpu.memory_space<smem>>
    %259 = arith.index_cast %254 : i32 to index
    %260 = memref.load %arg4[%259] : memref<18xf32, #tpu.memory_space<smem>>
    %c0_99 = arith.constant 0 : index
    %261 = arith.index_cast %256 : i32 to index
    %c0_100 = arith.constant 0 : index
    %c0_101 = arith.constant 0 : index
    %262 = vector.load %arg5[%c0_99, %261, %c0_100, %c0_101] : memref<1x8x18x128xbf16, #tpu.memory_space<vmem>>, vector<1x1x18x128xbf16>
    %263 = vector.shape_cast %262 : vector<1x1x18x128xbf16> to vector<1x18x128xbf16>
    %264 = arith.extf %263 : vector<1x18x128xbf16> to vector<1x18x128xf32>
    %265 = vector.broadcast %258 : f32 to vector<1x18x128xf32>
    %266 = arith.mulf %264, %265 : vector<1x18x128xf32>
    %c1_i32_102 = arith.constant 1 : i32
    %267 = arith.addi %256, %c1_i32_102 : i32
    %c0_103 = arith.constant 0 : index
    %268 = arith.index_cast %267 : i32 to index
    %c0_104 = arith.constant 0 : index
    %c0_105 = arith.constant 0 : index
    %269 = vector.load %arg5[%c0_103, %268, %c0_104, %c0_105] : memref<1x8x18x128xbf16, #tpu.memory_space<vmem>>, vector<1x1x18x128xbf16>
    %270 = vector.shape_cast %269 : vector<1x1x18x128xbf16> to vector<1x18x128xbf16>
    %271 = arith.extf %270 : vector<1x18x128xbf16> to vector<1x18x128xf32>
    %272 = vector.broadcast %260 : f32 to vector<1x18x128xf32>
    %273 = arith.mulf %271, %272 : vector<1x18x128xf32>
    %274 = arith.addf %266, %273 : vector<1x18x128xf32>
    %275 = arith.truncf %274 : vector<1x18x128xf32> to vector<1x18x128xbf16>
    %c11 = arith.constant 11 : index
    %c0_106 = arith.constant 0 : index
    %c0_107 = arith.constant 0 : index
    %276 = vector.load %arg8[%c11, %c0_106, %c0_107] : memref<18x18x128xbf16, #tpu.memory_space<vmem>>, vector<1x18x128xbf16>
    tpu.vector_store %arg8[%c11, %c0_106, %c0_107], %275 {strides = array<i32>} : memref<18x18x128xbf16, #tpu.memory_space<vmem>>, vector<1x18x128xbf16>,
    %c12_i32 = arith.constant 12 : i32
    %277 = arith.addi %0, %c12_i32 : i32
    %278 = arith.index_cast %277 : i32 to index
    %279 = memref.load %arg2[%278] : memref<18xi32, #tpu.memory_space<smem>>
    %280 = arith.index_cast %277 : i32 to index
    %281 = memref.load %arg3[%280] : memref<18xf32, #tpu.memory_space<smem>>
    %282 = arith.index_cast %277 : i32 to index
    %283 = memref.load %arg4[%282] : memref<18xf32, #tpu.memory_space<smem>>
    %c0_108 = arith.constant 0 : index
    %284 = arith.index_cast %279 : i32 to index
    %c0_109 = arith.constant 0 : index
    %c0_110 = arith.constant 0 : index
    %285 = vector.load %arg5[%c0_108, %284, %c0_109, %c0_110] : memref<1x8x18x128xbf16, #tpu.memory_space<vmem>>, vector<1x1x18x128xbf16>
    %286 = vector.shape_cast %285 : vector<1x1x18x128xbf16> to vector<1x18x128xbf16>
    %287 = arith.extf %286 : vector<1x18x128xbf16> to vector<1x18x128xf32>
    %288 = vector.broadcast %281 : f32 to vector<1x18x128xf32>
    %289 = arith.mulf %287, %288 : vector<1x18x128xf32>
    %c1_i32_111 = arith.constant 1 : i32
    %290 = arith.addi %279, %c1_i32_111 : i32
    %c0_112 = arith.constant 0 : index
    %291 = arith.index_cast %290 : i32 to index
    %c0_113 = arith.constant 0 : index
    %c0_114 = arith.constant 0 : index
    %292 = vector.load %arg5[%c0_112, %291, %c0_113, %c0_114] : memref<1x8x18x128xbf16, #tpu.memory_space<vmem>>, vector<1x1x18x128xbf16>
    %293 = vector.shape_cast %292 : vector<1x1x18x128xbf16> to vector<1x18x128xbf16>
    %294 = arith.extf %293 : vector<1x18x128xbf16> to vector<1x18x128xf32>
    %295 = vector.broadcast %283 : f32 to vector<1x18x128xf32>
    %296 = arith.mulf %294, %295 : vector<1x18x128xf32>
    %297 = arith.addf %289, %296 : vector<1x18x128xf32>
    %298 = arith.truncf %297 : vector<1x18x128xf32> to vector<1x18x128xbf16>
    %c12 = arith.constant 12 : index
    %c0_115 = arith.constant 0 : index
    %c0_116 = arith.constant 0 : index
    %299 = vector.load %arg8[%c12, %c0_115, %c0_116] : memref<18x18x128xbf16, #tpu.memory_space<vmem>>, vector<1x18x128xbf16>
    tpu.vector_store %arg8[%c12, %c0_115, %c0_116], %298 {strides = array<i32>} : memref<18x18x128xbf16, #tpu.memory_space<vmem>>, vector<1x18x128xbf16>,
    %c13_i32 = arith.constant 13 : i32
    %300 = arith.addi %0, %c13_i32 : i32
    %301 = arith.index_cast %300 : i32 to index
    %302 = memref.load %arg2[%301] : memref<18xi32, #tpu.memory_space<smem>>
    %303 = arith.index_cast %300 : i32 to index
    %304 = memref.load %arg3[%303] : memref<18xf32, #tpu.memory_space<smem>>
    %305 = arith.index_cast %300 : i32 to index
    %306 = memref.load %arg4[%305] : memref<18xf32, #tpu.memory_space<smem>>
    %c0_117 = arith.constant 0 : index
    %307 = arith.index_cast %302 : i32 to index
    %c0_118 = arith.constant 0 : index
    %c0_119 = arith.constant 0 : index
    %308 = vector.load %arg5[%c0_117, %307, %c0_118, %c0_119] : memref<1x8x18x128xbf16, #tpu.memory_space<vmem>>, vector<1x1x18x128xbf16>
    %309 = vector.shape_cast %308 : vector<1x1x18x128xbf16> to vector<1x18x128xbf16>
    %310 = arith.extf %309 : vector<1x18x128xbf16> to vector<1x18x128xf32>
    %311 = vector.broadcast %304 : f32 to vector<1x18x128xf32>
    %312 = arith.mulf %310, %311 : vector<1x18x128xf32>
    %c1_i32_120 = arith.constant 1 : i32
    %313 = arith.addi %302, %c1_i32_120 : i32
    %c0_121 = arith.constant 0 : index
    %314 = arith.index_cast %313 : i32 to index
    %c0_122 = arith.constant 0 : index
    %c0_123 = arith.constant 0 : index
    %315 = vector.load %arg5[%c0_121, %314, %c0_122, %c0_123] : memref<1x8x18x128xbf16, #tpu.memory_space<vmem>>, vector<1x1x18x128xbf16>
    %316 = vector.shape_cast %315 : vector<1x1x18x128xbf16> to vector<1x18x128xbf16>
    %317 = arith.extf %316 : vector<1x18x128xbf16> to vector<1x18x128xf32>
    %318 = vector.broadcast %306 : f32 to vector<1x18x128xf32>
    %319 = arith.mulf %317, %318 : vector<1x18x128xf32>
    %320 = arith.addf %312, %319 : vector<1x18x128xf32>
    %321 = arith.truncf %320 : vector<1x18x128xf32> to vector<1x18x128xbf16>
    %c13 = arith.constant 13 : index
    %c0_124 = arith.constant 0 : index
    %c0_125 = arith.constant 0 : index
    %322 = vector.load %arg8[%c13, %c0_124, %c0_125] : memref<18x18x128xbf16, #tpu.memory_space<vmem>>, vector<1x18x128xbf16>
    tpu.vector_store %arg8[%c13, %c0_124, %c0_125], %321 {strides = array<i32>} : memref<18x18x128xbf16, #tpu.memory_space<vmem>>, vector<1x18x128xbf16>,
    %c14_i32 = arith.constant 14 : i32
    %323 = arith.addi %0, %c14_i32 : i32
    %324 = arith.index_cast %323 : i32 to index
    %325 = memref.load %arg2[%324] : memref<18xi32, #tpu.memory_space<smem>>
    %326 = arith.index_cast %323 : i32 to index
    %327 = memref.load %arg3[%326] : memref<18xf32, #tpu.memory_space<smem>>
    %328 = arith.index_cast %323 : i32 to index
    %329 = memref.load %arg4[%328] : memref<18xf32, #tpu.memory_space<smem>>
    %c0_126 = arith.constant 0 : index
    %330 = arith.index_cast %325 : i32 to index
    %c0_127 = arith.constant 0 : index
    %c0_128 = arith.constant 0 : index
    %331 = vector.load %arg5[%c0_126, %330, %c0_127, %c0_128] : memref<1x8x18x128xbf16, #tpu.memory_space<vmem>>, vector<1x1x18x128xbf16>
    %332 = vector.shape_cast %331 : vector<1x1x18x128xbf16> to vector<1x18x128xbf16>
    %333 = arith.extf %332 : vector<1x18x128xbf16> to vector<1x18x128xf32>
    %334 = vector.broadcast %327 : f32 to vector<1x18x128xf32>
    %335 = arith.mulf %333, %334 : vector<1x18x128xf32>
    %c1_i32_129 = arith.constant 1 : i32
    %336 = arith.addi %325, %c1_i32_129 : i32
    %c0_130 = arith.constant 0 : index
    %337 = arith.index_cast %336 : i32 to index
    %c0_131 = arith.constant 0 : index
    %c0_132 = arith.constant 0 : index
    %338 = vector.load %arg5[%c0_130, %337, %c0_131, %c0_132] : memref<1x8x18x128xbf16, #tpu.memory_space<vmem>>, vector<1x1x18x128xbf16>
    %339 = vector.shape_cast %338 : vector<1x1x18x128xbf16> to vector<1x18x128xbf16>
    %340 = arith.extf %339 : vector<1x18x128xbf16> to vector<1x18x128xf32>
    %341 = vector.broadcast %329 : f32 to vector<1x18x128xf32>
    %342 = arith.mulf %340, %341 : vector<1x18x128xf32>
    %343 = arith.addf %335, %342 : vector<1x18x128xf32>
    %344 = arith.truncf %343 : vector<1x18x128xf32> to vector<1x18x128xbf16>
    %c14 = arith.constant 14 : index
    %c0_133 = arith.constant 0 : index
    %c0_134 = arith.constant 0 : index
    %345 = vector.load %arg8[%c14, %c0_133, %c0_134] : memref<18x18x128xbf16, #tpu.memory_space<vmem>>, vector<1x18x128xbf16>
    tpu.vector_store %arg8[%c14, %c0_133, %c0_134], %344 {strides = array<i32>} : memref<18x18x128xbf16, #tpu.memory_space<vmem>>, vector<1x18x128xbf16>,
    %c15_i32 = arith.constant 15 : i32
    %346 = arith.addi %0, %c15_i32 : i32
    %347 = arith.index_cast %346 : i32 to index
    %348 = memref.load %arg2[%347] : memref<18xi32, #tpu.memory_space<smem>>
    %349 = arith.index_cast %346 : i32 to index
    %350 = memref.load %arg3[%349] : memref<18xf32, #tpu.memory_space<smem>>
    %351 = arith.index_cast %346 : i32 to index
    %352 = memref.load %arg4[%351] : memref<18xf32, #tpu.memory_space<smem>>
    %c0_135 = arith.constant 0 : index
    %353 = arith.index_cast %348 : i32 to index
    %c0_136 = arith.constant 0 : index
    %c0_137 = arith.constant 0 : index
    %354 = vector.load %arg5[%c0_135, %353, %c0_136, %c0_137] : memref<1x8x18x128xbf16, #tpu.memory_space<vmem>>, vector<1x1x18x128xbf16>
    %355 = vector.shape_cast %354 : vector<1x1x18x128xbf16> to vector<1x18x128xbf16>
    %356 = arith.extf %355 : vector<1x18x128xbf16> to vector<1x18x128xf32>
    %357 = vector.broadcast %350 : f32 to vector<1x18x128xf32>
    %358 = arith.mulf %356, %357 : vector<1x18x128xf32>
    %c1_i32_138 = arith.constant 1 : i32
    %359 = arith.addi %348, %c1_i32_138 : i32
    %c0_139 = arith.constant 0 : index
    %360 = arith.index_cast %359 : i32 to index
    %c0_140 = arith.constant 0 : index
    %c0_141 = arith.constant 0 : index
    %361 = vector.load %arg5[%c0_139, %360, %c0_140, %c0_141] : memref<1x8x18x128xbf16, #tpu.memory_space<vmem>>, vector<1x1x18x128xbf16>
    %362 = vector.shape_cast %361 : vector<1x1x18x128xbf16> to vector<1x18x128xbf16>
    %363 = arith.extf %362 : vector<1x18x128xbf16> to vector<1x18x128xf32>
    %364 = vector.broadcast %352 : f32 to vector<1x18x128xf32>
    %365 = arith.mulf %363, %364 : vector<1x18x128xf32>
    %366 = arith.addf %358, %365 : vector<1x18x128xf32>
    %367 = arith.truncf %366 : vector<1x18x128xf32> to vector<1x18x128xbf16>
    %c15 = arith.constant 15 : index
    %c0_142 = arith.constant 0 : index
    %c0_143 = arith.constant 0 : index
    %368 = vector.load %arg8[%c15, %c0_142, %c0_143] : memref<18x18x128xbf16, #tpu.memory_space<vmem>>, vector<1x18x128xbf16>
    tpu.vector_store %arg8[%c15, %c0_142, %c0_143], %367 {strides = array<i32>} : memref<18x18x128xbf16, #tpu.memory_space<vmem>>, vector<1x18x128xbf16>,
    %c16_i32_144 = arith.constant 16 : i32
    %369 = arith.addi %0, %c16_i32_144 : i32
    %370 = arith.index_cast %369 : i32 to index
    %371 = memref.load %arg2[%370] : memref<18xi32, #tpu.memory_space<smem>>
    %372 = arith.index_cast %369 : i32 to index
    %373 = memref.load %arg3[%372] : memref<18xf32, #tpu.memory_space<smem>>
    %374 = arith.index_cast %369 : i32 to index
    %375 = memref.load %arg4[%374] : memref<18xf32, #tpu.memory_space<smem>>
    %c0_145 = arith.constant 0 : index
    %376 = arith.index_cast %371 : i32 to index
    %c0_146 = arith.constant 0 : index
    %c0_147 = arith.constant 0 : index
    %377 = vector.load %arg5[%c0_145, %376, %c0_146, %c0_147] : memref<1x8x18x128xbf16, #tpu.memory_space<vmem>>, vector<1x1x18x128xbf16>
    %378 = vector.shape_cast %377 : vector<1x1x18x128xbf16> to vector<1x18x128xbf16>
    %379 = arith.extf %378 : vector<1x18x128xbf16> to vector<1x18x128xf32>
    %380 = vector.broadcast %373 : f32 to vector<1x18x128xf32>
    %381 = arith.mulf %379, %380 : vector<1x18x128xf32>
    %c1_i32_148 = arith.constant 1 : i32
    %382 = arith.addi %371, %c1_i32_148 : i32
    %c0_149 = arith.constant 0 : index
    %383 = arith.index_cast %382 : i32 to index
    %c0_150 = arith.constant 0 : index
    %c0_151 = arith.constant 0 : index
    %384 = vector.load %arg5[%c0_149, %383, %c0_150, %c0_151] : memref<1x8x18x128xbf16, #tpu.memory_space<vmem>>, vector<1x1x18x128xbf16>
    %385 = vector.shape_cast %384 : vector<1x1x18x128xbf16> to vector<1x18x128xbf16>
    %386 = arith.extf %385 : vector<1x18x128xbf16> to vector<1x18x128xf32>
    %387 = vector.broadcast %375 : f32 to vector<1x18x128xf32>
    %388 = arith.mulf %386, %387 : vector<1x18x128xf32>
    %389 = arith.addf %381, %388 : vector<1x18x128xf32>
    %390 = arith.truncf %389 : vector<1x18x128xf32> to vector<1x18x128xbf16>
    %c16 = arith.constant 16 : index
    %c0_152 = arith.constant 0 : index
    %c0_153 = arith.constant 0 : index
    %391 = vector.load %arg8[%c16, %c0_152, %c0_153] : memref<18x18x128xbf16, #tpu.memory_space<vmem>>, vector<1x18x128xbf16>
    tpu.vector_store %arg8[%c16, %c0_152, %c0_153], %390 {strides = array<i32>} : memref<18x18x128xbf16, #tpu.memory_space<vmem>>, vector<1x18x128xbf16>,
    %c17_i32 = arith.constant 17 : i32
    %392 = arith.addi %0, %c17_i32 : i32
    %393 = arith.index_cast %392 : i32 to index
    %394 = memref.load %arg2[%393] : memref<18xi32, #tpu.memory_space<smem>>
    %395 = arith.index_cast %392 : i32 to index
    %396 = memref.load %arg3[%395] : memref<18xf32, #tpu.memory_space<smem>>
    %397 = arith.index_cast %392 : i32 to index
    %398 = memref.load %arg4[%397] : memref<18xf32, #tpu.memory_space<smem>>
    %c0_154 = arith.constant 0 : index
    %399 = arith.index_cast %394 : i32 to index
    %c0_155 = arith.constant 0 : index
    %c0_156 = arith.constant 0 : index
    %400 = vector.load %arg5[%c0_154, %399, %c0_155, %c0_156] : memref<1x8x18x128xbf16, #tpu.memory_space<vmem>>, vector<1x1x18x128xbf16>
    %401 = vector.shape_cast %400 : vector<1x1x18x128xbf16> to vector<1x18x128xbf16>
    %402 = arith.extf %401 : vector<1x18x128xbf16> to vector<1x18x128xf32>
    %403 = vector.broadcast %396 : f32 to vector<1x18x128xf32>
    %404 = arith.mulf %402, %403 : vector<1x18x128xf32>
    %c1_i32_157 = arith.constant 1 : i32
    %405 = arith.addi %394, %c1_i32_157 : i32
    %c0_158 = arith.constant 0 : index
    %406 = arith.index_cast %405 : i32 to index
    %c0_159 = arith.constant 0 : index
    %c0_160 = arith.constant 0 : index
    %407 = vector.load %arg5[%c0_158, %406, %c0_159, %c0_160] : memref<1x8x18x128xbf16, #tpu.memory_space<vmem>>, vector<1x1x18x128xbf16>
    %408 = vector.shape_cast %407 : vector<1x1x18x128xbf16> to vector<1x18x128xbf16>
    %409 = arith.extf %408 : vector<1x18x128xbf16> to vector<1x18x128xf32>
    %410 = vector.broadcast %398 : f32 to vector<1x18x128xf32>
    %411 = arith.mulf %409, %410 : vector<1x18x128xf32>
    %412 = arith.addf %404, %411 : vector<1x18x128xf32>
    %413 = arith.truncf %412 : vector<1x18x128xf32> to vector<1x18x128xbf16>
    %c17 = arith.constant 17 : index
    %c0_161 = arith.constant 0 : index
    %c0_162 = arith.constant 0 : index
    %414 = vector.load %arg8[%c17, %c0_161, %c0_162] : memref<18x18x128xbf16, #tpu.memory_space<vmem>>, vector<1x18x128xbf16>
    tpu.vector_store %arg8[%c17, %c0_161, %c0_162], %413 {strides = array<i32>} : memref<18x18x128xbf16, #tpu.memory_space<vmem>>, vector<1x18x128xbf16>,
    %c0_163 = arith.constant 0 : index
    %c0_164 = arith.constant 0 : index
    %c0_165 = arith.constant 0 : index
    %415 = vector.load %arg8[%c0_163, %c0_164, %c0_165] : memref<18x18x128xbf16, #tpu.memory_space<vmem>>, vector<16x16x128xbf16>
    %c0_166 = arith.constant 0 : index
    %c0_167 = arith.constant 0 : index
    %c0_168 = arith.constant 0 : index
    %416 = vector.load %arg9[%c0_166, %c0_167, %c0_168] : memref<16x16x1152xbf16, #tpu.memory_space<vmem>>, vector<16x16x128xbf16>
    tpu.vector_store %arg9[%c0_166, %c0_167, %c0_168], %415 {strides = array<i32>} : memref<16x16x1152xbf16, #tpu.memory_space<vmem>>, vector<16x16x128xbf16>,
    %c0_169 = arith.constant 0 : index
    %c1_170 = arith.constant 1 : index
    %c0_171 = arith.constant 0 : index
    %417 = vector.load %arg8[%c0_169, %c1_170, %c0_171] : memref<18x18x128xbf16, #tpu.memory_space<vmem>>, vector<16x16x128xbf16>
    %c0_172 = arith.constant 0 : index
    %c0_173 = arith.constant 0 : index
    %c128 = arith.constant 128 : index
    %418 = vector.load %arg9[%c0_172, %c0_173, %c128] : memref<16x16x1152xbf16, #tpu.memory_space<vmem>>, vector<16x16x128xbf16>
    tpu.vector_store %arg9[%c0_172, %c0_173, %c128], %417 {strides = array<i32>} : memref<16x16x1152xbf16, #tpu.memory_space<vmem>>, vector<16x16x128xbf16>,
    %c0_174 = arith.constant 0 : index
    %c2_175 = arith.constant 2 : index
    %c0_176 = arith.constant 0 : index
    %419 = vector.load %arg8[%c0_174, %c2_175, %c0_176] : memref<18x18x128xbf16, #tpu.memory_space<vmem>>, vector<16x16x128xbf16>
    %c0_177 = arith.constant 0 : index
    %c0_178 = arith.constant 0 : index
    %c256 = arith.constant 256 : index
    %420 = vector.load %arg9[%c0_177, %c0_178, %c256] : memref<16x16x1152xbf16, #tpu.memory_space<vmem>>, vector<16x16x128xbf16>
    tpu.vector_store %arg9[%c0_177, %c0_178, %c256], %419 {strides = array<i32>} : memref<16x16x1152xbf16, #tpu.memory_space<vmem>>, vector<16x16x128xbf16>,
    %c1_179 = arith.constant 1 : index
    %c0_180 = arith.constant 0 : index
    %c0_181 = arith.constant 0 : index
    %421 = vector.load %arg8[%c1_179, %c0_180, %c0_181] : memref<18x18x128xbf16, #tpu.memory_space<vmem>>, vector<16x16x128xbf16>
    %c0_182 = arith.constant 0 : index
    %c0_183 = arith.constant 0 : index
    %c384 = arith.constant 384 : index
    %422 = vector.load %arg9[%c0_182, %c0_183, %c384] : memref<16x16x1152xbf16, #tpu.memory_space<vmem>>, vector<16x16x128xbf16>
    tpu.vector_store %arg9[%c0_182, %c0_183, %c384], %421 {strides = array<i32>} : memref<16x16x1152xbf16, #tpu.memory_space<vmem>>, vector<16x16x128xbf16>,
    %c1_184 = arith.constant 1 : index
    %c1_185 = arith.constant 1 : index
    %c0_186 = arith.constant 0 : index
    %423 = vector.load %arg8[%c1_184, %c1_185, %c0_186] : memref<18x18x128xbf16, #tpu.memory_space<vmem>>, vector<16x16x128xbf16>
    %c0_187 = arith.constant 0 : index
    %c0_188 = arith.constant 0 : index
    %c512 = arith.constant 512 : index
    %424 = vector.load %arg9[%c0_187, %c0_188, %c512] : memref<16x16x1152xbf16, #tpu.memory_space<vmem>>, vector<16x16x128xbf16>
    tpu.vector_store %arg9[%c0_187, %c0_188, %c512], %423 {strides = array<i32>} : memref<16x16x1152xbf16, #tpu.memory_space<vmem>>, vector<16x16x128xbf16>,
    %c1_189 = arith.constant 1 : index
    %c2_190 = arith.constant 2 : index
    %c0_191 = arith.constant 0 : index
    %425 = vector.load %arg8[%c1_189, %c2_190, %c0_191] : memref<18x18x128xbf16, #tpu.memory_space<vmem>>, vector<16x16x128xbf16>
    %c0_192 = arith.constant 0 : index
    %c0_193 = arith.constant 0 : index
    %c640 = arith.constant 640 : index
    %426 = vector.load %arg9[%c0_192, %c0_193, %c640] : memref<16x16x1152xbf16, #tpu.memory_space<vmem>>, vector<16x16x128xbf16>
    tpu.vector_store %arg9[%c0_192, %c0_193, %c640], %425 {strides = array<i32>} : memref<16x16x1152xbf16, #tpu.memory_space<vmem>>, vector<16x16x128xbf16>,
    %c2_194 = arith.constant 2 : index
    %c0_195 = arith.constant 0 : index
    %c0_196 = arith.constant 0 : index
    %427 = vector.load %arg8[%c2_194, %c0_195, %c0_196] : memref<18x18x128xbf16, #tpu.memory_space<vmem>>, vector<16x16x128xbf16>
    %c0_197 = arith.constant 0 : index
    %c0_198 = arith.constant 0 : index
    %c768 = arith.constant 768 : index
    %428 = vector.load %arg9[%c0_197, %c0_198, %c768] : memref<16x16x1152xbf16, #tpu.memory_space<vmem>>, vector<16x16x128xbf16>
    tpu.vector_store %arg9[%c0_197, %c0_198, %c768], %427 {strides = array<i32>} : memref<16x16x1152xbf16, #tpu.memory_space<vmem>>, vector<16x16x128xbf16>,
    %c2_199 = arith.constant 2 : index
    %c1_200 = arith.constant 1 : index
    %c0_201 = arith.constant 0 : index
    %429 = vector.load %arg8[%c2_199, %c1_200, %c0_201] : memref<18x18x128xbf16, #tpu.memory_space<vmem>>, vector<16x16x128xbf16>
    %c0_202 = arith.constant 0 : index
    %c0_203 = arith.constant 0 : index
    %c896 = arith.constant 896 : index
    %430 = vector.load %arg9[%c0_202, %c0_203, %c896] : memref<16x16x1152xbf16, #tpu.memory_space<vmem>>, vector<16x16x128xbf16>
    tpu.vector_store %arg9[%c0_202, %c0_203, %c896], %429 {strides = array<i32>} : memref<16x16x1152xbf16, #tpu.memory_space<vmem>>, vector<16x16x128xbf16>,
    %c2_204 = arith.constant 2 : index
    %c2_205 = arith.constant 2 : index
    %c0_206 = arith.constant 0 : index
    %431 = vector.load %arg8[%c2_204, %c2_205, %c0_206] : memref<18x18x128xbf16, #tpu.memory_space<vmem>>, vector<16x16x128xbf16>
    %c0_207 = arith.constant 0 : index
    %c0_208 = arith.constant 0 : index
    %c1024 = arith.constant 1024 : index
    %432 = vector.load %arg9[%c0_207, %c0_208, %c1024] : memref<16x16x1152xbf16, #tpu.memory_space<vmem>>, vector<16x16x128xbf16>
    tpu.vector_store %arg9[%c0_207, %c0_208, %c1024], %431 {strides = array<i32>} : memref<16x16x1152xbf16, #tpu.memory_space<vmem>>, vector<16x16x128xbf16>,
    %c0_209 = arith.constant 0 : index
    %c0_210 = arith.constant 0 : index
    %c0_211 = arith.constant 0 : index
    %433 = vector.load %arg9[%c0_209, %c0_210, %c0_211] : memref<16x16x1152xbf16, #tpu.memory_space<vmem>>, vector<16x16x1152xbf16>
    %434 = vector.shape_cast %433 : vector<16x16x1152xbf16> to vector<256x1152xbf16>
    %c0_212 = arith.constant 0 : index
    %c0_213 = arith.constant 0 : index
    %435 = vector.load %arg6[%c0_212, %c0_213] : memref<1152x128xbf16, #tpu.memory_space<vmem>>, vector<1152x128xbf16>
    %cst = arith.constant dense<0.000000e+00> : vector<256x128xf32>
    %436 = tpu.matmul %434, %435, %cst {dimension_numbers = #tpu.dot_dimension_numbers<[1], [0], [0], [1], [0, 0, 1, 1], [], []>} : vector<256x1152xbf16>, vector<1152x128xbf16>, vector<256x128xf32> -> vector<256x128xf32>
    %437 = arith.truncf %436 : vector<256x128xf32> to vector<256x128xbf16>
    %c0_214 = arith.constant 0 : index
    %c0_215 = arith.constant 0 : index
    %c0_216 = arith.constant 0 : index
    %438 = vector.load %arg7[%c0_214, %c0_215, %c0_216] : memref<1x256x128xbf16, #tpu.memory_space<vmem>>, vector<1x256x128xbf16>
    %439 = vector.shape_cast %438 : vector<1x256x128xbf16> to vector<256x128xbf16>
    %440 = vector.shape_cast %437 : vector<256x128xbf16> to vector<1x256x128xbf16>
    tpu.vector_store %arg7[%c0_214, %c0_215, %c0_216], %440 {strides = array<i32>} : memref<1x256x128xbf16, #tpu.memory_space<vmem>>, vector<1x256x128xbf16>,
    return
  }
  func.func @transform_0(%arg0: i32, %arg1: i32, %arg2: memref<18xi32, #tpu.memory_space<smem>>, %arg3: memref<18xf32, #tpu.memory_space<smem>>, %arg4: memref<18xf32, #tpu.memory_space<smem>>) -> (i32, i32, i32, i32) {
    %c0_i32 = arith.constant 0 : i32
    %c0_i32_0 = arith.constant 0 : i32
    %c0_i32_1 = arith.constant 0 : i32
    %c0_i32_2 = arith.constant 0 : i32
    return %arg0, %c0_i32, %c0_i32_0, %c0_i32_1 : i32, i32, i32, i32
  }
  func.func @transform_1(%arg0: i32, %arg1: i32, %arg2: memref<18xi32, #tpu.memory_space<smem>>, %arg3: memref<18xf32, #tpu.memory_space<smem>>, %arg4: memref<18xf32, #tpu.memory_space<smem>>) -> (i32, i32) {
    %c0_i32 = arith.constant 0 : i32
    %c0_i32_0 = arith.constant 0 : i32
    %c0_i32_1 = arith.constant 0 : i32
    return %c0_i32, %c0_i32_0 : i32, i32
  }
  func.func @transform_2(%arg0: i32, %arg1: i32, %arg2: memref<18xi32, #tpu.memory_space<smem>>, %arg3: memref<18xf32, #tpu.memory_space<smem>>, %arg4: memref<18xf32, #tpu.memory_space<smem>>) -> (i32, i32, i32) {
    %c0_i32 = arith.constant 0 : i32
    %c0_i32_0 = arith.constant 0 : i32
    return %arg0, %arg1, %c0_i32 : i32, i32, i32
  }
}

</mosaic_0001>

<bundles_post_ra>
// kernel: sinet_phinet_forward.4
= control target key start
LH: loop header
LB: loop body
LE: loop exit
PB: predicated region body
PF: predicated region fallthrough
CT: control target
= control target key end

     0   :  { %vm34_vm0 = vcmask 1043456   ;;  %vm27_vm1 = vcmask 64512   ;;  %s180_s1 = inlined_call_operand.vmem [shape: bf16[8,128], index: 1, kind: input, shape index: {}]   ;;  %s181_s0 = inlined_call_operand.vmem [shape: bf16[32,8], index: 0, kind: input, shape index: {}]   ;;  %s182_s2 = inlined_call_operand.vmem [shape: bf16[32,128], index: 2, kind: output, shape index: {}]  }
   0x1   :  { %v16_v0 = vld [vmem:[%s180_s1] sm:$0xf]  ;;  %v149_v3 = vld [vmem:[%s181_s0 + $0x8] sm:$0xff]  }
   0x2   :  { %147 = vmatprep.subr.msk.bf16.mxu0 %vm34_vm0, %v16_v0  ;;  %v36_v1 = vsel %vm34_vm0, %v16_v0, 0  ;;  %v148_v2 = vld [vmem:[%s181_s0] sm:$0xff]  }
   0x3   :  { %142 = vmatpush3.bf16.msra.mxu0 %v36_v1  ;;  %143 = vmatprep.mubr.msk.bf16.mxu0 %vm27_vm1, %v148_v2 }
   0x6   :  { %144 = vmatmul.mubr.msk.bf16.vlgmr.msra.gmra.mrb[0].mxu0 %vm27_vm1, %v149_v3 }
  0xd9   :  { %v145_v4 = vpop.f32.mrb[0].mxu0 }
  0xda   :  { %v72_v5 = vpop.f32.mrb[1].mxu0  ;;  %v89_v7 = vmax.f32 %v145_v4, 0.0 }
  0xdb   :  { %v146_v6 = vpop.f32.mrb[2].mxu0  ;;  %v87_v10 = vmax.f32 %v72_v5, 0.0 }
  0xdc   :  { %v90_v8 = vmax.f32 %v146_v6, 0.0  ;;  %v75_v9 = vpop.f32.mrb[3].mxu0 }
  0xdd   :  { %v88_v11 = vmax.f32 %v75_v9, 0.0 }
  0xde   :  { %v135_v12 = vpack.c.bf16 %v90_v8, %v89_v7 }
  0xdf   :  { %v130_v13 = vpack.c.bf16 %v88_v11, %v87_v10 }
  0xe0   :  { %137 = vst [vmem:[%s182_s2 + $0x8] sm:$0xff] %v135_v12  }
  0xe1   :  { %131 = vst [vmem:[%s182_s2] sm:$0xff] %v130_v13  }

// kernel: sinet_phinet_forward.5
= control target key start
LH: loop header
LB: loop body
LE: loop exit
PB: predicated region body
PF: predicated region fallthrough
CT: control target
= control target key end

     0   :  { %v324_v0 = vmov 0.0   ;;  %vm325_vm0 = vmmov 0   ;;  %s400_s1 = inlined_call_operand.vmem [shape: bf16[128,128], index: 1, kind: input, shape index: {}]   ;;  %s401_s2 = inlined_call_operand.vmem [shape: bf16[128,128], index: 2, kind: input, shape index: {}]   ;;  %s402_s0 = inlined_call_operand.vmem [shape: bf16[8,128], index: 0, kind: input, shape index: {}]   ;;  %s403_s3 = inlined_call_operand.vmem [shape: bf16[8,128], index: 3, kind: output, shape index: {}]  }
   0x1   :  { %266 = vmatprep.subr.bf16.mxu0 %v324_v0  ;;  %v308_v1 = vld [vmem:[%s400_s1] sm:$0xff]   ;;  %282 = vmatprep.mubr.msk.bf16.mxu0 %vm325_vm0, %v324_v0  ;;  %v309_v2 = vld [vmem:[%s400_s1 + $0x8] sm:$0xff]   ;;  %v310_v3 = vld [vmem:[%s400_s1 + $0x10] sm:$0xff]  }
   0x2   :  { %286 = vmatprep.subr.bf16.mxu1 %v324_v0  ;;  %302 = vmatprep.mubr.msk.bf16.mxu1 %vm325_vm0, %v324_v0  ;;  %v316_v4 = vld [vmem:[%s401_s2] sm:$0xff]   ;;  %v311_v5 = vld [vmem:[%s400_s1 + $0x18] sm:$0xff]   ;;  %v317_v6 = vld [vmem:[%s401_s2 + $0x8] sm:$0xff]  }
   0x3   :  { %267 = vmatpush3.bf16.msra.mxu0 %v308_v1  ;;  %287 = vmatpush3.bf16.msra.mxu1 %v316_v4  ;;  %v312_v7 = vld [vmem:[%s400_s1 + $0x20] sm:$0xff]   ;;  %v318_v8 = vld [vmem:[%s401_s2 + $0x10] sm:$0xff]   ;;  %v313_v9 = vld [vmem:[%s400_s1 + $0x28] sm:$0xff]  }
   0x4   :  { %268 = vmatprep.subr.bf16.mxu0 %v324_v0  ;;  %288 = vmatprep.subr.bf16.mxu1 %v324_v0  ;;  %v319_v10 = vld [vmem:[%s401_s2 + $0x18] sm:$0xff]   ;;  %v314_v11 = vld [vmem:[%s400_s1 + $0x30] sm:$0xff]   ;;  %v320_v12 = vld [vmem:[%s401_s2 + $0x20] sm:$0xff]  }
   0x5   :  { %v315_v13 = vld [vmem:[%s400_s1 + $0x38] sm:$0xff]   ;;  %v321_v14 = vld [vmem:[%s401_s2 + $0x28] sm:$0xff]   ;;  %v15_v15 = vld [vmem:[%s402_s0] sm:$0xf] }
   0x6   :  { %v322_v16 = vld [vmem:[%s401_s2 + $0x30] sm:$0xff]   ;;  %v323_v17 = vld [vmem:[%s401_s2 + $0x38] sm:$0xff]  }
   0x7   :  { %269 = vmatpush3.bf16.msra.mxu0 %v309_v2  ;;  %289 = vmatpush3.bf16.msra.mxu1 %v317_v6 }
   0x8   :  { %270 = vmatprep.subr.bf16.mxu0 %v324_v0  ;;  %290 = vmatprep.subr.bf16.mxu1 %v324_v0 }
   0xb   :  { %271 = vmatpush3.bf16.msra.mxu0 %v310_v3  ;;  %291 = vmatpush3.bf16.msra.mxu1 %v318_v8 }
   0xc   :  { %272 = vmatprep.subr.bf16.mxu0 %v324_v0  ;;  %292 = vmatprep.subr.bf16.mxu1 %v324_v0 }
   0xf   :  { %273 = vmatpush3.bf16.msra.mxu0 %v311_v5  ;;  %293 = vmatpush3.bf16.msra.mxu1 %v319_v10 }
  0x10   :  { %274 = vmatprep.subr.bf16.mxu0 %v324_v0  ;;  %294 = vmatprep.subr.bf16.mxu1 %v324_v0 }
  0x13   :  { %275 = vmatpush3.bf16.msra.mxu0 %v312_v7  ;;  %295 = vmatpush3.bf16.msra.mxu1 %v320_v12 }
  0x14   :  { %276 = vmatprep.subr.bf16.mxu0 %v324_v0  ;;  %296 = vmatprep.subr.bf16.mxu1 %v324_v0 }
  0x17   :  { %277 = vmatpush3.bf16.msra.mxu0 %v313_v9  ;;  %297 = vmatpush3.bf16.msra.mxu1 %v321_v14 }
  0x18   :  { %278 = vmatprep.subr.bf16.mxu0 %v324_v0  ;;  %298 = vmatprep.subr.bf16.mxu1 %v324_v0 }
  0x1b   :  { %279 = vmatpush3.bf16.msra.mxu0 %v314_v11  ;;  %299 = vmatpush3.bf16.msra.mxu1 %v322_v16 }
  0x1c   :  { %280 = vmatprep.subr.bf16.mxu0 %v324_v0  ;;  %300 = vmatprep.subr.bf16.mxu1 %v324_v0 }
  0x1f   :  { %281 = vmatpush3.bf16.msra.mxu0 %v315_v13  ;;  %301 = vmatpush3.bf16.msra.mxu1 %v323_v17 }
  0x22   :  { %283 = vmatmul.mubr.bf16.vlgmr.msra.gmra.mrb[0].mxu0 %v15_v15 }
  0xf5   :  { %v114_v18 = vpop.f32.mrb[0].mxu0 }
  0xf6   :  { %v120_v19 = vmax.f32 %v114_v18, 0.0  ;;  %v284_v20 = vpop.f32.mrb[1].mxu0 }
  0xf7   :  { %v117_v21 = vpop.f32.mrb[2].mxu0 }
  0xf8   :  { %v121_v22 = vpack.c.bf16 %v120_v19, %v120_v19  ;;  %v285_v23 = vpop.f32.mrb[3].mxu0 }
  0xfa   :  { %303 = vmatmul.mubr.bf16.vlgmr.msra.gmra.mrb[0].mxu1 %v121_v22 }
 0x1cd   :  { %v220_v24 = vpop.f32.mrb[0].mxu1 }
 0x1ce   :  { %v226_v25 = vpack.c.bf16 %v220_v24, %v220_v24  ;;  %v304_v26 = vpop.f32.mrb[1].mxu1 }
 0x1cf   :  { %v223_v27 = vpop.f32.mrb[2].mxu1 }
 0x1d0   :  { %227 = vst [vmem:[%s403_s3] sm:$0xf] %v226_v25  ;;  %v305_v28 = vpop.f32.mrb[3].mxu1 }

// kernel: sinet_phinet_forward.6
= control target key start
LH: loop header
LB: loop body
LE: loop exit
PB: predicated region body
PF: predicated region fallthrough
CT: control target
= control target key end

     0   :  { %v49_v0 = vlaneseq  ;;  %s510_s0 = inlined_call_operand.vmem [shape: bf16[32,128], index: 0, kind: input, shape index: {}]   ;;  %s511_s3 = inlined_call_operand.vmem [shape: f32[8,128], index: 3, kind: input, shape index: {}]   ;;  %s512_s2 = inlined_call_operand.vmem [shape: bf16[128,128], index: 2, kind: input, shape index: {}]   ;;  %s513_s1 = inlined_call_operand.vmem [shape: bf16[32,128], index: 1, kind: input, shape index: {}]   ;;  %s514_s4 = inlined_call_operand.vmem [shape: bf16[32,128], index: 4, kind: output, shape index: {}]  }
   0x1   :  { %v301_v1 = vld [vmem:[%s511_s3] ss:$0 sm:$0xff]  ;;  %v302_v2 = vld [vmem:[%s511_s3 + $0x1] ss:$0 sm:$0xff]  ;;  %v344_v6 = vld [vmem:[%s510_s0 + $0x8] sm:$0xff]  }
   0x2   :  { %v327_v3 = vld [vmem:[%s510_s0] sm:$0xff]   ;;  %v50_v5 = vand.u32 127, %v49_v0  ;;  %v332_v8 = vunpack.c.l.bf16 %v344_v6  ;;  %v333_v9 = vunpack.c.h.bf16 %v344_v6  ;;  %v377_v13 = vld [vmem:[%s512_s2 + $0x8] sm:$0xff]   ;;  %v378_v20 = vld [vmem:[%s512_s2 + $0x10] sm:$0xff]  }
   0x3   :  { %v328_v4 = vunpack.c.l.bf16 %v327_v3  ;;  %v329_v7 = vunpack.c.h.bf16 %v327_v3  ;;  %v376_v10 = vld [vmem:[%s512_s2] sm:$0xff]   ;;  %v379_v24 = vld [vmem:[%s512_s2 + $0x18] sm:$0xff]   ;;  %v381_v28 = vld [vmem:[%s512_s2 + $0x28] sm:$0xff]  }
   0x4   :  { %vm51_vm0 = vcmp.lt.s32.totalorder %v50_v5, 20  ;;  %v39_v14 = vmul.f32 %v332_v8, %v301_v1  ;;  %v40_v15 = vmul.f32 %v333_v9, %v301_v1  ;;  %356 = vmatprep.subr.bf16.mxu0 %v376_v10  ;;  %v384_v26 = vld [vmem:[%s513_s1] sm:$0xff]   ;;  %v382_v29 = vld [vmem:[%s512_s2 + $0x30] sm:$0xff]   ;;  %v383_v30 = vld [vmem:[%s512_s2 + $0x38] sm:$0xff]  }
   0x5   :  { %v37_v11 = vmul.f32 %v328_v4, %v301_v1  ;;  %v38_v12 = vmul.f32 %v329_v7, %v301_v1  ;;  %357 = vmatpush3.bf16.msra.mxu0 %v376_v10  ;;  %v380_v27 = vld [vmem:[%s512_s2 + $0x20] sm:$0xff]   ;;  %372 = vmatprep.mubr.bf16.mxu0 %v384_v26  ;;  %v385_v31 = vld [vmem:[%s513_s1 + $0x8] sm:$0xff]  }
   0x6   :  { %v449_v18 = vadd.f32 %v302_v2, %v39_v14  ;;  %v451_v19 = vadd.f32 %v302_v2, %v40_v15  ;;  %358 = vmatprep.subr.bf16.mxu0 %v377_v13  ;;  %v313_v52 = vld [vmem:[%s511_s3 + $0x2] ss:$0 sm:$0xff]  ;;  %v314_v55 = vld [vmem:[%s511_s3 + $0x3] ss:$0 sm:$0xff]  ;;  %v315_v60 = vld [vmem:[%s511_s3 + $0x4] ss:$0 sm:$0xff] }
   0x7   :  { %v445_v16 = vadd.f32 %v302_v2, %v37_v11  ;;  %v447_v17 = vadd.f32 %v302_v2, %v38_v12 }
   0x8   :  { %v54_v22 = vsel %vm51_vm0, %v449_v18, -1e+30  ;;  %v55_v25 = vsel %vm51_vm0, %v451_v19, -1e+30 }
   0x9   :  { %v52_v21 = vsel %vm51_vm0, %v445_v16, -1e+30  ;;  %v53_v23 = vsel %vm51_vm0, %v447_v17, -1e+30  ;;  %60 = vmax.xlane.f32.xlu1 %v54_v22  ;;  %359 = vmatpush3.bf16.msra.mxu0 %v377_v13 }
   0xa   :  { %56 = vmax.xlane.f32.xlu0 %v52_v21  ;;  %360 = vmatprep.subr.bf16.mxu0 %v378_v20 }
   0xd   :  { %62 = vmax.xlane.f32.xlu1 %v55_v25  ;;  %361 = vmatpush3.bf16.msra.mxu0 %v378_v20 }
   0xe   :  { %58 = vmax.xlane.f32.xlu0 %v53_v23  ;;  %362 = vmatprep.subr.bf16.mxu0 %v379_v24 }
  0x11   :  { %363 = vmatpush3.bf16.msra.mxu0 %v379_v24 }
  0x12   :  { %364 = vmatprep.subr.bf16.mxu0 %v380_v27 }
  0x15   :  { %365 = vmatpush3.bf16.msra.mxu0 %v380_v27 }
  0x16   :  { %366 = vmatprep.subr.bf16.mxu0 %v381_v28 }
  0x19   :  { %367 = vmatpush3.bf16.msra.mxu0 %v381_v28 }
  0x1a   :  { %368 = vmatprep.subr.bf16.mxu0 %v382_v29 }
  0x1d   :  { %369 = vmatpush3.bf16.msra.mxu0 %v382_v29  ;;  %v317_v29 = vld [vmem:[%s511_s3 + $0x6] ss:$0 sm:$0xff] }
  0x1e   :  { %370 = vmatprep.subr.bf16.mxu0 %v383_v30 }
  0x21   :  { %371 = vmatpush3.bf16.msra.mxu0 %v383_v30 }
  0x24   :  { %373 = vmatmul.mubr.bf16.vlgmr.msra.gmra.mrb[0].mxu0 %v385_v31 }
  0x96   :  { %v61_v34 = vpop.xlane.xlu1 %60 }
  0x97   :  { %v57_v32 = vpop.xlane.xlu0 %56  ;;  %v66_v35 = vsub.f32 %v54_v22, %v61_v34 }
  0x98   :  { %v64_v33 = vsub.f32 %v52_v21, %v57_v32  ;;  %v316_v21 = vld [vmem:[%s511_s3 + $0x5] ss:$0 sm:$0xff] }
  0x99   :  { %v72_v37 = vmul.f32 1.442695, %v66_v35 }
  0x9a   :  { %v68_v36 = vmul.f32 1.442695, %v64_v33  ;;  %v63_v40 = vpop.xlane.xlu1 %62 }
  0x9b   :  { %v59_v38 = vpop.xlane.xlu0 %58  ;;  %v67_v41 = vsub.f32 %v55_v25, %v63_v40 }
  0x9c   :  { %386 = vpow2.f32 %v68_v36  ;;  %v65_v39 = vsub.f32 %v53_v23, %v59_v38 }
  0x9d   :  { %388 = vpow2.f32 %v72_v37  ;;  %v74_v43 = vmul.f32 1.442695, %v67_v41 }
  0x9e   :  { %v70_v42 = vmul.f32 1.442695, %v65_v39 }
  0xa0   :  { %390 = vpow2.f32 %v70_v42 }
  0xa1   :  { %392 = vpow2.f32 %v74_v43 }
  0xa6   :  { %v387_v44 = vpop.eup %386 }
  0xa7   :  { %76 = vadd.xlane.f32.xlu0 %v387_v44  ;;  %v389_v45 = vpop.eup %388 }
  0xaa   :  { %v391_v46 = vpop.eup %390 }
  0xab   :  { %80 = vadd.xlane.f32.xlu0 %v389_v45  ;;  %78 = vadd.xlane.f32.xlu1 %v391_v46  ;;  %v393_v47 = vpop.eup %392 }
  0xaf   :  { %82 = vadd.xlane.f32.xlu1 %v393_v47 }
  0xf7   :  { %v374_v48 = vpop.f32.mrb[0].mxu0 }
  0xf8   :  { %v206_v49 = vpop.f32.mrb[1].mxu0  ;;  %v227_v61 = vmul.f32 %v374_v48, %v313_v52 }
  0xf9   :  { %v375_v50 = vpop.f32.mrb[2].mxu0  ;;  %v225_v53 = vmul.f32 %v313_v52, %v206_v49 }
  0xfa   :  { %v209_v51 = vpop.f32.mrb[3].mxu0  ;;  %v235_v0 = vadd.f32 %v314_v55, %v227_v61  ;;  %v228_v2 = vmul.f32 %v375_v50, %v313_v52 }
  0xfb   :  { %v233_v56 = vadd.f32 %v314_v55, %v225_v53  ;;  %v226_v57 = vmul.f32 %v313_v52, %v209_v51 }
  0xfc   :  { %v247_v7 = vmul.f32 %v315_v60, %v235_v0  ;;  %vm239_vm3 = vcmp.ge.f32.partialorder %v235_v0, 0.0  ;;  %v236_v8 = vadd.f32 %v314_v55, %v228_v2 }
  0xfd   :  { %v245_v62 = vmul.f32 %v315_v60, %v233_v56  ;;  %v234_v63 = vadd.f32 %v314_v55, %v226_v57  ;;  %vm237_vm1 = vcmp.ge.f32.partialorder %v233_v56, 0.0 }
  0xfe   :  { %v251_v14 = vsel %vm239_vm3, %v235_v0, %v247_v7  ;;  %v248_v22 = vmul.f32 %v315_v60, %v236_v8  ;;  %vm240_vm4 = vcmp.ge.f32.partialorder %v236_v8, 0.0 }
  0xff   :  { %v249_v4 = vsel %vm237_vm1, %v233_v56, %v245_v62  ;;  %v246_v5 = vmul.f32 %v315_v60, %v234_v63  ;;  %vm238_vm2 = vcmp.ge.f32.partialorder %v234_v63, 0.0 }
 0x100   :  { %v252_v30 = vsel %vm240_vm4, %v236_v8, %v248_v22 }
 0x101   :  { %v250_v11 = vsel %vm238_vm2, %v234_v63, %v246_v5 }
 0x134   :  { %v77_v54 = vpop.xlane.xlu0 %76 }
 0x135   :  { %394 = vrcp.f32 %v77_v54 }
 0x138   :  { %v79_v58 = vpop.xlane.xlu1 %78  ;;  %v81_v59 = vpop.xlane.xlu0 %80 }
 0x139   :  { %396 = vrcp.f32 %v79_v58 }
 0x13a   :  { %398 = vrcp.f32 %v81_v59 }
 0x13c   :  { %v83_v1 = vpop.xlane.xlu1 %82 }
 0x13d   :  { %400 = vrcp.f32 %v83_v1 }
 0x13f   :  { %v395_v3 = vpop.eup %394 }
 0x140   :  { %v88_v6 = vsub.f32 1.0, %v395_v3 }
 0x142   :  { %v253_v9 = vmul.f32 %v249_v4, %v88_v6 }
 0x143   :  { %v397_v10 = vpop.eup %396 }
 0x144   :  { %v399_v12 = vpop.eup %398  ;;  %v89_v13 = vsub.f32 1.0, %v397_v10  ;;  %v257_v15 = vadd.f32 %v253_v9, %v445_v16 }
 0x145   :  { %v90_v20 = vsub.f32 1.0, %v399_v12 }
 0x146   :  { %v254_v23 = vmul.f32 %v250_v11, %v89_v13  ;;  %v265_v26 = vmul.f32 %v316_v21, %v257_v15 }
 0x147   :  { %v401_v24 = vpop.eup %400  ;;  %v255_v25 = vmul.f32 %v251_v14, %v90_v20 }
 0x148   :  { %v91_v27 = vsub.f32 1.0, %v401_v24  ;;  %v258_v28 = vadd.f32 %v254_v23, %v447_v17  ;;  %v273_v34 = vadd.f32 %v317_v29, %v265_v26 }
 0x149   :  { %v259_v16 = vadd.f32 %v255_v25, %v449_v18 }
 0x14a   :  { %v256_v31 = vmul.f32 %v252_v30, %v91_v27  ;;  %v266_v32 = vmul.f32 %v316_v21, %v258_v28 }
 0x14b   :  { %v267_v33 = vmul.f32 %v316_v21, %v259_v16 }
 0x14c   :  { %v260_v35 = vadd.f32 %v256_v31, %v451_v19  ;;  %v274_v36 = vadd.f32 %v317_v29, %v266_v32 }
 0x14d   :  { %v275_v39 = vadd.f32 %v317_v29, %v267_v33 }
 0x14e   :  { %v268_v37 = vmul.f32 %v316_v21, %v260_v35  ;;  %v337_v38 = vpack.c.bf16 %v274_v36, %v273_v34 }
 0x150   :  { %v276_v40 = vadd.f32 %v317_v29, %v268_v37  ;;  %338 = vst [vmem:[%s514_s4] sm:$0xff] %v337_v38  }
 0x152   :  { %v342_v17 = vpack.c.bf16 %v276_v40, %v275_v39 }
 0x154   :  { %345 = vst [vmem:[%s514_s4 + $0x8] sm:$0xff] %v342_v17  }

// kernel: sinet_phinet_forward.7
= control target key start
LH: loop header
LB: loop body
LE: loop exit
PB: predicated region body
PF: predicated region fallthrough
CT: control target
= control target key end

     0   :  { %s8126_s0 = inlined_call_operand.vmem [shape: s32[18], index: 0, kind: input, shape index: {}]   ;;  %s8127_s3 = inlined_call_operand.vmem [shape: bf16[2,8,18,128], index: 3, kind: input, shape index: {}]   ;;  %s8128_s4 = inlined_call_operand.vmem [shape: bf16[1152,128], index: 4, kind: input, shape index: {}]   ;;  %s8129_s5 = inlined_call_operand.vmem [shape: bf16[2,256,128], index: 5, kind: output, shape index: {}]   ;;  %s8130_s1 = inlined_call_operand.vmem [shape: f32[18], index: 1, kind: input, shape index: {}]   ;;  %s8131_s2 = inlined_call_operand.vmem [shape: f32[18], index: 2, kind: input, shape index: {}]  }
   0x1   :  { %s10_s20 = sshll.u32 %s8126_s0, 4  ;;  %s14_s23 = sshll.u32 %s8130_s1, 4  ;;  %s11_s20 = int_to_ptr.vmem [resolvable:$true] %s10_s20  ;;  %s15_s23 = int_to_ptr.vmem [resolvable:$true] %s14_s23 }
   0x2   :  { %s7084_s24 = scalar_lea.vmem %s11_s20, 16  ;;  %p7089_p1 = scmp.lt.s32.totalorder %s11_s20, %s11_s20 }
   0x3   :  { %p7085_p0 = scmp.ne.s32.totalorder %s11_s20, %s7084_s24  ;;  %p7090_p2 = scmp.lt.s32.totalorder %s7084_s24, %s7084_s24 }
   0x5   :  { %p7091_p3 = por %p7090_p2, %p7089_p1 }
   0x7   :  { %p7092_p4 = pnand %p7091_p3, %p7085_p0 }
   0x9   :  { %7095 = shalt.err (!%p7092_p4)  }
   0xa   :  { %s7146_s25 = smov [#allocation5]   ;;  %s7096_s26 = scalar_lea.vmem %s15_s23, 16 }
   0xb   :  { %13 = dma.vmem_to_smem %s11_s20, 16, %s7146_s25, [#allocation4] }
   0xc   :  { %p7097_p5 = scmp.ne.s32.totalorder %s15_s23, %s7096_s26  ;;  %p7101_p6 = scmp.lt.s32.totalorder %s15_s23, %s15_s23 }
   0xd   :  { %p7102_p7 = scmp.lt.s32.totalorder %s7096_s26, %s7096_s26 }
   0xf   :  { %p7103_p8 = por %p7102_p7, %p7101_p6 }
  0x11   :  { %p7104_p9 = pnand %p7103_p8, %p7097_p5 }
  0x13   :  { %7107 = shalt.err (!%p7104_p9)  }
  0x14   :  { %s7147_s0 = smov [#allocation6]   ;;  %s18_s28 = sshll.u32 %s8131_s2, 4  ;;  %s19_s28 = int_to_ptr.vmem [resolvable:$true] %s18_s28 }
  0x15   :  { %17 = dma.vmem_to_smem %s15_s23, 16, %s7147_s0, [#allocation4] }
  0x16   :  { %s7108_s29 = scalar_lea.vmem %s19_s28, 16  ;;  %p7113_p11 = scmp.lt.s32.totalorder %s19_s28, %s19_s28 }
  0x17   :  { %p7109_p10 = scmp.ne.s32.totalorder %s19_s28, %s7108_s29  ;;  %p7114_p12 = scmp.lt.s32.totalorder %s7108_s29, %s7108_s29 }
  0x19   :  { %p7115_p13 = por %p7114_p12, %p7113_p11 }
  0x1b   :  { %p7116_p0 = pnand %p7115_p13, %p7109_p10 }
  0x1d   :  { %7119 = shalt.err (!%p7116_p0)  }
  0x1e   :  { %s7148_s30 = smov [#allocation7]  }
  0x1f   :  { %21 = dma.vmem_to_smem %s19_s28, 16, %s7148_s30, [#allocation4] }
  0x20   :  { %7132 = dma.done.wait [#allocation4], 48 }
  0x21   :  { %7133 = vsyncadd [#allocation4], 4294967248 }
  0x22   :  { %23 = sfence }
  0x23   :  { %s7188_s6 = smov 0   ;;  %s7190_s7 = smov 0  }
  0x24   :  { %s7192_s8 = smov 0  }
  0x25 LB: > { %s41_s2 = sadd.s32 1, %s7140_s7  ;;  %p5364_p1 = scmp.ge.s32.totalorder %s7144_s8, 1  ;;  %s7144_s8 = sphi %s7192_s8, %s29_s8   ;;  %s7140_s7 = sphi %s7190_s7, %s8133_s7   ;;  %s7136_s6 = sphi %s7188_s6, %s8132_s6  }
  0x26   : > { %p43_p2 = scmp.ge.s32.totalorder %s41_s2, 2  ;;  %p143_p3 = scmp.lt.s32.totalorder %s7144_s8, 3 }
  0x28   : > { %s8135_s2 = smov (%p43_p2, %s41_s2), 0  ;;  %p144_p4 = pnand %p5364_p1, %p143_p3 }
  0x29   : > { %v6772_v0 = vld [vmem:[%s8128_s4 + $0x40] sm:$0xff] (!%p144_p4)   ;;  %v6774_v2 = vld [vmem:[%s8128_s4 + $0x48] sm:$0xff] (!%p144_p4)   ;;  %v6776_v4 = vld [vmem:[%s8128_s4 + $0x50] sm:$0xff] (!%p144_p4)   ;;  %p169_p5 = scmp.lt.s32.totalorder (!%p144_p4), %s7136_s6, 1  ;;  %s186_s30 = sld [smem:[#allocation5]] (!%p144_p4)  ;;  %vm1823_vm1 = vcmask (!%p144_p4), 1046528  }
  0x2a   : > { %147 = sbr.rel (%p144_p4) target bundleno = 636 (0x27c), region = 28  ;;  %v6773_v1 = vld [vmem:[%s8128_s4] sm:$0xff] (!%p144_p4)   ;;  %6728 = vmatprep.subr.bf16.mxu1 (!%p144_p4), %v6772_v0  ;;  %6208 = vmatprep.subr.bf16.mxu0 (!%p144_p4), %v6772_v0  ;;  %v6775_v3 = vld [vmem:[%s8128_s4 + $0x8] sm:$0xff] (!%p144_p4)   ;;  %v6777_v5 = vld [vmem:[%s8128_s4 + $0x10] sm:$0xff] (!%p144_p4)   ;;  %s187_s9 = sld [smem:[#allocation6]] (!%p144_p4) }
  0x2b   : > { %6736 = vmatpush3.bf16.msra.mxu1 (!%p144_p4), %v6773_v1  ;;  %6209 = vmatpush3.bf16.msra.mxu0 (!%p144_p4), %v6773_v1  ;;  %v6778_v6 = vld [vmem:[%s8128_s4 + $0x58] sm:$0xff] (!%p144_p4)   ;;  %v6780_v8 = vld [vmem:[%s8128_s4 + $0x60] sm:$0xff] (!%p144_p4)   ;;  %v6782_v10 = vld [vmem:[%s8128_s4 + $0x68] sm:$0xff] (!%p144_p4)   ;;  %s188_s10 = sld [smem:[#allocation7]] (!%p144_p4)  ;;  %s5485_s11 = sld [smem:[#allocation5 + $0xc]] (!%p144_p4) }
  0x2c   : > { %6729 = vmatprep.subr.bf16.mxu1 (!%p144_p4), %v6774_v2  ;;  %6210 = vmatprep.subr.bf16.mxu0 (!%p144_p4), %v6774_v2  ;;  %v6779_v7 = vld [vmem:[%s8128_s4 + $0x18] sm:$0xff] (!%p144_p4)   ;;  %v6781_v9 = vld [vmem:[%s8128_s4 + $0x20] sm:$0xff] (!%p144_p4)   ;;  %s5486_s12 = sld [smem:[#allocation6 + $0xc]] (!%p144_p4)  ;;  %v6783_v11 = vld [vmem:[%s8128_s4 + $0x28] sm:$0xff] (!%p144_p4)   ;;  %s7264_s1 = sld [smem:[#allocation5 + $0x1]] (!%p144_p4) }
  0x2d   : > { %s5487_s13 = sld [smem:[#allocation7 + $0xc]] (!%p144_p4)  ;;  %v6784_v12 = vld [vmem:[%s8128_s4 + $0x70] sm:$0xff] (!%p144_p4)   ;;  %v6786_v14 = vld [vmem:[%s8128_s4 + $0x78] sm:$0xff] (!%p144_p4)   ;;  %v6792_v35 = vld [vmem:[%s8128_s4 + $0xc0] sm:$0xff] (!%p144_p4)   ;;  %s7280_s14 = sld [smem:[#allocation5 + $0xd]] (!%p144_p4) }
  0x2e   : > { %v6785_v13 = vld [vmem:[%s8128_s4 + $0x30] sm:$0xff] (!%p144_p4)   ;;  %v6787_v18 = vld [vmem:[%s8128_s4 + $0x38] sm:$0xff] (!%p144_p4)   ;;  %v6797_v36 = vld [vmem:[%s8128_s4 + $0x140] sm:$0xff] (!%p144_p4)   ;;  %s7283_s16 = sld [smem:[#allocation6 + $0xd]] (!%p144_p4)  ;;  %s7287_s18 = sld [smem:[#allocation5 + $0x2]] (!%p144_p4) }
  0x2f   : > { %6737 = vmatpush3.bf16.msra.mxu1 (!%p144_p4), %v6775_v3  ;;  %6211 = vmatpush3.bf16.msra.mxu0 (!%p144_p4), %v6775_v3  ;;  %s5892_s23 = smul.u32 (!%p144_p4), 12, %s186_s30  ;;  %s7270_s30 = sld [smem:[#allocation6 + $0x1]] (!%p144_p4)  ;;  %vm1422_vm0 = vsmask.f32 (!%p144_p4), 7424 }
  0x30   : > { %6730 = vmatprep.subr.bf16.mxu1 (!%p144_p4), %v6776_v4  ;;  %6212 = vmatprep.subr.bf16.mxu0 (!%p144_p4), %v6776_v4  ;;  %v198_v15 = vstv (!%p144_p4), %s187_s9  ;;  %s7290_s19 = sld [smem:[#allocation7 + $0xd]] (!%p144_p4)  ;;  %s7293_s22 = sld [smem:[#allocation6 + $0x2]] (!%p144_p4) }
  0x31   : > { %s8137_s6 = smov (!%p169_p5, %s7136_s6), 1  ;;  %s5940_s26 = smul.u32 12, %s5485_s11  ;;  %v212_v16 = vstv %s188_s10 }
  0x32   : > { %s6744_s27 = smul.u32 96, %s8137_s6  ;;  %v809_v17 = vstv %s5486_s12  ;;  %s7298_s25 = sld [smem:[#allocation7 + $0x2]] }
  0x33   : > { %6738 = vmatpush3.bf16.msra.mxu1 %v6777_v5  ;;  %6213 = vmatpush3.bf16.msra.mxu0 %v6777_v5  ;;  %v823_v22 = vstv %s5487_s13  ;;  %s7278_s13 = sld [smem:[#allocation7 + $0x1]]  ;;  %s5896_s15 = smul.u32 12, %s7264_s1 }
  0x34   : > { %6731 = vmatprep.subr.bf16.mxu1 %v6778_v6  ;;  %6214 = vmatprep.subr.bf16.mxu0 %v6778_v6  ;;  %s7255_s20 = scalar_lea.vmem %s8127_s3, %s6744_s27  ;;  %s5944_s21 = smul.u32 12, %s7280_s14 }
  0x35   : > { %s191_s0 = scalar_lea.vmem %s7255_s20, %s5892_s23  ;;  %s802_s29 = scalar_lea.vmem %s7255_s20, %s5940_s26  ;;  %v248_v56 = vstv %s7270_s30 }
  0x36   : > { %v5997_v19 = vld [vmem:[%s191_s0] sm:$0xff]   ;;  %v194_v20 = vld [vmem:[%s191_s0 + $0x8] sm:$0x1]  ;;  %v5369_v21 = vld [vmem:[%s191_s0 + $0xc] sm:$0xff]   ;;  %s241_s17 = scalar_lea.vmem %s7255_s20, %s5896_s15  ;;  %s7295_s23 = sld [smem:[#allocation5 + $0xe]] }
  0x37   : > { %6739 = vmatpush3.bf16.msra.mxu1 %v6779_v7  ;;  %6215 = vmatpush3.bf16.msra.mxu0 %v6779_v7  ;;  %v5998_v23 = vunpack.c.l.bf16 %v5997_v19  ;;  %v5999_v24 = vunpack.c.h.bf16 %v5997_v19  ;;  %v197_v25 = vunpack.c.l.bf16 %v194_v20  ;;  %v5371_v26 = vld [vmem:[%s191_s0 + $0x14] sm:$0x1]  ;;  %v209_v27 = vunpack.c.l.bf16 %v5369_v21  ;;  %v6075_v28 = vld [vmem:[%s802_s29] sm:$0xff]   ;;  %v805_v29 = vld [vmem:[%s802_s29 + $0x8] sm:$0x1]  ;;  %s853_s24 = scalar_lea.vmem %s7255_s20, %s5944_s21  ;;  %s5900_s26 = smul.u32 12, %s7287_s18 }
  0x38   : > { %6732 = vmatprep.subr.bf16.mxu1 %v6780_v8  ;;  %6216 = vmatprep.subr.bf16.mxu0 %v6780_v8  ;;  %v210_v30 = vunpack.c.h.bf16 %v5369_v21  ;;  %v211_v31 = vunpack.c.l.bf16 %v5371_v26  ;;  %v6076_v32 = vunpack.c.l.bf16 %v6075_v28  ;;  %v6077_v33 = vunpack.c.h.bf16 %v6075_v28  ;;  %v5489_v34 = vld [vmem:[%s802_s29 + $0xc] sm:$0xff]   ;;  %v5491_v41 = vld [vmem:[%s802_s29 + $0x14] sm:$0x1]  ;;  %v6006_v60 = vld [vmem:[%s241_s17] sm:$0xff]   ;;  %s7303_s1 = sld [smem:[#allocation5 + $0x3]]  ;;  %s7309_s28 = sld [smem:[#allocation6 + $0xe]] }
  0x39   : > { %v199_v37 = vmul.f32 %v5998_v23, %v198_v15  ;;  %v200_v38 = vmul.f32 %v5999_v24, %v198_v15  ;;  %v201_v39 = vmul.f32 %v198_v15, %v197_v25  ;;  %v808_v40 = vunpack.c.l.bf16 %v805_v29  ;;  %v244_v61 = vld [vmem:[%s241_s17 + $0x8] sm:$0x1]  ;;  %v5379_v62 = vld [vmem:[%s241_s17 + $0xc] sm:$0xff]   ;;  %v5381_v4 = vld [vmem:[%s241_s17 + $0x14] sm:$0x1]  ;;  %s292_s0 = scalar_lea.vmem %s7255_s20, %s5900_s26  ;;  %s7319_s11 = sld [smem:[#allocation7 + $0xe]] }
  0x3a   : > { %v213_v42 = vmul.f32 %v212_v16, %v209_v27  ;;  %v214_v43 = vmul.f32 %v212_v16, %v210_v30  ;;  %v215_v44 = vmul.f32 %v212_v16, %v211_v31  ;;  %v810_v45 = vmul.f32 %v6076_v32, %v809_v17  ;;  %v5499_v19 = vld [vmem:[%s853_s24 + $0xc] sm:$0xff]   ;;  %v5501_v24 = vld [vmem:[%s853_s24 + $0x14] sm:$0x1]  ;;  %s7368_s9 = sld [smem:[#allocation6 + $0xf]]  ;;  %s7438_s26 = sld [smem:[#allocation7 + $0x5]] }
  0x3b   : > { %6740 = vmatpush3.bf16.msra.mxu1 %v6781_v9  ;;  %6217 = vmatpush3.bf16.msra.mxu0 %v6781_v9  ;;  %v811_v46 = vmul.f32 %v6077_v33, %v809_v17  ;;  %v812_v47 = vmul.f32 %v809_v17, %v808_v40  ;;  %v820_v48 = vunpack.c.l.bf16 %v5489_v34  ;;  %v821_v49 = vunpack.c.h.bf16 %v5489_v34  ;;  %v6084_v17 = vld [vmem:[%s853_s24] sm:$0xff]   ;;  %s7452_s30 = sld [smem:[#allocation5 + $0x6]]  ;;  %s7586_s21 = sld [smem:[#allocation7 + $0xb]] }
  0x3c   : > { %6733 = vmatprep.subr.bf16.mxu1 %v6782_v10  ;;  %6218 = vmatprep.subr.bf16.mxu0 %v6782_v10  ;;  %v216_v50 = vadd.f32 %v213_v42, %v199_v37  ;;  %v217_v51 = vadd.f32 %v214_v43, %v200_v38  ;;  %v218_v52 = vadd.f32 %v215_v44, %v201_v39  ;;  %v822_v53 = vunpack.c.l.bf16 %v5491_v41  ;;  %v6010_v37 = vld [vmem:[%s292_s0] sm:$0xff]   ;;  %v295_v38 = vld [vmem:[%s292_s0 + $0x8] sm:$0x1]  ;;  %v5389_v39 = vld [vmem:[%s292_s0 + $0xc] sm:$0xff]   ;;  %s5948_s27 = smul.u32 12, %s7295_s23  ;;  %s7478_s23 = sld [smem:[#allocation5 + $0x7]] }
  0x3d   : > { %v824_v54 = vmul.f32 %v823_v22, %v820_v48  ;;  %v825_v55 = vmul.f32 %v823_v22, %v821_v49  ;;  %v262_v63 = vstv %s7278_s13  ;;  %v6007_v2 = vunpack.c.l.bf16 %v6006_v60  ;;  %s7829_s12 = sld [smem:[#allocation7 + $0x11]] }
  0x3e   : > { %v5895_v57 = vpack.c.bf16 %v218_v52, %v218_v52  ;;  %v6003_v58 = vpack.c.bf16 %v217_v51, %v216_v50  ;;  %v826_v59 = vmul.f32 %v823_v22, %v822_v53  ;;  %v6008_v3 = vunpack.c.h.bf16 %v6006_v60  ;;  %v5391_v51 = vld [vmem:[%s292_s0 + $0x14] sm:$0x1]  ;;  %s7312_s29 = scalar_lea.vmem %s7255_s20, %s5948_s27  ;;  %s5904_s10 = smul.u32 12, %s7303_s1 }
  0x3f   : > { %6741 = vmatpush3.bf16.msra.mxu1 %v6783_v11  ;;  %6219 = vmatpush3.bf16.msra.mxu0 %v6783_v11  ;;  %v827_v0 = vadd.f32 %v824_v54, %v810_v45  ;;  %v828_v1 = vadd.f32 %v825_v55, %v811_v46  ;;  %v247_v6 = vunpack.c.l.bf16 %v244_v61  ;;  %v259_v7 = vunpack.c.l.bf16 %v5379_v62  ;;  %s7492_s1 = sld [smem:[#allocation6 + $0x7]] }
  0x40   : > { %6734 = vmatprep.subr.bf16.mxu1 %v6784_v12  ;;  %6220 = vmatprep.subr.bf16.mxu0 %v6784_v12  ;;  %6004 = vst [vmem:[#allocation2] sm:$0xff] %v6003_v58   ;;  %234 = vst [vmem:[#allocation2 + $0x8] sm:$0x1] %v5895_v57  ;;  %v829_v5 = vadd.f32 %v826_v59, %v812_v47  ;;  %v260_v8 = vunpack.c.h.bf16 %v5379_v62  ;;  %v249_v10 = vmul.f32 %v6007_v2, %v248_v56  ;;  %s7335_s18 = scalar_lea.vmem %s7255_s20, %s5904_s10  ;;  %s7370_s10 = sld [smem:[#allocation7 + $0xf]] }
  0x41   : > { %v6081_v9 = vpack.c.bf16 %v828_v1, %v827_v0  ;;  %v250_v11 = vmul.f32 %v6008_v3, %v248_v56  ;;  %v261_v12 = vunpack.c.l.bf16 %v5381_v4  ;;  %v263_v15 = vmul.f32 %v262_v63, %v259_v7  ;;  %s7494_s27 = sld [smem:[#allocation7 + $0x7]] }
  0x42   : > { %v264_v16 = vmul.f32 %v262_v63, %v260_v8  ;;  %v6085_v21 = vunpack.c.l.bf16 %v6084_v17  ;;  %v6086_v22 = vunpack.c.h.bf16 %v6084_v17  ;;  %v860_v27 = vstv %s7283_s16  ;;  %v6815_v17 = vld [vmem:[%s8128_s4 + $0x148] sm:$0xff]   ;;  %s5916_s16 = smul.u32 12, %s7452_s30 }
  0x43   : > { %6742 = vmatpush3.bf16.msra.mxu1 %v6785_v13  ;;  %6221 = vmatpush3.bf16.msra.mxu0 %v6785_v13  ;;  %v5943_v13 = vpack.c.bf16 %v829_v5, %v829_v5  ;;  %6082 = vst [vmem:[#allocation2 + $0x90] sm:$0xff] %v6081_v9   ;;  %v265_v20 = vmul.f32 %v262_v63, %v261_v12  ;;  %v871_v28 = vunpack.c.l.bf16 %v5499_v19  ;;  %v874_v41 = vstv %s7290_s19  ;;  %s7584_s19 = sld [smem:[#allocation6 + $0xb]] }
  0x44   : > { %6735 = vmatprep.subr.bf16.mxu1 %v6786_v14  ;;  %6222 = vmatprep.subr.bf16.mxu0 %v6786_v14  ;;  %v251_v14 = vmul.f32 %v248_v56, %v247_v6  ;;  %v266_v25 = vadd.f32 %v263_v15, %v249_v10  ;;  %v267_v26 = vadd.f32 %v264_v16, %v250_v11  ;;  %v6011_v42 = vunpack.c.l.bf16 %v6010_v37  ;;  %v6799_v6 = vld [vmem:[%s8128_s4 + $0x100] sm:$0xff]   ;;  %v907_v16 = vld [vmem:[%s7312_s29 + $0x8] sm:$0x1]  ;;  %s496_s17 = scalar_lea.vmem %s7255_s20, %s5916_s16 }
  0x45   : > { %846 = vst [vmem:[#allocation2 + $0x98] sm:$0x1] %v5943_v13  ;;  %v861_v30 = vmul.f32 %v6085_v21, %v860_v27  ;;  %v862_v31 = vmul.f32 %v6086_v22, %v860_v27  ;;  %v6012_v43 = vunpack.c.h.bf16 %v6010_v37  ;;  %v875_v46 = vmul.f32 %v874_v41, %v871_v28  ;;  %v6088_v10 = vld [vmem:[%s7312_s29] sm:$0xff]  }
  0x46   : > { %v268_v29 = vadd.f32 %v265_v20, %v251_v14  ;;  %v5897_v33 = vpack.c.bf16 %v266_v25, %v266_v25  ;;  %v5898_v34 = vpack.c.bf16 %v267_v26, %v267_v26  ;;  %v298_v49 = vunpack.c.l.bf16 %v295_v38  ;;  %v6795_v26 = vld [vmem:[%s8128_s4 + $0x80] sm:$0xff]  }
  0x47   : > { %6743 = vmatpush3.bf16.msra.mxu1 %v6787_v18  ;;  %6223 = vmatpush3.bf16.msra.mxu0 %v6787_v18  ;;  %v856_v18 = vld [vmem:[%s853_s24 + $0x8] sm:$0x1]  ;;  %v6788_v44 = vld [vmem:[#allocation2] sm:$0xff]   ;;  %v299_v50 = vstv %s7293_s22  ;;  %v310_v52 = vunpack.c.l.bf16 %v5389_v39  ;;  %v311_v53 = vunpack.c.h.bf16 %v5389_v39  ;;  %v313_v54 = vstv %s7298_s25  ;;  %v5509_v39 = vld [vmem:[%s7312_s29 + $0xc] sm:$0xff]   ;;  %s7344_s22 = sld [smem:[#allocation6 + $0x3]]  ;;  %s7434_s24 = sld [smem:[#allocation5 + $0x5]] }
  0x48   : > { %6320 = vmatprep.subr.bf16.mxu1 %v6792_v35  ;;  %6432 = vmatprep.subr.bf16.mxu0 %v6797_v36  ;;  %v859_v23 = vunpack.c.l.bf16 %v856_v18  ;;  %v872_v35 = vunpack.c.h.bf16 %v5499_v19  ;;  %v873_v36 = vunpack.c.l.bf16 %v5501_v24  ;;  %v5899_v40 = vpack.c.bf16 %v268_v29, %v268_v29  ;;  %v6789_v45 = vld [vmem:[#allocation2 + $0x8] ss:$0 sps:$4 sm:$0x11]   ;;  %283 = vst [vmem:[#allocation2 + $0xc] sm:$0xf] %v5897_v33  ;;  %v6793_v13 = vld [vmem:[#allocation2] sm:$0xff]  }
  0x49   : > { %284 = vst [vmem:[#allocation2 + $0x10] sm:$0xf] %v5898_v34  ;;  %v1424_v55 = vshrl.u32 %v6788_v44, 16  ;;  %v1426_v56 = vshll.u32 %v6788_v44, 16  ;;  %v1431_v57 = vshll.u32 %v6789_v45, 16  ;;  %v878_v59 = vadd.f32 %v875_v46, %v861_v30  ;;  %v6819_v45 = vld [vmem:[%s8128_s4 + $0x108] sm:$0xff]  }
  0x4a   : > { %v863_v32 = vmul.f32 %v860_v27, %v859_v23  ;;  %v876_v47 = vmul.f32 %v874_v41, %v872_v35  ;;  %v877_v48 = vmul.f32 %v874_v41, %v873_v36  ;;  %285 = vst [vmem:[#allocation2 + $0x14] sm:$0x1] %v5899_v40  ;;  %v6790_v58 = vld [vmem:[#allocation2 + $0x90] sm:$0xff]   ;;  %v300_v62 = vmul.f32 %v6011_v42, %v299_v50  ;;  %v6798_v46 = vld [vmem:[%s8128_s4 + $0x88] sm:$0xff]   ;;  %s7349_s25 = sld [smem:[#allocation7 + $0x3]] }
  0x4b   : > { %v301_v63 = vmul.f32 %v6012_v43, %v299_v50  ;;  %v1428_v0 = vrot.slane %v1426_v56, 1  ;;  %v1433_v1 = vrot.slane %v1431_v57, 1  ;;  %v1568_v3 = vshrl.u32 %v6790_v58, 16  ;;  %v6794_v19 = vld [vmem:[#allocation2 + $0x90] sm:$0xff]  }
  0x4c   : > { %v879_v60 = vadd.f32 %v876_v47, %v862_v31  ;;  %v880_v61 = vadd.f32 %v877_v48, %v863_v32  ;;  %v6791_v2 = vld [vmem:[#allocation2 + $0x98] ss:$0 sps:$4 sm:$0x11]   ;;  %v5945_v4 = vpack.c.bf16 %v878_v59, %v878_v59  ;;  %v1570_v5 = vshll.u32 %v6790_v58, 16  ;;  %v6796_v31 = vld [vmem:[%s8128_s4 + $0xc8] sm:$0xff]  }
  0x4d   : > { %v302_v9 = vmul.f32 %v299_v50, %v298_v49  ;;  %v1429_v11 = vor.u32 %v1428_v0, %v1424_v55  ;;  %v1575_v12 = vshll.u32 %v6791_v2, 16  ;;  %v312_v14 = vunpack.c.l.bf16 %v5391_v51  ;;  %v5511_v40 = vld [vmem:[%s7312_s29 + $0x14] sm:$0x1]  ;;  %v5399_v58 = vld [vmem:[%s7335_s18 + $0xc] sm:$0xff]   ;;  %s7406_s29 = sld [smem:[#allocation6 + $0x4]] }
  0x4e   : > { %v5946_v7 = vpack.c.bf16 %v879_v60, %v879_v60  ;;  %v5947_v8 = vpack.c.bf16 %v880_v61, %v880_v61  ;;  %895 = vst [vmem:[#allocation2 + $0x9c] sm:$0xf] %v5945_v4  ;;  %v314_v15 = vmul.f32 %v313_v54, %v310_v52  ;;  %v1572_v18 = vrot.slane %v1570_v5, 1  ;;  %v6019_v52 = vld [vmem:[%s7335_s18] sm:$0xff]   ;;  %v6804_v2 = vld [vmem:[%s8128_s4 + $0xd0] sm:$0xff]  }
  0x4f   : > { %v315_v21 = vmul.f32 %v313_v54, %v311_v53  ;;  %v6089_v22 = vunpack.c.l.bf16 %v6088_v10  ;;  %v6090_v23 = vunpack.c.h.bf16 %v6088_v10  ;;  %v1434_v24 = vsel %vm1422_vm0, %v1429_v11, %v1433_v1  ;;  %v346_v53 = vld [vmem:[%s7335_s18 + $0x8] sm:$0x1] }
  0x50   : > { %v6800_v20 = vld [vmem:[#allocation2 + $0xc] sm:$0xff]   ;;  %896 = vst [vmem:[#allocation2 + $0xa0] sm:$0xf] %v5946_v7  ;;  %897 = vst [vmem:[#allocation2 + $0xa4] sm:$0x1] %v5947_v8  ;;  %v1577_v25 = vrot.slane %v1575_v12, 1  ;;  %v316_v28 = vmul.f32 %v313_v54, %v312_v14  ;;  %v317_v29 = vadd.f32 %v314_v15, %v300_v62  ;;  %4256 = vmatprep.mubr.bf16.mxu0 %v1434_v24  ;;  %v910_v37 = vunpack.c.l.bf16 %v907_v16 }
  0x51   : > { %v6801_v27 = vld [vmem:[#allocation2 + $0x14] ss:$0 sps:$4 sm:$0x11]   ;;  %v1573_v30 = vor.u32 %v1572_v18, %v1568_v3  ;;  %v1436_v32 = vshrl.u32 %v6800_v20, 16  ;;  %v1438_v33 = vshll.u32 %v6800_v20, 16  ;;  %v318_v34 = vadd.f32 %v315_v21, %v301_v63  ;;  %4257 = vmatmul.mubr.bf16.vlgmr.msra.gmra.mrb[0].mxu0 %v6793_v13  ;;  %v6805_v48 = vld [vmem:[#allocation2 + $0xc] sm:$0xff]  }
  0x52   : > { %v1443_v35 = vshll.u32 %v6801_v27, 16  ;;  %v319_v36 = vadd.f32 %v316_v28, %v302_v9  ;;  %v911_v38 = vstv %s7309_s28  ;;  %6433 = vmatpush3.bf16.msra.mxu0 %v6799_v6  ;;  %v922_v55 = vunpack.c.l.bf16 %v5509_v39  ;;  %v6807_v8 = vld [vmem:[%s8128_s4 + $0x90] sm:$0xff]   ;;  %s7363_s28 = sld [smem:[#allocation5 + $0xf]]  ;;  %v6808_v13 = vld [vmem:[%s8128_s4 + $0xd8] sm:$0xff]  }
  0x53   : > { %v1578_v41 = vsel %vm1422_vm0, %v1573_v30, %v1577_v25  ;;  %v1440_v42 = vrot.slane %v1438_v33, 1  ;;  %v6016_v43 = vpack.c.bf16 %v318_v34, %v317_v29  ;;  %v912_v44 = vmul.f32 %v6089_v22, %v911_v38  ;;  %6434 = vmatprep.subr.bf16.mxu0 %v6815_v17  ;;  %v5401_v9 = vld [vmem:[%s7335_s18 + $0x14] sm:$0x1]  ;;  %v6809_v27 = vld [vmem:[%s8128_s4 + $0x98] sm:$0xff]   ;;  %v6814_v33 = vld [vmem:[%s8128_s4 + $0xe0] sm:$0xff]  }
  0x54   : > { %4352 = vmatprep.mubr.bf16.mxu1 %v1578_v41  ;;  %v1445_v47 = vrot.slane %v1443_v35, 1  ;;  %v5903_v49 = vpack.c.bf16 %v319_v36, %v319_v36  ;;  %v913_v50 = vmul.f32 %v6090_v23, %v911_v38  ;;  %v914_v51 = vmul.f32 %v911_v38, %v910_v37 }
  0x55   : > { %4353 = vmatmul.mubr.bf16.vlgmr.msra.gmra.mrb[0].mxu1 %v6794_v19  ;;  %v1441_v54 = vor.u32 %v1440_v42, %v1436_v32  ;;  %6017 = vst [vmem:[#allocation2 + $0x18] sm:$0xff] %v6016_v43   ;;  %v923_v56 = vunpack.c.h.bf16 %v5509_v39  ;;  %v924_v57 = vunpack.c.l.bf16 %v5511_v40  ;;  %v925_v60 = vstv %s7319_s11 }
  0x56   : > { %6321 = vmatpush3.bf16.msra.mxu1 %v6795_v26  ;;  %336 = vst [vmem:[#allocation2 + $0x20] sm:$0x1] %v5903_v49  ;;  %v6020_v61 = vunpack.c.l.bf16 %v6019_v52  ;;  %v6021_v62 = vunpack.c.h.bf16 %v6019_v52  ;;  %v349_v63 = vunpack.c.l.bf16 %v346_v53  ;;  %v926_v3 = vmul.f32 %v925_v60, %v922_v55  ;;  %6435 = vmatpush3.bf16.msra.mxu0 %v6819_v45  ;;  %v6818_v45 = vld [vmem:[%s8128_s4 + $0xa0] sm:$0xff]  }
  0x57   : > { %v6802_v59 = vld [vmem:[#allocation2 + $0x9c] sm:$0xff]   ;;  %6322 = vmatprep.subr.bf16.mxu1 %v6796_v31  ;;  %v1446_v0 = vsel %vm1422_vm0, %v1441_v54, %v1445_v47  ;;  %v6803_v1 = vld [vmem:[#allocation2 + $0xa4] ss:$0 sps:$4 sm:$0x11]   ;;  %v927_v4 = vmul.f32 %v925_v60, %v923_v56  ;;  %v928_v5 = vmul.f32 %v925_v60, %v924_v57  ;;  %v361_v10 = vunpack.c.l.bf16 %v5399_v58  ;;  %v6820_v57 = vld [vmem:[%s8128_s4 + $0xe8] sm:$0xff]  }
  0x58   : > { %4264 = vmatprep.mubr.bf16.mxu0 %v1446_v0  ;;  %v1580_v6 = vshrl.u32 %v6802_v59, 16  ;;  %v1582_v7 = vshll.u32 %v6802_v59, 16  ;;  %v362_v11 = vunpack.c.h.bf16 %v5399_v58  ;;  %v1587_v12 = vshll.u32 %v6803_v1, 16  ;;  %v6806_v22 = vld [vmem:[#allocation2 + $0x9c] sm:$0xff]   ;;  %s5952_s15 = smul.u32 12, %s7363_s28  ;;  %v6821_v0 = vld [vmem:[%s8128_s4 + $0xa8] sm:$0xff]  }
  0x59   : > { %v929_v14 = vadd.f32 %v926_v3, %v912_v44  ;;  %v930_v15 = vadd.f32 %v927_v4, %v913_v50  ;;  %v931_v16 = vadd.f32 %v928_v5, %v914_v51  ;;  %4265 = vmatmul.mubr.bf16.gmra.mrb[4].mxu0 %v6805_v48  ;;  %v350_v18 = vstv %s7344_s22  ;;  %v6831_v51 = vld [vmem:[%s8128_s4 + $0x150] sm:$0xff]   ;;  %s7391_s22 = sld [smem:[#allocation5 + $0x4]]  ;;  %s5920_s28 = smul.u32 12, %s7478_s23 }
  0x5a   : > { %6323 = vmatpush3.bf16.msra.mxu1 %v6798_v46  ;;  %v1584_v17 = vrot.slane %v1582_v7, 1  ;;  %v363_v19 = vunpack.c.l.bf16 %v5401_v9  ;;  %v364_v20 = vstv %s7349_s25  ;;  %v1589_v21 = vrot.slane %v1587_v12, 1  ;;  %s955_s18 = scalar_lea.vmem %s7255_s20, %s5952_s15  ;;  %6436 = vmatprep.subr.bf16.mxu0 %v6831_v51  ;;  %s7436_s25 = sld [smem:[#allocation6 + $0x5]] }
  0x5b   : > { %6324 = vmatprep.subr.bf16.mxu1 %v6804_v2  ;;  %v5951_v23 = vpack.c.bf16 %v931_v16, %v931_v16  ;;  %v6094_v24 = vpack.c.bf16 %v930_v15, %v929_v14  ;;  %v351_v25 = vmul.f32 %v6020_v61, %v350_v18  ;;  %v352_v29 = vmul.f32 %v6021_v62, %v350_v18  ;;  %v6097_v53 = vld [vmem:[%s955_s18] sm:$0xff]   ;;  %v958_v54 = vld [vmem:[%s955_s18 + $0x8] sm:$0x1]  ;;  %v5519_v55 = vld [vmem:[%s955_s18 + $0xc] sm:$0xff]   ;;  %s7544_s23 = sld [smem:[#allocation6 + $0x9]] }
  0x5c   : > { %v1585_v26 = vor.u32 %v1584_v17, %v1580_v6  ;;  %v6810_v28 = vld [vmem:[#allocation2 + $0x18] sm:$0xff]   ;;  %v353_v30 = vmul.f32 %v350_v18, %v349_v63  ;;  %v365_v31 = vmul.f32 %v364_v20, %v361_v10  ;;  %v366_v34 = vmul.f32 %v364_v20, %v362_v11  ;;  %v5521_v61 = vld [vmem:[%s955_s18 + $0x14] sm:$0x1] }
  0x5d   : > { %v6811_v32 = vld [vmem:[#allocation2 + $0x20] ss:$0 sps:$4 sm:$0x11]   ;;  %6095 = vst [vmem:[#allocation2 + $0xa8] sm:$0xff] %v6094_v24   ;;  %948 = vst [vmem:[#allocation2 + $0xb0] sm:$0x1] %v5951_v23  ;;  %v367_v35 = vmul.f32 %v364_v20, %v363_v19  ;;  %v962_v50 = vstv %s7368_s9  ;;  %v976_v56 = vstv %s7370_s10  ;;  %v6098_v58 = vunpack.c.l.bf16 %v6097_v53 }
  0x5e   : > { %v1590_v36 = vsel %vm1422_vm0, %v1585_v26, %v1589_v21  ;;  %6325 = vmatpush3.bf16.msra.mxu1 %v6807_v8  ;;  %v1448_v37 = vshrl.u32 %v6810_v28, 16  ;;  %v1450_v38 = vshll.u32 %v6810_v28, 16  ;;  %v368_v39 = vadd.f32 %v365_v31, %v351_v25  ;;  %v6816_v44 = vld [vmem:[#allocation2 + $0x18] sm:$0xff]   ;;  %v6826_v11 = vld [vmem:[%s8128_s4 + $0xf0] sm:$0xff]   ;;  %s7411_s10 = sld [smem:[#allocation7 + $0x4]]  ;;  %s7454_s9 = sld [smem:[#allocation6 + $0x6]] }
  0x5f   : > { %4360 = vmatprep.mubr.bf16.mxu1 %v1590_v36  ;;  %6326 = vmatprep.subr.bf16.mxu1 %v6808_v13  ;;  %v1455_v40 = vshll.u32 %v6811_v32, 16  ;;  %v369_v41 = vadd.f32 %v366_v34, %v352_v29  ;;  %v370_v42 = vadd.f32 %v367_v35, %v353_v30  ;;  %v6099_v59 = vunpack.c.h.bf16 %v6097_v53  ;;  %v6833_v16 = vld [vmem:[%s8128_s4 + $0x110] sm:$0xff]   ;;  %s5908_s11 = smul.u32 12, %s7391_s22  ;;  %v6830_v23 = vld [vmem:[%s8128_s4 + $0xf8] sm:$0xff]   ;;  %s7542_s22 = sld [smem:[#allocation5 + $0x9]] }
  0x60   : > { %4361 = vmatmul.mubr.bf16.gmra.mrb[4].mxu1 %v6806_v22  ;;  %v1452_v43 = vrot.slane %v1450_v38, 1  ;;  %v5905_v46 = vpack.c.bf16 %v368_v39, %v368_v39  ;;  %v961_v60 = vunpack.c.l.bf16 %v958_v54  ;;  %v973_v62 = vunpack.c.l.bf16 %v5519_v55  ;;  %v6829_v19 = vld [vmem:[%s8128_s4 + $0xb0] sm:$0xff]   ;;  %6437 = vmatpush3.bf16.msra.mxu0 %v6833_v16 }
  0x61   : > { %v1457_v47 = vrot.slane %v1455_v40, 1  ;;  %v5906_v48 = vpack.c.bf16 %v369_v41, %v369_v41  ;;  %v5907_v49 = vpack.c.bf16 %v370_v42, %v370_v42  ;;  %v974_v1 = vunpack.c.h.bf16 %v5519_v55  ;;  %s394_s14 = scalar_lea.vmem %s7255_s20, %s5908_s11  ;;  %v7445_v16 = vld [vmem:[#allocation2 + $0x14] ss:$0 sps:$4 sm:$0x11]   ;;  %s7569_s11 = sld [smem:[#allocation7 + $0xa]] }
  0x62   : > { %6327 = vmatpush3.bf16.msra.mxu1 %v6809_v27  ;;  %v1453_v52 = vor.u32 %v1452_v43, %v1448_v37  ;;  %385 = vst [vmem:[#allocation2 + $0x24] sm:$0xf] %v5905_v46  ;;  %v975_v2 = vunpack.c.l.bf16 %v5521_v61  ;;  %v963_v5 = vmul.f32 %v6098_v58, %v962_v50  ;;  %v964_v6 = vmul.f32 %v6099_v59, %v962_v50  ;;  %v6023_v32 = vld [vmem:[%s394_s14] sm:$0xff]   ;;  %v5409_v34 = vld [vmem:[%s394_s14 + $0xc] sm:$0xff]   ;;  %v6832_v37 = vld [vmem:[%s8128_s4 + $0xb8] sm:$0xff]  }
  0x63   : > { %6328 = vmatprep.subr.bf16.mxu1 %v6814_v33  ;;  %386 = vst [vmem:[#allocation2 + $0x28] sm:$0xf] %v5906_v48  ;;  %387 = vst [vmem:[#allocation2 + $0x2c] sm:$0x1] %v5907_v49  ;;  %v965_v7 = vmul.f32 %v962_v50, %v961_v60  ;;  %v977_v8 = vmul.f32 %v976_v56, %v973_v62  ;;  %v978_v9 = vmul.f32 %v976_v56, %v974_v1  ;;  %v397_v33 = vld [vmem:[%s394_s14 + $0x8] sm:$0x1] }
  0x64   : > { %v1458_v63 = vsel %vm1422_vm0, %v1453_v52, %v1457_v47  ;;  %v6812_v3 = vld [vmem:[#allocation2 + $0xa8] sm:$0xff]   ;;  %v6813_v4 = vld [vmem:[#allocation2 + $0xb0] ss:$0 sps:$4 sm:$0x11]   ;;  %v979_v10 = vmul.f32 %v976_v56, %v975_v2  ;;  %v6024_v38 = vunpack.c.l.bf16 %v6023_v32  ;;  %v6025_v39 = vunpack.c.h.bf16 %v6023_v32  ;;  %v5411_v40 = vld [vmem:[%s394_s14 + $0x14] sm:$0x1] }
  0x65   : > { %4272 = vmatprep.mubr.bf16.mxu0 %v1458_v63  ;;  %v1592_v12 = vshrl.u32 %v6812_v3, 16  ;;  %v1594_v13 = vshll.u32 %v6812_v3, 16  ;;  %v1599_v14 = vshll.u32 %v6813_v4, 16  ;;  %v980_v15 = vadd.f32 %v977_v8, %v963_v5  ;;  %v6817_v28 = vld [vmem:[#allocation2 + $0xa8] sm:$0xff]   ;;  %v6845_v50 = vld [vmem:[%s8128_s4 + $0x158] sm:$0xff]   ;;  %s7521_s14 = sld [smem:[#allocation7 + $0x8]] }
  0x66   : > { %4273 = vmatmul.mubr.bf16.gmra.mrb[8].mxu0 %v6816_v44  ;;  %6329 = vmatpush3.bf16.msra.mxu1 %v6818_v45  ;;  %v981_v17 = vadd.f32 %v978_v9, %v964_v6  ;;  %v982_v18 = vadd.f32 %v979_v10, %v965_v7  ;;  %v400_v42 = vunpack.c.l.bf16 %v397_v33  ;;  %v401_v43 = vstv %s7406_s29  ;;  %v6837_v45 = vld [vmem:[%s8128_s4 + $0x1c0] sm:$0xff]   ;;  %v6849_v58 = vld [vmem:[%s8128_s4 + $0x118] sm:$0xff]   ;;  %v6840_v8 = vld [vmem:[#allocation2 + $0x8] ss:$0 sps:$4 sm:$0x11]   ;;  %s5912_s29 = smul.u32 12, %s7434_s24 }
  0x67   : > { %6330 = vmatprep.subr.bf16.mxu1 %v6820_v57  ;;  %v1596_v20 = vrot.slane %v1594_v13, 1  ;;  %v1601_v21 = vrot.slane %v1599_v14, 1  ;;  %v5953_v22 = vpack.c.bf16 %v980_v15, %v980_v15  ;;  %v412_v44 = vunpack.c.l.bf16 %v5409_v34  ;;  %6438 = vmatprep.subr.bf16.mxu0 %v6845_v50  ;;  %v6839_v5 = vld [vmem:[#allocation2] sm:$0xfe]   ;;  %v7443_v15 = vld [vmem:[#allocation2 + $0xc] sm:$0xfe]  }
  0x68   : > { %v5954_v25 = vpack.c.bf16 %v981_v17, %v981_v17  ;;  %v5955_v26 = vpack.c.bf16 %v982_v18, %v982_v18  ;;  %v402_v47 = vmul.f32 %v6024_v38, %v401_v43  ;;  %v403_v48 = vmul.f32 %v6025_v39, %v401_v43  ;;  %6439 = vmatpush3.bf16.msra.mxu0 %v6849_v58  ;;  %v6858_v13 = vld [vmem:[%s8128_s4 + $0x160] sm:$0xff]   ;;  %s445_s13 = scalar_lea.vmem %s7255_s20, %s5912_s29  ;;  %s7546_s24 = sld [smem:[#allocation7 + $0x9]] }
  0x69   : > { %v1597_v27 = vor.u32 %v1596_v20, %v1592_v12  ;;  %997 = vst [vmem:[#allocation2 + $0xb4] sm:$0xf] %v5953_v22  ;;  %v413_v49 = vunpack.c.h.bf16 %v5409_v34  ;;  %v404_v53 = vmul.f32 %v401_v43, %v400_v42  ;;  %v414_v54 = vunpack.c.l.bf16 %v5411_v40  ;;  %v6836_v12 = vld [vmem:[#allocation2 + $0xc] sm:$0xff]   ;;  %6440 = vmatprep.subr.bf16.mxu0 %v6858_v13  ;;  %v6859_v17 = vld [vmem:[%s8128_s4 + $0x120] sm:$0xff]   ;;  %v448_v33 = vld [vmem:[%s445_s13 + $0x8] sm:$0x1] }
  0x6a   : > { %6331 = vmatpush3.bf16.msra.mxu1 %v6821_v0  ;;  %v6822_v24 = vld [vmem:[#allocation2 + $0x24] sm:$0xff]   ;;  %v6823_v29 = vld [vmem:[#allocation2 + $0x2c] ss:$0 sps:$4 sm:$0x11]   ;;  %998 = vst [vmem:[#allocation2 + $0xb8] sm:$0xf] %v5954_v25  ;;  %v415_v55 = vstv %s7411_s10  ;;  %v451_v39 = vunpack.c.l.bf16 %v448_v33 }
  0x6b   : > { %6332 = vmatprep.subr.bf16.mxu1 %v6826_v11  ;;  %v1460_v30 = vshrl.u32 %v6822_v24, 16  ;;  %v1462_v31 = vshll.u32 %v6822_v24, 16  ;;  %999 = vst [vmem:[#allocation2 + $0xbc] sm:$0x1] %v5955_v26  ;;  %v1602_v35 = vsel %vm1422_vm0, %v1597_v27, %v1601_v21  ;;  %v1467_v36 = vshll.u32 %v6823_v29, 16  ;;  %v6827_v52 = vld [vmem:[#allocation2 + $0x24] sm:$0xff]  }
  0x6c   : > { %4368 = vmatprep.mubr.bf16.mxu1 %v1602_v35  ;;  %v416_v56 = vmul.f32 %v415_v55, %v412_v44  ;;  %v417_v57 = vmul.f32 %v415_v55, %v413_v49  ;;  %v418_v60 = vmul.f32 %v415_v55, %v414_v54  ;;  %v1825_v20 = vrot.slane %v6840_v8, 1  ;;  %s7456_s10 = sld [smem:[#allocation7 + $0x6]]  ;;  %6441 = vmatpush3.bf16.msra.mxu0 %v6859_v17  ;;  %v6869_v21 = vld [vmem:[%s8128_s4 + $0x168] sm:$0xff]   ;;  %v6032_v32 = vld [vmem:[%s445_s13] sm:$0xff]   ;;  %v5421_v40 = vld [vmem:[%s445_s13 + $0x14] sm:$0x1] }
  0x6d   : > { %v1464_v41 = vrot.slane %v1462_v31, 1  ;;  %4369 = vmatmul.mubr.bf16.gmra.mrb[8].mxu1 %v6817_v28  ;;  %v1469_v46 = vrot.slane %v1467_v36, 1  ;;  %6442 = vmatprep.subr.bf16.mxu0 %v6869_v21  ;;  %v1828_v25 = vrot.slane %v7445_v16, 1  ;;  %v6841_v28 = vld [vmem:[%s8128_s4 + $0x180] sm:$0xff]   ;;  %v452_v29 = vstv %s7436_s25  ;;  %v5419_v34 = vld [vmem:[%s445_s13 + $0xc] sm:$0xff]   ;;  %s7519_s13 = sld [smem:[#allocation6 + $0x8]] }
  0x6e   : > { %6333 = vmatpush3.bf16.msra.mxu1 %v6829_v19  ;;  %v419_v62 = vadd.f32 %v416_v56, %v402_v47  ;;  %v420_v63 = vadd.f32 %v417_v57, %v403_v48  ;;  %v421_v1 = vadd.f32 %v418_v60, %v404_v53  ;;  %v1824_v19 = vrot.slane %v6839_v5, 1  ;;  %v499_v53 = vld [vmem:[%s496_s17 + $0x8] sm:$0x1]  ;;  %v5431_v60 = vld [vmem:[%s496_s17 + $0x14] sm:$0x1]  ;;  %s5928_s25 = smul.u32 12, %s7542_s22 }
  0x6f   : > { %6334 = vmatprep.subr.bf16.mxu1 %v6830_v23  ;;  %v1465_v51 = vor.u32 %v1464_v41, %v1460_v30  ;;  %v1827_v23 = vrot.slane %v7443_v15, 1  ;;  %v466_v35 = vstv %s7438_s26  ;;  %v6034_v38 = vunpack.c.h.bf16 %v6032_v32  ;;  %v6844_v41 = vld [vmem:[#allocation2 + $0x18] sm:$0xff]   ;;  %v6857_v54 = vld [vmem:[%s8128_s4 + $0x188] sm:$0xff]   ;;  %v7490_v8 = vld [vmem:[#allocation2 + $0x20] ss:$0 sps:$4 sm:$0x11]  }
  0x70   : > { %v6029_v4 = vpack.c.bf16 %v420_v63, %v419_v62  ;;  %v5911_v7 = vpack.c.bf16 %v421_v1, %v421_v1  ;;  %v1826_v31 = vsel %vm1823_vm1, %v1824_v19, %v1825_v20  ;;  %v463_v43 = vunpack.c.l.bf16 %v5419_v34  ;;  %v6852_v21 = vld [vmem:[#allocation2 + $0x24] sm:$0xff]   ;;  %s5526_s22 = sld [smem:[#allocation6 + $0x10]] }
  0x71   : > { %v1470_v59 = vsel %vm1422_vm0, %v1465_v51, %v1469_v46  ;;  %v6824_v61 = vld [vmem:[#allocation2 + $0xb4] sm:$0xff]   ;;  %v464_v44 = vunpack.c.h.bf16 %v5419_v34  ;;  %v6853_v46 = vld [vmem:[%s8128_s4 + $0x1c8] sm:$0xff]   ;;  %v454_v50 = vmul.f32 %v6034_v38, %v452_v29  ;;  %v455_v51 = vmul.f32 %v452_v29, %v451_v39 }
  0x72   : > { %6335 = vmatpush3.bf16.msra.mxu1 %v6832_v37  ;;  %4280 = vmatprep.mubr.bf16.mxu0 %v1470_v59  ;;  %v6825_v0 = vld [vmem:[#allocation2 + $0xbc] ss:$0 sps:$4 sm:$0x11]   ;;  %v1604_v2 = vshrl.u32 %v6824_v61, 16  ;;  %v1606_v3 = vshll.u32 %v6824_v61, 16  ;;  %v6828_v10 = vld [vmem:[#allocation2 + $0xb4] sm:$0xff]   ;;  %v6033_v37 = vunpack.c.l.bf16 %v6032_v32  ;;  %v467_v55 = vmul.f32 %v466_v35, %v463_v43 }
  0x73   : > { %6544 = vmatprep.subr.bf16.mxu1 %v6837_v45  ;;  %4281 = vmatmul.mubr.bf16.gmra.mrb[12].mxu0 %v6827_v52  ;;  %v1611_v6 = vshll.u32 %v6825_v0, 16  ;;  %6030 = vst [vmem:[#allocation2 + $0x30] sm:$0xff] %v6029_v4   ;;  %438 = vst [vmem:[#allocation2 + $0x38] sm:$0x1] %v5911_v7  ;;  %v465_v45 = vunpack.c.l.bf16 %v5421_v40  ;;  %v6036_v52 = vld [vmem:[%s496_s17] sm:$0xff]   ;;  %v468_v56 = vmul.f32 %v466_v35, %v464_v44  ;;  %v5429_v59 = vld [vmem:[%s496_s17 + $0xc] sm:$0xff]   ;;  %v502_v0 = vunpack.c.l.bf16 %v499_v53 }
  0x74   : > { %v1608_v9 = vrot.slane %v1606_v3, 1  ;;  %v453_v49 = vmul.f32 %v6033_v37, %v452_v29  ;;  %v6037_v58 = vunpack.c.l.bf16 %v6036_v52  ;;  %v6870_v61 = vld [vmem:[%s8128_s4 + $0x1d0] sm:$0xff]   ;;  %v6038_v63 = vunpack.c.h.bf16 %v6036_v52  ;;  %v6874_v3 = vld [vmem:[%s8128_s4 + $0x128] sm:$0xff]  }
  0x75   : > { %v1613_v11 = vrot.slane %v1611_v6, 1  ;;  %v469_v57 = vmul.f32 %v466_v35, %v465_v45  ;;  %v503_v1 = vstv %s7454_s9  ;;  %v471_v5 = vadd.f32 %v468_v56, %v454_v50  ;;  %6443 = vmatpush3.bf16.msra.mxu0 %v6874_v3  ;;  %s547_s9 = scalar_lea.vmem %s7255_s20, %s5920_s28  ;;  %v7508_v15 = vld [vmem:[#allocation2 + $0x24] sm:$0xfe]   ;;  %v7517_v39 = vld [vmem:[#allocation2 + $0x2c] ss:$0 sps:$4 sm:$0x11]   ;;  %s649_s28 = scalar_lea.vmem %s7255_s20, %s5928_s25 }
  0x76   : > { %v1609_v14 = vor.u32 %v1608_v9, %v1604_v2  ;;  %v7485_v2 = vld [vmem:[#allocation2 + $0x18] sm:$0xfe]   ;;  %v470_v4 = vadd.f32 %v467_v55, %v453_v49  ;;  %v504_v7 = vmul.f32 %v6037_v58, %v503_v1  ;;  %v505_v9 = vmul.f32 %v6038_v63, %v503_v1  ;;  %v550_v32 = vld [vmem:[%s547_s9 + $0x8] sm:$0x1]  ;;  %v5439_v33 = vld [vmem:[%s547_s9 + $0xc] sm:$0xff]  }
  0x77   : > { %v472_v6 = vadd.f32 %v469_v57, %v455_v51  ;;  %v1829_v19 = vsel %vm1823_vm1, %v1827_v23, %v1828_v25  ;;  %v517_v20 = vstv %s7456_s10  ;;  %v1830_v16 = vrot.slane %v7485_v2, 1  ;;  %s7510_s10 = sld [smem:[#allocation5 + $0x8]]  ;;  %v6882_v23 = vld [vmem:[%s8128_s4 + $0x170] sm:$0xff]  }
  0x78   : > { %v1614_v18 = vsel %vm1422_vm0, %v1609_v14, %v1613_v11  ;;  %v514_v11 = vunpack.c.l.bf16 %v5429_v59  ;;  %v5913_v13 = vpack.c.bf16 %v470_v4, %v470_v4  ;;  %v5914_v14 = vpack.c.bf16 %v471_v5, %v471_v5  ;;  %v5441_v38 = vld [vmem:[%s547_s9 + $0x14] sm:$0x1]  ;;  %6444 = vmatprep.subr.bf16.mxu0 %v6882_v23 }
  0x79   : > { %4376 = vmatprep.mubr.bf16.mxu1 %v1614_v18  ;;  %v5915_v17 = vpack.c.bf16 %v472_v6, %v472_v6  ;;  %v516_v18 = vunpack.c.l.bf16 %v5431_v60  ;;  %v554_v37 = vstv %s7492_s1  ;;  %v566_v43 = vunpack.c.h.bf16 %v5439_v33  ;;  %v6883_v52 = vld [vmem:[%s8128_s4 + $0x130] sm:$0xff]  }
  0x7a   : > { %4377 = vmatmul.mubr.bf16.gmra.mrb[12].mxu1 %v6828_v10  ;;  %v6834_v22 = vld [vmem:[#allocation2 + $0x30] sm:$0xff]   ;;  %v6835_v24 = vld [vmem:[#allocation2 + $0x38] ss:$0 sps:$4 sm:$0x11]   ;;  %v506_v10 = vmul.f32 %v503_v1, %v502_v0  ;;  %487 = vst [vmem:[#allocation2 + $0x3c] sm:$0xf] %v5913_v13  ;;  %v568_v49 = vstv %s7494_s27  ;;  %6445 = vmatpush3.bf16.msra.mxu0 %v6883_v52  ;;  %v605_v2 = vstv %s7519_s13 }
  0x7b   : > { %4417 = vmatprep.mubr.bf16.mxu1 %v6836_v12  ;;  %v1472_v26 = vshrl.u32 %v6834_v22, 16  ;;  %v1474_v27 = vshll.u32 %v6834_v22, 16  ;;  %v1479_v30 = vshll.u32 %v6835_v24, 16  ;;  %v6838_v48 = vld [vmem:[#allocation2 + $0x30] sm:$0xff]   ;;  %v515_v12 = vunpack.c.h.bf16 %v5429_v59  ;;  %488 = vst [vmem:[#allocation2 + $0x40] sm:$0xf] %v5914_v14 }
  0x7c   : > { %v6875_v22 = vld [vmem:[%s8128_s4 + $0x190] sm:$0xff]   ;;  %489 = vst [vmem:[#allocation2 + $0x44] sm:$0x1] %v5915_v17  ;;  %v518_v24 = vmul.f32 %v517_v20, %v514_v11  ;;  %v1833_v50 = vrot.slane %v7508_v15, 1  ;;  %v570_v55 = vmul.f32 %v568_v49, %v566_v43  ;;  %v619_v14 = vstv %s7521_s14 }
  0x7d   : > { %v1476_v36 = vrot.slane %v1474_v27, 1  ;;  %v1481_v42 = vrot.slane %v1479_v30, 1  ;;  %v520_v27 = vmul.f32 %v517_v20, %v516_v18  ;;  %v1831_v30 = vrot.slane %v7490_v8, 1  ;;  %v7525_v51 = vld [vmem:[#allocation2 + $0x30] sm:$0xfe]   ;;  %s5924_s17 = smul.u32 12, %s7510_s10 }
  0x7e   : > { %v521_v25 = vadd.f32 %v518_v24, %v504_v7  ;;  %v6873_v6 = vld [vmem:[#allocation2 + $0x38] ss:$0 sps:$4 sm:$0x11]   ;;  %v1836_v7 = vrot.slane %v7525_v51, 1  ;;  %s7566_s10 = sld [smem:[#allocation6 + $0xa]] }
  0x7f   : > { %v1477_v47 = vor.u32 %v1476_v36, %v1472_v26  ;;  %v519_v26 = vmul.f32 %v517_v20, %v515_v12  ;;  %v523_v29 = vadd.f32 %v520_v27, %v506_v10  ;;  %v553_v36 = vunpack.c.l.bf16 %v550_v32  ;;  %s598_s18 = scalar_lea.vmem %s7255_s20, %s5924_s17 }
  0x80   : > { %v1832_v53 = vsel %vm1823_vm1, %v1830_v16, %v1831_v30  ;;  %v6049_v11 = vld [vmem:[%s598_s18] sm:$0xff]   ;;  %v601_v12 = vld [vmem:[%s598_s18 + $0x8] sm:$0x1]  ;;  %v5449_v13 = vld [vmem:[%s598_s18 + $0xc] sm:$0xff]  }
  0x81   : > { %v1482_v62 = vsel %vm1422_vm0, %v1477_v47, %v1481_v42  ;;  %v5919_v40 = vpack.c.bf16 %v523_v29, %v523_v29  ;;  %v565_v42 = vunpack.c.l.bf16 %v5439_v33  ;;  %v567_v47 = vunpack.c.l.bf16 %v5441_v38  ;;  %v6887_v38 = vld [vmem:[%s8128_s4 + $0x1d8] sm:$0xff]  }
  0x82   : > { %4418 = vmatmul.mubr.bf16.vlgmr.msra.gmra.mrb[16].mxu1 %v1826_v31  ;;  %4288 = vmatprep.mubr.bf16.mxu0 %v1482_v62  ;;  %v6045_v31 = vld [vmem:[%s547_s9] sm:$0xff]   ;;  %v1834_v62 = vrot.slane %v7517_v39, 1  ;;  %v6050_v17 = vunpack.c.l.bf16 %v6049_v11  ;;  %v6051_v18 = vunpack.c.h.bf16 %v6049_v11  ;;  %v616_v20 = vunpack.c.l.bf16 %v5449_v13  ;;  %v5461_v11 = vld [vmem:[%s649_s28 + $0x14] sm:$0x1]  ;;  %s7564_s9 = sld [smem:[#allocation5 + $0xa]] }
  0x83   : > { %6545 = vmatpush3.bf16.msra.mxu1 %v6841_v28  ;;  %4425 = vmatprep.mubr.bf16.mxu1 %v6844_v41  ;;  %v522_v28 = vadd.f32 %v519_v26, %v505_v9  ;;  %v6046_v34 = vunpack.c.l.bf16 %v6045_v31  ;;  %v6047_v35 = vunpack.c.h.bf16 %v6045_v31  ;;  %540 = vst [vmem:[#allocation2 + $0x50] sm:$0x1] %v5919_v40  ;;  %v571_v56 = vmul.f32 %v568_v49, %v567_v47  ;;  %v6842_v57 = vld [vmem:[#allocation2 + $0x3c] sm:$0xff]   ;;  %v6843_v58 = vld [vmem:[#allocation2 + $0x44] ss:$0 sps:$4 sm:$0x11]  }
  0x84   : > { %4289 = vmatmul.mubr.bf16.gmra.mrb[16].mxu0 %v6838_v48  ;;  %6546 = vmatprep.subr.bf16.mxu1 %v6853_v46  ;;  %v557_v46 = vmul.f32 %v554_v37, %v553_v36  ;;  %v6862_v48 = vld [vmem:[#allocation2 + $0x30] sm:$0xff]   ;;  %v1484_v63 = vshrl.u32 %v6842_v57, 16  ;;  %v1486_v0 = vshll.u32 %v6842_v57, 16  ;;  %v1491_v1 = vshll.u32 %v6843_v58, 16  ;;  %v6846_v10 = vld [vmem:[#allocation2 + $0x3c] sm:$0xff]  }
  0x85   : > { %v6042_v41 = vpack.c.bf16 %v522_v28, %v521_v25  ;;  %v555_v44 = vmul.f32 %v6046_v34, %v554_v37  ;;  %v556_v45 = vmul.f32 %v6047_v35, %v554_v37  ;;  %v1835_v26 = vsel %vm1823_vm1, %v1833_v50, %v1834_v62  ;;  %v5451_v25 = vld [vmem:[%s598_s18 + $0x14] sm:$0x1]  ;;  %v6868_v29 = vld [vmem:[#allocation2 + $0x3c] sm:$0xff]   ;;  %s7581_s18 = sld [smem:[#allocation5 + $0xb]] }
  0x86   : > { %v1488_v8 = vrot.slane %v1486_v0, 1  ;;  %v1493_v9 = vrot.slane %v1491_v1, 1  ;;  %v617_v27 = vunpack.c.h.bf16 %v5449_v13  ;;  %v606_v16 = vmul.f32 %v6050_v17, %v605_v2  ;;  %v6891_v57 = vld [vmem:[%s8128_s4 + $0x198] sm:$0xff]   ;;  %v6058_v1 = vld [vmem:[%s649_s28] sm:$0xff]  }
  0x87   : > { %6547 = vmatpush3.bf16.msra.mxu1 %v6857_v54  ;;  %6043 = vst [vmem:[#allocation2 + $0x48] sm:$0xff] %v6042_v41   ;;  %v569_v54 = vmul.f32 %v568_v49, %v565_v42  ;;  %v573_v60 = vadd.f32 %v570_v55, %v556_v45  ;;  %v607_v15 = vmul.f32 %v6051_v18, %v605_v2  ;;  %v618_v34 = vunpack.c.l.bf16 %v5451_v25 }
  0x88   : > { %6548 = vmatprep.subr.bf16.mxu1 %v6870_v61  ;;  %v574_v61 = vadd.f32 %v571_v56, %v557_v46  ;;  %v620_v28 = vmul.f32 %v619_v14, %v616_v20  ;;  %v621_v35 = vmul.f32 %v619_v14, %v617_v27  ;;  %v1837_v37 = vrot.slane %v6873_v6, 1  ;;  %v6880_v56 = vld [vmem:[#allocation2 + $0x3c] sm:$0xfe]   ;;  %s5932_s14 = smul.u32 12, %s7564_s9 }
  0x89   : > { %v572_v59 = vadd.f32 %v569_v54, %v555_v44  ;;  %v5922_v4 = vpack.c.bf16 %v573_v60, %v573_v60  ;;  %v622_v41 = vmul.f32 %v619_v14, %v618_v34  ;;  %v6881_v60 = vld [vmem:[#allocation2 + $0x44] ss:$0 sps:$4 sm:$0x11]   ;;  %v656_v62 = vstv %s7544_s23  ;;  %s5527_s23 = sld [smem:[#allocation7 + $0x10]] }
  0x8a   : > { %4426 = vmatmul.mubr.bf16.gmra.mrb[20].mxu1 %v1829_v19  ;;  %v5923_v5 = vpack.c.bf16 %v574_v61, %v574_v61  ;;  %v604_v19 = vunpack.c.l.bf16 %v601_v12  ;;  %v6851_v24 = vld [vmem:[#allocation2 + $0x50] ss:$0 sps:$4 sm:$0x11]   ;;  %v623_v36 = vadd.f32 %v620_v28, %v606_v16  ;;  %v624_v42 = vadd.f32 %v621_v35, %v607_v15  ;;  %v6895_v61 = vld [vmem:[%s8128_s4 + $0x178] sm:$0xff]   ;;  %s700_s15 = scalar_lea.vmem %s7255_s20, %s5932_s14 }
  0x8b   : > { %4433 = vmatprep.mubr.bf16.mxu1 %v6852_v21  ;;  %6549 = vmatpush3.bf16.msra.mxu1 %v6875_v22  ;;  %v5921_v3 = vpack.c.bf16 %v572_v59, %v572_v59  ;;  %590 = vst [vmem:[#allocation2 + $0x58] sm:$0xf] %v5922_v4  ;;  %v1489_v21 = vor.u32 %v1488_v8, %v1484_v63  ;;  %v1503_v33 = vshll.u32 %v6851_v24, 16  ;;  %v6899_v63 = vld [vmem:[%s8128_s4 + $0x138] sm:$0xff]   ;;  %v670_v4 = vstv %s7546_s24  ;;  %s5936_s24 = smul.u32 12, %s7581_s18 }
  0x8c   : > { %591 = vst [vmem:[#allocation2 + $0x5c] sm:$0x1] %v5923_v5  ;;  %v608_v23 = vmul.f32 %v605_v2, %v604_v19  ;;  %6550 = vmatprep.subr.bf16.mxu1 %v6887_v38  ;;  %v6055_v47 = vpack.c.bf16 %v624_v42, %v623_v36  ;;  %v1838_v50 = vsel %vm1823_vm1, %v1836_v7, %v1837_v37  ;;  %v652_v2 = vld [vmem:[%s649_s28 + $0x8] sm:$0x1]  ;;  %v1839_v5 = vrot.slane %v6880_v56, 1  ;;  %v6908_v42 = vld [vmem:[%s8128_s4 + $0x1a0] sm:$0xff]  }
  0x8d   : > { %589 = vst [vmem:[#allocation2 + $0x54] sm:$0xf] %v5921_v3  ;;  %v1494_v30 = vsel %vm1422_vm0, %v1489_v21, %v1493_v9  ;;  %v1505_v40 = vrot.slane %v1503_v33, 1  ;;  %v5459_v3 = vld [vmem:[%s649_s28 + $0xc] sm:$0xff]   ;;  %v1840_v6 = vrot.slane %v6881_v60, 1  ;;  %v6059_v8 = vunpack.c.l.bf16 %v6058_v1  ;;  %6446 = vmatprep.subr.bf16.mxu0 %v6895_v61  ;;  %v6903_v33 = vld [vmem:[%s8128_s4 + $0x1e0] sm:$0xff]   ;;  %s751_s25 = scalar_lea.vmem %s7255_s20, %s5936_s24 }
  0x8e   : > { %v6850_v22 = vld [vmem:[#allocation2 + $0x48] sm:$0xff]   ;;  %4296 = vmatprep.mubr.bf16.mxu0 %v1494_v30  ;;  %v625_v46 = vadd.f32 %v622_v41, %v608_v23  ;;  %6056 = vst [vmem:[#allocation2 + $0x60] sm:$0xff] %v6055_v47   ;;  %v6060_v9 = vunpack.c.h.bf16 %v6058_v1  ;;  %v667_v12 = vunpack.c.l.bf16 %v5459_v3  ;;  %v668_v14 = vunpack.c.h.bf16 %v5459_v3  ;;  %6447 = vmatpush3.bf16.msra.mxu0 %v6899_v63  ;;  %v6890_v41 = vld [vmem:[#allocation2 + $0x50] ss:$0 sps:$4 sm:$0x11]  }
  0x8f   : > { %v1496_v31 = vshrl.u32 %v6850_v22, 16  ;;  %v1498_v32 = vshll.u32 %v6850_v22, 16  ;;  %4297 = vmatmul.mubr.bf16.gmra.mrb[20].mxu0 %v6846_v10  ;;  %v6854_v49 = vld [vmem:[#allocation2 + $0x48] sm:$0xff]   ;;  %6551 = vmatpush3.bf16.msra.mxu1 %v6891_v57  ;;  %v655_v10 = vunpack.c.l.bf16 %v652_v2  ;;  %v669_v17 = vunpack.c.l.bf16 %v5461_v11 }
  0x90   : > { %v5927_v54 = vpack.c.bf16 %v625_v46, %v625_v46  ;;  %v6878_v55 = vld [vmem:[#allocation2 + $0x48] sm:$0xff]   ;;  %v657_v19 = vmul.f32 %v6059_v8, %v656_v62  ;;  %v658_v20 = vmul.f32 %v6060_v9, %v656_v62  ;;  %v671_v22 = vmul.f32 %v670_v4, %v667_v12  ;;  %6552 = vmatprep.subr.bf16.mxu1 %v6903_v33 }
  0x91   : > { %v1500_v39 = vrot.slane %v1498_v32, 1  ;;  %v659_v21 = vmul.f32 %v656_v62, %v655_v10  ;;  %v672_v24 = vmul.f32 %v670_v4, %v668_v14  ;;  %v1841_v27 = vsel %vm1823_vm1, %v1839_v5, %v1840_v6  ;;  %v5469_v46 = vld [vmem:[%s700_s15 + $0xc] sm:$0xff]   ;;  %v7591_v62 = vld [vmem:[%s8128_s4 + $0x200] sm:$0xff]  }
  0x92   : > { %4434 = vmatmul.mubr.bf16.gmra.mrb[24].mxu1 %v1832_v53  ;;  %642 = vst [vmem:[#allocation2 + $0x68] sm:$0x1] %v5927_v54  ;;  %v674_v23 = vadd.f32 %v671_v22, %v657_v19  ;;  %v718_v54 = vunpack.c.l.bf16 %v5469_v46  ;;  %v721_v57 = vstv %s7569_s11  ;;  %v1843_v61 = vrot.slane %v6890_v41, 1  ;;  %6680 = vmatprep.subr.bf16.mxu0 %v7591_v62  ;;  %s7825_s11 = sld [smem:[#allocation6 + $0x11]] }
  0x93   : > { %4441 = vmatprep.mubr.bf16.mxu1 %v6862_v48  ;;  %v1501_v43 = vor.u32 %v1500_v39, %v1496_v31  ;;  %v6861_v45 = vld [vmem:[#allocation2 + $0x5c] ss:$0 sps:$4 sm:$0x11]   ;;  %v6889_v39 = vld [vmem:[#allocation2 + $0x48] sm:$0xfe]   ;;  %6553 = vmatpush3.bf16.msra.mxu1 %v6908_v42 }
  0x94   : > { %v6860_v44 = vld [vmem:[#allocation2 + $0x54] sm:$0xff]   ;;  %v1515_v53 = vshll.u32 %v6861_v45, 16  ;;  %v5929_v32 = vpack.c.bf16 %v674_v23, %v674_v23  ;;  %v707_v45 = vstv %s7566_s10  ;;  %v1842_v47 = vrot.slane %v6889_v39, 1  ;;  %v6898_v14 = vld [vmem:[#allocation2 + $0x5c] ss:$0 sps:$4 sm:$0x11]  }
  0x95   : > { %v1506_v48 = vsel %vm1422_vm0, %v1501_v43, %v1505_v40  ;;  %v1508_v51 = vshrl.u32 %v6860_v44, 16  ;;  %v1510_v52 = vshll.u32 %v6860_v44, 16  ;;  %v6863_v7 = vld [vmem:[#allocation2 + $0x54] sm:$0xff]   ;;  %v6866_v18 = vld [vmem:[#allocation2 + $0x60] sm:$0xff]   ;;  %v703_v44 = vld [vmem:[%s700_s15 + $0x8] sm:$0x1]  ;;  %v722_v63 = vmul.f32 %v721_v57, %v718_v54 }
  0x96   : > { %4304 = vmatprep.mubr.bf16.mxu0 %v1506_v48  ;;  %v1517_v59 = vrot.slane %v1515_v53, 1  ;;  %v6886_v16 = vld [vmem:[#allocation2 + $0x54] sm:$0xff]   ;;  %v1520_v25 = vshrl.u32 %v6866_v18, 16  ;;  %v1522_v28 = vshll.u32 %v6866_v18, 16  ;;  %v6871_v38 = vld [vmem:[#allocation2 + $0x60] sm:$0xff]   ;;  %v1844_v2 = vsel %vm1823_vm1, %v1842_v47, %v1843_v61  ;;  %v6920_v42 = vld [vmem:[%s8128_s4 + $0x1e8] sm:$0xff]  }
  0x97   : > { %v1512_v58 = vrot.slane %v1510_v52, 1  ;;  %4305 = vmatmul.mubr.bf16.gmra.mrb[24].mxu0 %v6854_v49  ;;  %691 = vst [vmem:[#allocation2 + $0x6c] sm:$0xf] %v5929_v32  ;;  %v6062_v43 = vld [vmem:[%s700_s15] sm:$0xff]   ;;  %v5471_v52 = vld [vmem:[%s700_s15 + $0x14] sm:$0x1]  ;;  %6554 = vmatprep.subr.bf16.mxu1 %v6920_v42 }
  0x98   : > { %v1524_v34 = vrot.slane %v1522_v28, 1  ;;  %v6063_v49 = vunpack.c.l.bf16 %v6062_v43  ;;  %v6894_v53 = vld [vmem:[#allocation2 + $0x60] sm:$0xff]   ;;  %v720_v56 = vunpack.c.l.bf16 %v5471_v52  ;;  %v6897_v12 = vld [vmem:[#allocation2 + $0x54] sm:$0xfe]   ;;  %s7823_s10 = sld [smem:[#allocation5 + $0x11]] }
  0x99   : > { %v1513_v0 = vor.u32 %v1512_v58, %v1508_v51  ;;  %v6867_v15 = vld [vmem:[#allocation2 + $0x68] ss:$0 sps:$4 sm:$0x11]   ;;  %v706_v51 = vunpack.c.l.bf16 %v703_v44 }
  0x9a   : > { %4442 = vmatmul.mubr.bf16.gmra.mrb[28].mxu1 %v1835_v26  ;;  %v673_v26 = vmul.f32 %v670_v4, %v669_v17  ;;  %v1527_v31 = vshll.u32 %v6867_v15, 16  ;;  %v1525_v40 = vor.u32 %v1524_v34, %v1520_v25  ;;  %v708_v58 = vmul.f32 %v6063_v49, %v707_v45 }
  0x9b   : > { %4449 = vmatprep.mubr.bf16.mxu1 %v6868_v29  ;;  %v1518_v13 = vsel %vm1422_vm0, %v1513_v0, %v1517_v59  ;;  %v675_v29 = vadd.f32 %v672_v24, %v658_v20  ;;  %v710_v60 = vmul.f32 %v707_v45, %v706_v51  ;;  %v724_v1 = vmul.f32 %v721_v57, %v720_v56  ;;  %v6071_v24 = vld [vmem:[%s751_s25] sm:$0xff]  }
  0x9c   : > { %4312 = vmatprep.mubr.bf16.mxu0 %v1518_v13  ;;  %v676_v30 = vadd.f32 %v673_v26, %v659_v21  ;;  %v1529_v37 = vrot.slane %v1527_v31, 1  ;;  %v725_v4 = vadd.f32 %v722_v63, %v708_v58  ;;  %v758_v20 = vstv %s7584_s19  ;;  %v754_v26 = vld [vmem:[%s751_s25 + $0x8] sm:$0x1]  ;;  %v6904_v51 = vld [vmem:[#allocation2 + $0x60] sm:$0xfe]  }
  0x9d   : > { %v5930_v35 = vpack.c.bf16 %v675_v29, %v675_v29  ;;  %v727_v6 = vadd.f32 %v724_v1, %v710_v60  ;;  %v1845_v21 = vrot.slane %v6897_v12, 1  ;;  %v1846_v15 = vrot.slane %v6898_v14, 1  ;;  %v6907_v12 = vld [vmem:[#allocation2 + $0x14] ss:$0 sps:$4 sm:$0x11]  }
  0x9e   : > { %v5931_v36 = vpack.c.bf16 %v676_v30, %v676_v30  ;;  %v1530_v48 = vsel %vm1422_vm0, %v1525_v40, %v1529_v37  ;;  %v6072_v25 = vunpack.c.l.bf16 %v6071_v24  ;;  %v6073_v28 = vunpack.c.h.bf16 %v6071_v24  ;;  %v5481_v30 = vld [vmem:[%s751_s25 + $0x14] sm:$0x1]  ;;  %s5960_s13 = smul.u32 12, %s7823_s10 }
  0x9f   : > { %4313 = vmatmul.mubr.bf16.gmra.mrb[28].mxu0 %v6863_v7  ;;  %692 = vst [vmem:[#allocation2 + $0x70] sm:$0xf] %v5930_v35  ;;  %v5935_v10 = vpack.c.bf16 %v727_v6, %v727_v6  ;;  %v757_v29 = vunpack.c.l.bf16 %v754_v26  ;;  %v771_v33 = vunpack.c.l.bf16 %v5481_v30  ;;  %v1847_v34 = vsel %vm1823_vm1, %v1845_v21, %v1846_v15  ;;  %v7606_v15 = vld [vmem:[#allocation2 + $0x24] sm:$0xff]  }
  0xa0   : > { %693 = vst [vmem:[#allocation2 + $0x74] sm:$0x1] %v5931_v36  ;;  %4320 = vmatprep.mubr.bf16.mxu0 %v1530_v48  ;;  %v759_v36 = vmul.f32 %v6072_v25, %v758_v20  ;;  %v760_v37 = vmul.f32 %v6073_v28, %v758_v20  ;;  %v1848_v56 = vrot.slane %v6904_v51, 1  ;;  %v2251_v42 = vshll.u32 %v7606_v15, 16  ;;  %s1057_s14 = scalar_lea.vmem %s7255_s20, %s5960_s13 }
  0xa1   : > { %744 = vst [vmem:[#allocation2 + $0x80] sm:$0x1] %v5935_v10 }
  0xa2   : > { %4450 = vmatmul.mubr.bf16.gmra.mrb[32].mxu1 %v1838_v50  ;;  %v6064_v50 = vunpack.c.h.bf16 %v6062_v43 }
  0xa3   : > { %4457 = vmatprep.mubr.bf16.mxu1 %v6878_v55  ;;  %v719_v55 = vunpack.c.h.bf16 %v5469_v46 }
  0xa4   : > { %v709_v59 = vmul.f32 %v6064_v50, %v707_v45 }
  0xa5   : > { %v723_v0 = vmul.f32 %v721_v57, %v719_v55  ;;  %v6905_v55 = vld [vmem:[#allocation2 + $0x68] ss:$0 sps:$4 sm:$0x11]   ;;  %v6906_v57 = vld [vmem:[#allocation2 + $0xc] sm:$0xff]  }
  0xa6   : > { %v6876_v3 = vld [vmem:[#allocation2 + $0x6c] sm:$0xff]   ;;  %v1849_v60 = vrot.slane %v6905_v55, 1  ;;  %v2225_v6 = vshrl.u32 %v6906_v57, 16  ;;  %v2249_v55 = vshrl.u32 %v7606_v15, 16 }
  0xa7   : > { %4321 = vmatmul.mubr.bf16.gmra.mrb[32].mxu0 %v6871_v38  ;;  %v726_v5 = vadd.f32 %v723_v0, %v709_v59  ;;  %v6877_v7 = vld [vmem:[#allocation2 + $0x74] ss:$0 sps:$4 sm:$0x11]   ;;  %v1532_v8 = vshrl.u32 %v6876_v3, 16  ;;  %v1534_v9 = vshll.u32 %v6876_v3, 16  ;;  %v6900_v17 = vld [vmem:[#allocation2 + $0x6c] sm:$0xff]   ;;  %v761_v38 = vmul.f32 %v758_v20, %v757_v29 }
  0xa8   : > { %v1539_v13 = vshll.u32 %v6877_v7, 16  ;;  %v6879_v19 = vld [vmem:[#allocation2 + $0x6c] sm:$0xff]   ;;  %v6885_v47 = vld [vmem:[#allocation2 + $0x80] ss:$0 sps:$4 sm:$0x11]   ;;  %v1850_v3 = vsel %vm1823_vm1, %v1848_v56, %v1849_v60  ;;  %v2227_v7 = vshll.u32 %v6906_v57, 16 }
  0xa9   : > { %v6068_v11 = vpack.c.bf16 %v726_v5, %v725_v4  ;;  %v1536_v18 = vrot.slane %v1534_v9, 1  ;;  %v1551_v54 = vshll.u32 %v6885_v47, 16  ;;  %v6901_v0 = vld [vmem:[#allocation2 + $0xc] sm:$0xfe]   ;;  %v2232_v29 = vshll.u32 %v6907_v12, 16 }
  0xaa   : > { %4458 = vmatmul.mubr.bf16.gmra.mrb[36].mxu1 %v1841_v27  ;;  %v1541_v22 = vrot.slane %v1539_v13, 1  ;;  %v5479_v27 = vld [vmem:[%s751_s25 + $0xc] sm:$0xff]   ;;  %v2624_v5 = vrot.slane %v6901_v0, 1  ;;  %v6914_v24 = vld [vmem:[#allocation2 + $0x74] ss:$0 sps:$4 sm:$0x11]  }
  0xab   : > { %4465 = vmatprep.mubr.bf16.mxu1 %v6886_v16  ;;  %6069 = vst [vmem:[#allocation2 + $0x78] sm:$0xff] %v6068_v11   ;;  %v772_v16 = vstv %s7586_s21  ;;  %v1537_v23 = vor.u32 %v1536_v18, %v1532_v8  ;;  %v769_v31 = vunpack.c.l.bf16 %v5479_v27  ;;  %v770_v32 = vunpack.c.h.bf16 %v5479_v27  ;;  %v6915_v8 = vld [vmem:[#allocation2 + $0x18] sm:$0xff]   ;;  %v6912_v27 = vld [vmem:[#allocation2 + $0x20] ss:$0 sps:$4 sm:$0x11]   ;;  %v6927_v56 = vld [vmem:[#allocation2 + $0x90] sm:$0xff]  }
  0xac   : > { %v775_v41 = vmul.f32 %v772_v16, %v771_v33  ;;  %v1553_v59 = vrot.slane %v1551_v54, 1  ;;  %v2229_v18 = vrot.slane %v2227_v7, 1  ;;  %v2239_v26 = vshll.u32 %v6915_v8, 16  ;;  %v6922_v47 = vld [vmem:[#allocation2 + $0x80] ss:$0 sps:$4 sm:$0x11]  }
  0xad   : > { %v1542_v35 = vsel %vm1422_vm0, %v1537_v23, %v1541_v22  ;;  %v773_v39 = vmul.f32 %v772_v16, %v769_v31  ;;  %v774_v40 = vmul.f32 %v772_v16, %v770_v32  ;;  %v6911_v22 = vld [vmem:[#allocation2 + $0x18] sm:$0xfe]   ;;  %v6925_v23 = vld [vmem:[%s8128_s4 + $0x1a8] sm:$0xff]   ;;  %v1852_v30 = vrot.slane %v6914_v24, 1  ;;  %s5525_s21 = sld [smem:[#allocation5 + $0x10]] }
  0xae   : > { %4328 = vmatprep.mubr.bf16.mxu0 %v1542_v35  ;;  %v778_v45 = vadd.f32 %v775_v41, %v761_v38  ;;  %6555 = vmatpush3.bf16.msra.mxu1 %v6925_v23  ;;  %v6916_v35 = vld [vmem:[#allocation2 + $0x20] ss:$0 sps:$4 sm:$0x11]   ;;  %v2234_v38 = vrot.slane %v2232_v29, 1  ;;  %v2628_v41 = vrot.slane %v6912_v27, 1  ;;  %v2253_v60 = vrot.slane %v2251_v42, 1 }
  0xaf   : > { %4329 = vmatmul.mubr.bf16.gmra.mrb[36].mxu0 %v6879_v19  ;;  %v776_v43 = vadd.f32 %v773_v39, %v759_v36  ;;  %v777_v44 = vadd.f32 %v774_v40, %v760_v37  ;;  %v6913_v19 = vld [vmem:[#allocation2 + $0x6c] sm:$0xfe]   ;;  %v2237_v36 = vshrl.u32 %v6915_v8, 16  ;;  %v2241_v37 = vrot.slane %v2239_v26, 1  ;;  %v6935_v24 = vld [vmem:[#allocation2 + $0x3c] sm:$0xfe]  }
  0xb0   : > { %v5939_v50 = vpack.c.bf16 %v778_v45, %v778_v45  ;;  %v1851_v16 = vrot.slane %v6913_v19, 1  ;;  %v2627_v39 = vrot.slane %v6911_v22, 1  ;;  %v2230_v40 = vor.u32 %v2229_v18, %v2225_v6  ;;  %v6918_v45 = vld [vmem:[#allocation2 + $0x24] sm:$0xfe]   ;;  %v6937_v6 = vld [vmem:[%s8128_s4 + $0x1f0] sm:$0xff]   ;;  %v6940_v22 = vld [vmem:[#allocation2 + $0x3c] sm:$0xff]  }
  0xb1   : > { %v5937_v48 = vpack.c.bf16 %v776_v43, %v776_v43  ;;  %v5938_v49 = vpack.c.bf16 %v777_v44, %v777_v44  ;;  %v2244_v44 = vshll.u32 %v6916_v35, 16  ;;  %v6933_v8 = vld [vmem:[#allocation2 + $0x38] ss:$0 sps:$4 sm:$0x11]   ;;  %6556 = vmatprep.subr.bf16.mxu1 %v6937_v6  ;;  %v2254_v18 = vor.u32 %v2253_v60, %v2249_v55  ;;  %v6945_v42 = vld [vmem:[#allocation2 + $0x48] sm:$0xfe]  }
  0xb2   : > { %4466 = vmatmul.mubr.bf16.gmra.mrb[40].mxu1 %v1844_v2  ;;  %v6884_v46 = vld [vmem:[#allocation2 + $0x78] sm:$0xff]   ;;  %795 = vst [vmem:[#allocation2 + $0x8c] sm:$0x1] %v5939_v50  ;;  %v6902_v2 = vld [vmem:[#allocation2 + $0x14] ss:$0 sps:$4 sm:$0x11]   ;;  %v2235_v51 = vsel %vm1422_vm0, %v2230_v40, %v2234_v38  ;;  %v2629_v54 = vsel %vm1823_vm1, %v2627_v39, %v2628_v41 }
  0xb3   : > { %4473 = vmatprep.mubr.bf16.mxu1 %v6894_v53  ;;  %v1544_v52 = vshrl.u32 %v6884_v46, 16  ;;  %v1546_v53 = vshll.u32 %v6884_v46, 16  ;;  %793 = vst [vmem:[#allocation2 + $0x84] sm:$0xf] %v5937_v48  ;;  %794 = vst [vmem:[#allocation2 + $0x88] sm:$0xf] %v5938_v49 }
  0xb4   : > { %v6910_v61 = vld [vmem:[#allocation2 + $0x78] sm:$0xff]   ;;  %v2625_v11 = vrot.slane %v6902_v2, 1  ;;  %v6919_v46 = vld [vmem:[#allocation2 + $0x2c] ss:$0 sps:$4 sm:$0x11]   ;;  %v2268_v12 = vshll.u32 %v6933_v8, 16 }
  0xb5   : > { %v1548_v58 = vrot.slane %v1546_v53, 1  ;;  %v6888_v63 = vld [vmem:[#allocation2 + $0x78] sm:$0xff]   ;;  %v6924_v49 = vld [vmem:[#allocation2 + $0x2c] ss:$0 sps:$4 sm:$0x11]   ;;  %v7619_v53 = vld [vmem:[#allocation2 + $0x30] sm:$0xff]  }
  0xb6   : > { %v2626_v33 = vsel %vm1823_vm1, %v2624_v5, %v2625_v11  ;;  %v6921_v43 = vld [vmem:[#allocation2 + $0x78] sm:$0xfe]   ;;  %v6926_v50 = vld [vmem:[%s8128_s4 + $0x208] sm:$0xff]   ;;  %v2256_v0 = vshll.u32 %v6924_v49, 16  ;;  %v6928_v2 = vld [vmem:[#allocation2 + $0x30] sm:$0xfe]  }
  0xb7   : > { %v1549_v1 = vor.u32 %v1548_v58, %v1544_v52  ;;  %v1854_v48 = vrot.slane %v6921_v43, 1  ;;  %v1855_v52 = vrot.slane %v6922_v47, 1  ;;  %v2242_v58 = vor.u32 %v2241_v37, %v2237_v36  ;;  %v6934_v11 = vld [vmem:[#allocation2 + $0x9c] sm:$0xff]   ;;  %v6936_v15 = vld [vmem:[#allocation2 + $0x44] ss:$0 sps:$4 sm:$0x11]  }
  0xb8   : > { %v2258_v19 = vrot.slane %v2256_v0, 1  ;;  %v2270_v27 = vrot.slane %v2268_v12, 1  ;;  %v6939_v23 = vld [vmem:[#allocation2 + $0x98] ss:$0 sps:$4 sm:$0x11]   ;;  %v6944_v36 = vld [vmem:[#allocation2 + $0xa8] sm:$0xff]  }
  0xb9   : > { %v1554_v4 = vsel %vm1422_vm0, %v1549_v1, %v1553_v59  ;;  %v6893_v10 = vld [vmem:[#allocation2 + $0x8c] ss:$0 sps:$4 sm:$0x11]   ;;  %v1856_v57 = vsel %vm1823_vm1, %v1854_v48, %v1855_v52  ;;  %v2246_v59 = vrot.slane %v2244_v44, 1  ;;  %v2263_v1 = vshll.u32 %v7619_v53, 16  ;;  %v6957_v0 = vld [vmem:[#allocation2 + $0x54] sm:$0xff]  }
  0xba   : > { %4474 = vmatmul.mubr.bf16.gmra.mrb[44].mxu1 %v1847_v34  ;;  %4336 = vmatprep.mubr.bf16.mxu0 %v1554_v4  ;;  %v6892_v9 = vld [vmem:[#allocation2 + $0x84] sm:$0xff]   ;;  %v1853_v34 = vsel %vm1823_vm1, %v1851_v16, %v1852_v30  ;;  %v6931_v5 = vld [vmem:[#allocation2 + $0x8c] ss:$0 sps:$4 sm:$0x11]   ;;  %v6938_v16 = vld [vmem:[#allocation2 + $0x90] sm:$0xfe]  }
  0xbb   : > { %4481 = vmatprep.mubr.bf16.mxu1 %v6900_v17  ;;  %4337 = vmatmul.mubr.bf16.gmra.mrb[40].mxu0 %v6888_v63  ;;  %v1556_v13 = vshrl.u32 %v6892_v9, 16  ;;  %v1558_v14 = vshll.u32 %v6892_v9, 16  ;;  %v1563_v17 = vshll.u32 %v6893_v10, 16  ;;  %v6896_v28 = vld [vmem:[#allocation2 + $0x84] sm:$0xff]   ;;  %v2631_v63 = vrot.slane %v6919_v46, 1  ;;  %v6959_v12 = vld [vmem:[%s8128_s4 + $0x1b8] sm:$0xff]  }
  0xbc   : > { %v6917_v31 = vld [vmem:[#allocation2 + $0x84] sm:$0xff]   ;;  %v2247_v7 = vsel %vm1422_vm0, %v2242_v58, %v2246_v59  ;;  %v1858_v10 = vrot.slane %v6931_v5, 1  ;;  %v2265_v26 = vrot.slane %v2263_v1, 1  ;;  %v1860_v29 = vrot.slane %v6938_v16, 1  ;;  %v6947_v44 = vld [vmem:[#allocation2 + $0x9c] sm:$0xfe]  }
  0xbd   : > { %v1560_v20 = vrot.slane %v1558_v14, 1  ;;  %v1565_v21 = vrot.slane %v1563_v17, 1  ;;  %v6930_v4 = vld [vmem:[#allocation2 + $0x84] sm:$0xfe]   ;;  %v2261_v17 = vshrl.u32 %v7619_v53, 16  ;;  %v2275_v30 = vshll.u32 %v6940_v22, 16 }
  0xbe   : > { %v2637_v38 = vrot.slane %v6936_v15, 1  ;;  %v2273_v39 = vshrl.u32 %v6940_v22, 16  ;;  %v6946_v43 = vld [vmem:[#allocation2 + $0x50] ss:$0 sps:$4 sm:$0x11]   ;;  %v6949_v47 = vld [vmem:[#allocation2 + $0x48] sm:$0xff]  }
  0xbf   : > { %v1561_v25 = vor.u32 %v1560_v20, %v1556_v13  ;;  %v6942_v13 = vld [vmem:[%s8128_s4 + $0x1b0] sm:$0xff]   ;;  %v2633_v20 = vrot.slane %v6928_v2, 1  ;;  %v2266_v37 = vor.u32 %v2265_v26, %v2261_v17  ;;  %v2277_v40 = vrot.slane %v2275_v30, 1  ;;  %v6948_v46 = vld [vmem:[#allocation2 + $0xa4] ss:$0 sps:$4 sm:$0x11]  }
  0xc0   : > { %6557 = vmatpush3.bf16.msra.mxu1 %v6942_v13  ;;  %v1863_v49 = vrot.slane %v6947_v44, 1  ;;  %v2287_v52 = vshll.u32 %v6949_v47, 16  ;;  %v6951_v53 = vld [vmem:[#allocation2 + $0xb4] sm:$0xff]   ;;  %v2639_v59 = vrot.slane %v6945_v42, 1  ;;  %v2640_v60 = vrot.slane %v6946_v43, 1  ;;  %v6966_v22 = vld [vmem:[#allocation2 + $0x60] sm:$0xff]  }
  0xc1   : > { %v1566_v32 = vsel %vm1422_vm0, %v1561_v25, %v1565_v21  ;;  %v6943_v25 = vld [vmem:[%s8128_s4 + $0x210] sm:$0xff]   ;;  %v2278_v55 = vor.u32 %v2277_v40, %v2273_v39  ;;  %v6953_v1 = vld [vmem:[#allocation2 + $0x5c] ss:$0 sps:$4 sm:$0x11]   ;;  %v6955_v5 = vld [vmem:[#allocation2 + $0xa8] sm:$0xfe]   ;;  %v7673_v40 = vstv %s5527_s23 }
  0xc2   : > { %4482 = vmatmul.mubr.bf16.gmra.mrb[48].mxu1 %v1850_v3  ;;  %4344 = vmatprep.mubr.bf16.mxu0 %v1566_v32  ;;  %v6929_v3 = vld [vmem:[#allocation2 + $0x38] ss:$0 sps:$4 sm:$0x11]   ;;  %v1861_v32 = vrot.slane %v6939_v23, 1  ;;  %v2311_v23 = vshll.u32 %v6966_v22, 16  ;;  %v2309_v30 = vshrl.u32 %v6966_v22, 16 }
  0xc3   : > { %4489 = vmatprep.mubr.bf16.mxu1 %v6910_v61  ;;  %4345 = vmatmul.mubr.bf16.gmra.mrb[44].mxu0 %v6896_v28  ;;  %v2630_v61 = vrot.slane %v6918_v45, 1  ;;  %v2634_v21 = vrot.slane %v6929_v3, 1  ;;  %v2259_v28 = vsel %vm1422_vm0, %v2254_v18, %v2258_v19  ;;  %v2271_v45 = vsel %vm1422_vm0, %v2266_v37, %v2270_v27  ;;  %v6952_v2 = vld [vmem:[#allocation2 + $0x54] sm:$0xfe]   ;;  %s5956_s24 = smul.u32 12, %s5525_s21 }
  0xc4   : > { %4578 = vmatprep.mubr.bf16.mxu0 %v2626_v33  ;;  %v6941_v33 = vld [vmem:[#allocation2 + $0x44] ss:$0 sps:$4 sm:$0x11]   ;;  %v1862_v35 = vsel %vm1823_vm1, %v1860_v29, %v1861_v32  ;;  %v6956_v6 = vld [vmem:[#allocation2 + $0xb0] ss:$0 sps:$4 sm:$0x11]  }
  0xc5   : > { %v2632_v9 = vsel %vm1823_vm1, %v2630_v61, %v2631_v63  ;;  %v2280_v41 = vshll.u32 %v6941_v33, 16  ;;  %v2285_v61 = vshrl.u32 %v6949_v47, 16  ;;  %v2289_v63 = vrot.slane %v2287_v52, 1  ;;  %v6963_v16 = vld [vmem:[#allocation2 + $0x68] ss:$0 sps:$4 sm:$0x11]   ;;  %s7666_s25 = scalar_lea.vmem %s7255_s20, %s5956_s24 }
  0xc6   : > { %v1867_v8 = vrot.slane %v6956_v6, 1  ;;  %v2297_v19 = vshrl.u32 %v6957_v0, 16  ;;  %v7663_v29 = vld [vmem:[#allocation2 + $0xbc] ss:$0 sps:$4 sm:$0x11]   ;;  %v2646_v33 = vrot.slane %v6963_v16, 1 }
  0xc7   : > { %v2290_v13 = vor.u32 %v2289_v63, %v2285_v61  ;;  %v6101_v37 = vld [vmem:[%s7666_s25] sm:$0xff]   ;;  %v5529_v39 = vld [vmem:[%s7666_s25 + $0xc] sm:$0xff]   ;;  %v6980_v22 = vld [vmem:[#allocation2 + $0x78] sm:$0xff]   ;;  %s5891_s20 = sshll.u32 %s8137_s6, 7 }
  0xc8   : > { %v6102_v43 = vunpack.c.l.bf16 %v6101_v37  ;;  %v6103_v44 = vunpack.c.h.bf16 %v6101_v37  ;;  %v6968_v47 = vld [vmem:[#allocation2 + $0x6c] sm:$0xfe]   ;;  %v6975_v61 = vld [vmem:[%s8128_s4 + $0x220] sm:$0xff]   ;;  %s8067_s17 = scalar_lea.vmem %s8129_s5, %s5891_s20 }
  0xc9   : > { %v6972_v52 = vld [vmem:[#allocation2 + $0x6c] sm:$0xff]  }
  0xca   : > { %4490 = vmatmul.mubr.bf16.gmra.mrb[52].mxu1 %v1853_v34  ;;  %v2636_v34 = vrot.slane %v6935_v24, 1  ;;  %v6962_v24 = vld [vmem:[#allocation2 + $0x60] sm:$0xfe]  }
  0xcb   : > { %4497 = vmatprep.mubr.bf16.mxu1 %v6917_v31  ;;  %4579 = vmatmul.mubr.bf16.vlgmr.msra.gmra.mrb[48].mxu0 %v2235_v51  ;;  %v2635_v31 = vsel %vm1823_vm1, %v2633_v20, %v2634_v21  ;;  %v1864_v51 = vrot.slane %v6948_v46, 1  ;;  %v6960_v21 = vld [vmem:[%s8128_s4 + $0x218] sm:$0xff]   ;;  %v1025_v46 = vunpack.c.h.bf16 %v5529_v39 }
  0xcc   : > { %6681 = vmatpush3.bf16.msra.mxu0 %v7591_v62  ;;  %4586 = vmatprep.mubr.bf16.mxu0 %v2629_v54  ;;  %v1857_v62 = vrot.slane %v6930_v4, 1  ;;  %v2638_v48 = vsel %vm1823_vm1, %v2636_v34, %v2637_v38  ;;  %v6954_v54 = vld [vmem:[%s8128_s4 + $0x1f8] sm:$0xff]   ;;  %v2313_v34 = vrot.slane %v2311_v23, 1  ;;  %v7670_v38 = vstv %s5526_s22  ;;  %v6981_v23 = vld [vmem:[#allocation2 + $0x80] ss:$0 sps:$4 sm:$0x11]  }
  0xcd   : > { %6682 = vmatprep.subr.bf16.mxu0 %v6926_v50  ;;  %6558 = vmatprep.subr.bf16.mxu1 %v6954_v54  ;;  %v1015_v54 = vmul.f32 %v6103_v44, %v7670_v38 }
  0xce   : > { %v1859_v14 = vsel %vm1823_vm1, %v1857_v62, %v1858_v10  ;;  %v1866_v62 = vrot.slane %v6955_v5, 1  ;;  %v2299_v10 = vshll.u32 %v6957_v0, 16  ;;  %6559 = vmatpush3.bf16.msra.mxu1 %v6959_v12  ;;  %v2323_v5 = vshll.u32 %v6972_v52, 16 }
  0xd0   : > { %6683 = vmatpush3.bf16.msra.mxu0 %v6926_v50  ;;  %v6950_v50 = vld [vmem:[#allocation2 + $0x50] ss:$0 sps:$4 sm:$0x11]   ;;  %v1868_v17 = vsel %vm1823_vm1, %v1866_v62, %v1867_v8  ;;  %v2301_v20 = vrot.slane %v2299_v10, 1  ;;  %v2321_v62 = vshrl.u32 %v6972_v52, 16  ;;  %v2325_v12 = vrot.slane %v2323_v5, 1 }
  0xd1   : > { %6684 = vmatprep.subr.bf16.mxu0 %v6943_v25  ;;  %v2292_v58 = vshll.u32 %v6950_v50, 16  ;;  %v6976_v10 = vld [vmem:[#allocation2 + $0x78] sm:$0xfe]   ;;  %v6995_v5 = vld [vmem:[#allocation2 + $0x90] sm:$0xff]  }
  0xd2   : > { %4498 = vmatmul.mubr.bf16.gmra.mrb[56].mxu1 %v1856_v57  ;;  %v1865_v57 = vsel %vm1823_vm1, %v1863_v49, %v1864_v51  ;;  %v2302_v32 = vor.u32 %v2301_v20, %v2297_v19  ;;  %v2651_v19 = vrot.slane %v6976_v10, 1  ;;  %v6979_v20 = vld [vmem:[#allocation2 + $0x2c] ss:$0 sps:$4 sm:$0x11]  }
  0xd3   : > { %4505 = vmatprep.mubr.bf16.mxu1 %v6927_v56  ;;  %4587 = vmatmul.mubr.bf16.gmra.mrb[52].mxu0 %v2247_v7  ;;  %v2282_v56 = vrot.slane %v2280_v41, 1  ;;  %v2294_v4 = vrot.slane %v2292_v58, 1  ;;  %v2641_v7 = vsel %vm1823_vm1, %v2639_v59, %v2640_v60  ;;  %v1870_v41 = vrot.slane %v7663_v29, 1  ;;  %v6994_v10 = vld [vmem:[#allocation2 + $0x44] ss:$0 sps:$4 sm:$0x11]  }
  0xd4   : > { %4594 = vmatprep.mubr.bf16.mxu0 %v2632_v9  ;;  %6685 = vmatpush3.bf16.msra.mxu0 %v6943_v25  ;;  %v6958_v9 = vld [vmem:[#allocation2 + $0x5c] ss:$0 sps:$4 sm:$0x11]   ;;  %v2335_v29 = vshll.u32 %v6980_v22, 16 }
  0xd5   : > { %v2283_v3 = vsel %vm1422_vm0, %v2278_v55, %v2282_v56  ;;  %v2304_v18 = vshll.u32 %v6958_v9, 16  ;;  %6686 = vmatprep.subr.bf16.mxu0 %v6960_v21  ;;  %v2295_v26 = vsel %vm1422_vm0, %v2290_v13, %v2294_v4  ;;  %v7659_v25 = vld [vmem:[#allocation2 + $0x18] sm:$0xff]   ;;  %v1029_v56 = vmul.f32 %v7673_v40, %v1025_v46  ;;  %v6973_v4 = vld [vmem:[#allocation2 + $0x74] ss:$0 sps:$4 sm:$0x11]   ;;  %v6978_v9 = vld [vmem:[#allocation2 + $0x24] sm:$0xff]  }
  0xd6   : > { %v3027_v42 = vshll.u32 %v7659_v25, 16  ;;  %v3025_v59 = vshrl.u32 %v7659_v25, 16  ;;  %v2328_v8 = vshll.u32 %v6973_v4, 16  ;;  %v6977_v13 = vld [vmem:[#allocation2 + $0x80] ss:$0 sps:$4 sm:$0x11]  }
  0xd7   : > { %v2306_v27 = vrot.slane %v2304_v18, 1  ;;  %v1032_v0 = vadd.f32 %v1029_v56, %v1015_v54  ;;  %v3037_v16 = vshrl.u32 %v6978_v9, 16  ;;  %v3044_v25 = vshll.u32 %v6979_v20, 16  ;;  %v6992_v4 = vld [vmem:[#allocation2 + $0x98] ss:$0 sps:$4 sm:$0x11]  }
  0xd8   : > { %6687 = vmatpush3.bf16.msra.mxu0 %v6960_v21  ;;  %v3029_v60 = vrot.slane %v3027_v42, 1  ;;  %v2330_v18 = vrot.slane %v2328_v8, 1  ;;  %v3039_v21 = vshll.u32 %v6978_v9, 16 }
  0xd9   : > { %v2307_v49 = vsel %vm1422_vm0, %v2302_v32, %v2306_v27  ;;  %6688 = vmatprep.subr.bf16.mxu0 %v6975_v61  ;;  %v2652_v27 = vrot.slane %v6977_v13, 1  ;;  %v2333_v32 = vshrl.u32 %v6980_v22, 16  ;;  %v3046_v44 = vrot.slane %v3044_v25, 1  ;;  %v6999_v25 = vld [vmem:[#allocation2 + $0xa4] ss:$0 sps:$4 sm:$0x11]  }
  0xda   : > { %4506 = vmatmul.mubr.bf16.gmra.mrb[60].mxu1 %v1859_v14  ;;  %v2643_v14 = vrot.slane %v6953_v1, 1  ;;  %v2648_v1 = vrot.slane %v6968_v47, 1  ;;  %v2658_v13 = vrot.slane %v6992_v4, 1  ;;  %v2357_v22 = vshrl.u32 %v6995_v5, 16 }
  0xdb   : > { %4513 = vmatprep.mubr.bf16.mxu1 %v6934_v11  ;;  %4595 = vmatmul.mubr.bf16.gmra.mrb[56].mxu0 %v2259_v28  ;;  %v2642_v11 = vrot.slane %v6952_v2, 1  ;;  %v7661_v28 = vld [vmem:[#allocation2 + $0xb4] sm:$0xfe]   ;;  %v2653_v42 = vsel %vm1823_vm1, %v2651_v19, %v2652_v27  ;;  %v2359_v19 = vshll.u32 %v6995_v5, 16  ;;  %v7000_v27 = vld [vmem:[#allocation2 + $0x48] sm:$0xff]  }
  0xdc   : > { %4602 = vmatprep.mubr.bf16.mxu0 %v2635_v31  ;;  %v2645_v31 = vrot.slane %v6962_v24, 1  ;;  %6689 = vmatpush3.bf16.msra.mxu0 %v6975_v61  ;;  %v3030_v24 = vor.u32 %v3029_v60, %v3025_v59  ;;  %v7011_v5 = vld [vmem:[#allocation2 + $0xb0] ss:$0 sps:$4 sm:$0x11]  }
  0xdd   : > { %v2644_v15 = vsel %vm1823_vm1, %v2642_v11, %v2643_v14 }
  0xde   : > { %v2647_v50 = vsel %vm1823_vm1, %v2645_v31, %v2646_v33 }
  0xe2   : > { %4514 = vmatmul.mubr.bf16.gmra.mrb[64].mxu1 %v1862_v35  ;;  %v1869_v35 = vrot.slane %v7661_v28, 1  ;;  %v6974_v28 = vld [vmem:[#allocation2 + $0x18] sm:$0xff]  }
  0xe3   : > { %4521 = vmatprep.mubr.bf16.mxu1 %v6944_v36  ;;  %4603 = vmatmul.mubr.bf16.gmra.mrb[60].mxu0 %v2271_v45  ;;  %v6967_v36 = vld [vmem:[#allocation2 + $0x68] ss:$0 sps:$4 sm:$0x11]   ;;  %v1024_v45 = vunpack.c.l.bf16 %v5529_v39 }
  0xe4   : > { %4610 = vmatprep.mubr.bf16.mxu0 %v2638_v48  ;;  %v6969_v48 = vld [vmem:[#allocation2 + $0x74] ss:$0 sps:$4 sm:$0x11]   ;;  %v2316_v51 = vshll.u32 %v6967_v36, 16  ;;  %v1871_v31 = vsel %vm1823_vm1, %v1869_v35, %v1870_v41  ;;  %v2340_v36 = vshll.u32 %v6981_v23, 16 }
  0xe5   : > { %v1028_v55 = vmul.f32 %v7673_v40, %v1024_v45  ;;  %v2649_v2 = vrot.slane %v6969_v48, 1  ;;  %v6983_v39 = vld [vmem:[#allocation2 + $0x84] sm:$0xfe]   ;;  %v6985_v45 = vld [vmem:[#allocation2 + $0x30] sm:$0xff]  }
  0xe6   : > { %v2318_v58 = vrot.slane %v2316_v51, 1  ;;  %v2342_v35 = vrot.slane %v2340_v36, 1  ;;  %v6986_v41 = vld [vmem:[#allocation2 + $0x38] ss:$0 sps:$4 sm:$0x11]   ;;  %v2654_v48 = vrot.slane %v6983_v39, 1 }
  0xe7   : > { %v2650_v14 = vsel %vm1823_vm1, %v2648_v1, %v2649_v2  ;;  %v6987_v51 = vld [vmem:[#allocation2 + $0x84] sm:$0xff]   ;;  %v3056_v52 = vshll.u32 %v6986_v41, 16  ;;  %v3049_v54 = vshrl.u32 %v6985_v45, 16  ;;  %v2661_v36 = vrot.slane %v6999_v25, 1  ;;  %v7002_v39 = vld [vmem:[#allocation2 + $0x9c] sm:$0xff]  }
  0xe8   : > { %v2347_v56 = vshll.u32 %v6987_v51, 16  ;;  %v2345_v59 = vshrl.u32 %v6987_v51, 16 }
  0xe9   : > { %v3058_v2 = vrot.slane %v3056_v52, 1 }
  0xea   : > { %4522 = vmatmul.mubr.bf16.gmra.mrb[68].mxu1 %v1865_v57  ;;  %v6971_v57 = vld [vmem:[#allocation2 + $0x20] ss:$0 sps:$4 sm:$0x11]  }
  0xeb   : > { %4529 = vmatprep.mubr.bf16.mxu1 %v6951_v53  ;;  %4611 = vmatmul.mubr.bf16.gmra.mrb[64].mxu0 %v2283_v3  ;;  %v1014_v53 = vmul.f32 %v6102_v43, %v7670_v38  ;;  %v2314_v3 = vor.u32 %v2313_v34, %v2309_v30  ;;  %v2337_v34 = vrot.slane %v2335_v29, 1  ;;  %v6984_v43 = vld [vmem:[#allocation2 + $0x8c] ss:$0 sps:$4 sm:$0x11]   ;;  %v6989_v29 = vld [vmem:[#allocation2 + $0x30] sm:$0xff]  }
  0xec   : > { %4618 = vmatprep.mubr.bf16.mxu0 %v2641_v7  ;;  %v3032_v7 = vshll.u32 %v6971_v57, 16  ;;  %v6990_v57 = vld [vmem:[%s8128_s4 + $0x228] sm:$0xff]  }
  0xed   : > { %v1031_v63 = vadd.f32 %v1028_v55, %v1014_v53  ;;  %v2319_v11 = vsel %vm1422_vm0, %v2314_v3, %v2318_v58  ;;  %v2338_v47 = vor.u32 %v2337_v34, %v2333_v32  ;;  %v6988_v53 = vld [vmem:[#allocation2 + $0x8c] ss:$0 sps:$4 sm:$0x11]   ;;  %6690 = vmatprep.subr.bf16.mxu0 %v6990_v57  ;;  %v6991_v3 = vld [vmem:[#allocation2 + $0x90] sm:$0xfe]  }
  0xee   : > { %v2352_v60 = vshll.u32 %v6988_v53, 16  ;;  %6691 = vmatpush3.bf16.msra.mxu0 %v6990_v57  ;;  %v7001_v32 = vld [vmem:[#allocation2 + $0x50] ss:$0 sps:$4 sm:$0x11]   ;;  %v7006_v53 = vld [vmem:[#allocation2 + $0xa8] sm:$0xfe]  }
  0xef   : > { %v6107_v6 = vpack.c.bf16 %v1032_v0, %v1031_v63  ;;  %v2343_v61 = vsel %vm1422_vm0, %v2338_v47, %v2342_v35  ;;  %v2349_v63 = vrot.slane %v2347_v56, 1  ;;  %v6993_v0 = vld [vmem:[#allocation2 + $0x3c] sm:$0xff]   ;;  %v7005_v47 = vld [vmem:[%s8128_s4 + $0x230] sm:$0xff]  }
  0xf0   : > { %v3063_v8 = vshll.u32 %v6993_v0, 16  ;;  %6692 = vmatprep.subr.bf16.mxu0 %v7005_v47 }
  0xf1   : > { %6108 = vst [vmem:[#allocation2 + $0xc0] sm:$0xff] %v6107_v6   ;;  %v6982_v6 = vld [vmem:[#allocation2 + $0x24] sm:$0xff]   ;;  %v2350_v9 = vor.u32 %v2349_v63, %v2345_v59 }
  0xf2   : > { %4530 = vmatmul.mubr.bf16.gmra.mrb[72].mxu1 %v1868_v17  ;;  %v3034_v17 = vrot.slane %v3032_v7, 1  ;;  %6693 = vmatpush3.bf16.msra.mxu0 %v7005_v47 }
  0xf3   : > { %4619 = vmatmul.mubr.bf16.gmra.mrb[68].mxu0 %v2295_v26  ;;  %v2326_v26 = vor.u32 %v2325_v12, %v2321_v62  ;;  %v2354_v62 = vrot.slane %v2352_v60, 1  ;;  %v2657_v12 = vrot.slane %v6991_v3, 1  ;;  %v7008_v60 = vld [vmem:[#allocation2 + $0x54] sm:$0xff]  }
  0xf4   : > { %4626 = vmatprep.mubr.bf16.mxu0 %v2644_v15  ;;  %v3041_v15 = vrot.slane %v3039_v21, 1  ;;  %v3035_v33 = vsel %vm1422_vm0, %v3030_v24, %v3034_v17  ;;  %v3068_v17 = vshll.u32 %v6994_v10, 16  ;;  %v2361_v24 = vrot.slane %v2359_v19, 1 }
  0xf5   : > { %v2331_v37 = vsel %vm1422_vm0, %v2326_v26, %v2330_v18  ;;  %v6996_v18 = vld [vmem:[#allocation2 + $0x98] ss:$0 sps:$4 sm:$0x11]   ;;  %v2355_v21 = vsel %vm1422_vm0, %v2350_v9, %v2354_v62  ;;  %v3087_v63 = vshll.u32 %v7008_v60, 16  ;;  %v3085_v4 = vshrl.u32 %v7008_v60, 16 }
  0xf6   : > { %v3042_v46 = vor.u32 %v3041_v15, %v3037_v16  ;;  %v2364_v26 = vshll.u32 %v6996_v18, 16  ;;  %v2659_v16 = vsel %vm1823_vm1, %v2657_v12, %v2658_v13  ;;  %v6998_v15 = vld [vmem:[#allocation2 + $0x9c] sm:$0xfe]   ;;  %v3070_v23 = vrot.slane %v3068_v17, 1  ;;  %v7013_v13 = vld [vmem:[#allocation2 + $0xb4] sm:$0xfe]  }
  0xf7   : > { %v2660_v34 = vrot.slane %v6998_v15, 1  ;;  %v2388_v10 = vshll.u32 %v7011_v5, 16  ;;  %v7004_v17 = vld [vmem:[#allocation2 + $0x48] sm:$0xff]   ;;  %v7018_v15 = vld [vmem:[#allocation2 + $0xbc] ss:$0 sps:$4 sm:$0x11]  }
  0xf8   : > { %v6961_v30 = vld [vmem:[#allocation2 + $0xc0] sm:$0xff]   ;;  %v3047_v58 = vsel %vm1422_vm0, %v3042_v46, %v3046_v44  ;;  %v2371_v46 = vshll.u32 %v7002_v39, 16 }
  0xf9   : > { %4537 = vmatprep.mubr.bf16.mxu1 %v6961_v30  ;;  %v2662_v51 = vsel %vm1823_vm1, %v2660_v34, %v2661_v36  ;;  %v2390_v19 = vrot.slane %v2388_v10, 1  ;;  %v7020_v36 = vld [vmem:[%s8128_s4 + $0x238] sm:$0xff]  }
  0xfa   : > { %4538 = vmatmul.mubr.bf16.gmra.mrb[76].mxu1 %v1871_v31  ;;  %v2366_v31 = vrot.slane %v2364_v26, 1  ;;  %v7016_v26 = vld [vmem:[#allocation2 + $0x68] ss:$0 sps:$4 sm:$0x11]   ;;  %6694 = vmatprep.subr.bf16.mxu0 %v7020_v36 }
  0xfb   : > { %4627 = vmatmul.mubr.bf16.gmra.mrb[72].mxu0 %v2307_v49  ;;  %4739 = vmatprep.mubr.bf16.mxu1 %v3035_v33  ;;  %v2655_v49 = vrot.slane %v6984_v43, 1  ;;  %v2362_v33 = vor.u32 %v2361_v24, %v2357_v22  ;;  %v3080_v43 = vshll.u32 %v7001_v32, 16  ;;  %v2666_v22 = vrot.slane %v7013_v13, 1  ;;  %v7019_v13 = vld [vmem:[#allocation2 + $0x60] sm:$0xff]  }
  0xfc   : > { %4634 = vmatprep.mubr.bf16.mxu0 %v2647_v50  ;;  %v3051_v50 = vshll.u32 %v6985_v45, 16  ;;  %v7003_v45 = vld [vmem:[#allocation2 + $0xa4] ss:$0 sps:$4 sm:$0x11]   ;;  %6695 = vmatpush3.bf16.msra.mxu0 %v7020_v36 }
  0xfd   : > { %v2656_v1 = vsel %vm1823_vm1, %v2654_v48, %v2655_v49  ;;  %v3082_v41 = vrot.slane %v3080_v43, 1  ;;  %v2367_v48 = vsel %vm1422_vm0, %v2362_v33, %v2366_v31  ;;  %v2373_v49 = vrot.slane %v2371_v46, 1  ;;  %v1009_v46 = vld [vmem:[%s7666_s25 + $0x8] sm:$0x1] }
  0xfe   : > { %v3053_v55 = vrot.slane %v3051_v50, 1  ;;  %v2376_v50 = vshll.u32 %v7003_v45, 16  ;;  %v2400_v33 = vshll.u32 %v7018_v15, 16 }
 0x100   : > { %v3054_v7 = vor.u32 %v3053_v55, %v3049_v54  ;;  %v2378_v52 = vrot.slane %v2376_v50, 1  ;;  %v7007_v54 = vld [vmem:[#allocation2 + $0xb0] ss:$0 sps:$4 sm:$0x11]   ;;  %v6997_v55 = vld [vmem:[#allocation2 + $0x3c] sm:$0xff]  }
 0x101   : > { %v2664_v59 = vrot.slane %v7007_v54, 1 }
 0x102   : > { %4740 = vmatmul.mubr.bf16.vlgmr.msra.gmra.mrb[80].mxu1 %v6974_v28  ;;  %v3059_v20 = vsel %vm1422_vm0, %v3054_v7, %v3058_v2  ;;  %v2369_v28 = vshrl.u32 %v7002_v39, 16 }
 0x103   : > { %4635 = vmatmul.mubr.bf16.gmra.mrb[76].mxu0 %v2319_v11  ;;  %4747 = vmatprep.mubr.bf16.mxu1 %v3047_v58  ;;  %v3061_v11 = vshrl.u32 %v6993_v0, 16  ;;  %v2663_v58 = vrot.slane %v7006_v53, 1 }
 0x104   : > { %4642 = vmatprep.mubr.bf16.mxu0 %v2650_v14  ;;  %v3065_v14 = vrot.slane %v3063_v8, 1  ;;  %v2374_v57 = vor.u32 %v2373_v49, %v2369_v28 }
 0x105   : > { %v2665_v9 = vsel %vm1823_vm1, %v2663_v58, %v2664_v59 }
 0x106   : > { %v3066_v30 = vor.u32 %v3065_v14, %v3061_v11  ;;  %v2379_v3 = vsel %vm1422_vm0, %v2374_v57, %v2378_v52  ;;  %v7015_v11 = vld [vmem:[#allocation2 + $0x60] sm:$0xff]   ;;  %v7014_v14 = vld [vmem:[#allocation2 + $0xbc] ss:$0 sps:$4 sm:$0x11]   ;;  %v5531_v52 = vld [vmem:[%s7666_s25 + $0x14] sm:$0x1] }
 0x107   : > { %v2667_v24 = vrot.slane %v7014_v14, 1  ;;  %v7725_v57 = vld [vmem:[#allocation2 + $0xc0] sm:$0xfe]  }
 0x108   : > { %v3071_v35 = vsel %vm1422_vm0, %v3066_v30, %v3070_v23 }
 0x10a   : > { %4748 = vmatmul.mubr.bf16.gmra.mrb[84].mxu1 %v6982_v6  ;;  %v3089_v6 = vrot.slane %v3087_v63, 1  ;;  %v7023_v63 = vld [vmem:[#allocation2 + $0x6c] sm:$0xff]  }
 0x10b   : > { %4643 = vmatmul.mubr.bf16.gmra.mrb[80].mxu0 %v2331_v37  ;;  %4755 = vmatprep.mubr.bf16.mxu1 %v3059_v20  ;;  %v3075_v37 = vshll.u32 %v7000_v27, 16  ;;  %v3097_v20 = vshrl.u32 %v7015_v11, 16  ;;  %v3111_v5 = vshll.u32 %v7023_v63, 16 }
 0x10c   : > { %4650 = vmatprep.mubr.bf16.mxu0 %v2653_v42  ;;  %v3073_v42 = vshrl.u32 %v7000_v27, 16  ;;  %v3090_v18 = vor.u32 %v3089_v6, %v3085_v4  ;;  %v3099_v27 = vshll.u32 %v7015_v11, 16  ;;  %v3109_v4 = vshrl.u32 %v7023_v63, 16  ;;  %v7035_v63 = vld [vmem:[#allocation2 + $0x84] sm:$0xff]  }
 0x10d   : > { %v3077_v44 = vrot.slane %v3075_v37, 1  ;;  %v2668_v37 = vsel %vm1823_vm1, %v2666_v22, %v2667_v24  ;;  %v3113_v10 = vrot.slane %v3111_v5, 1 }
 0x10e   : > { %v3101_v25 = vrot.slane %v3099_v27, 1 }
 0x10f   : > { %v3078_v56 = vor.u32 %v3077_v44, %v3073_v42  ;;  %v2402_v44 = vrot.slane %v2400_v33, 1  ;;  %v3114_v22 = vor.u32 %v3113_v10, %v3109_v4 }
 0x111   : > { %v3083_v2 = vsel %vm1422_vm0, %v3078_v56, %v3082_v41  ;;  %v3102_v41 = vor.u32 %v3101_v25, %v3097_v20  ;;  %v1026_v56 = vunpack.c.l.bf16 %v5531_v52 }
 0x112   : > { %4756 = vmatmul.mubr.bf16.gmra.mrb[88].mxu1 %v6989_v29  ;;  %v3104_v29 = vshll.u32 %v7016_v26, 16 }
 0x113   : > { %4651 = vmatmul.mubr.bf16.gmra.mrb[84].mxu0 %v2343_v61  ;;  %4763 = vmatprep.mubr.bf16.mxu1 %v3071_v35  ;;  %v7009_v61 = vld [vmem:[#allocation2 + $0x5c] ss:$0 sps:$4 sm:$0x11]   ;;  %v7012_v35 = vld [vmem:[#allocation2 + $0x54] sm:$0xff]  }
 0x114   : > { %4658 = vmatprep.mubr.bf16.mxu0 %v2656_v1  ;;  %v3092_v0 = vshll.u32 %v7009_v61, 16  ;;  %v7010_v1 = vld [vmem:[#allocation2 + $0xa8] sm:$0xff]   ;;  %v3106_v39 = vrot.slane %v3104_v29, 1  ;;  %v1030_v61 = vmul.f32 %v7673_v40, %v1026_v56 }
 0x115   : > { %v2381_v62 = vshrl.u32 %v7010_v1, 16  ;;  %v2383_v8 = vshll.u32 %v7010_v1, 16 }
 0x116   : > { %v3094_v7 = vrot.slane %v3092_v0, 1  ;;  %v7024_v0 = vld [vmem:[#allocation2 + $0x74] ss:$0 sps:$4 sm:$0x11]   ;;  %v3107_v1 = vsel %vm1422_vm0, %v3102_v41, %v3106_v39 }
 0x117   : > { %v2385_v12 = vrot.slane %v2383_v8, 1  ;;  %v3116_v6 = vshll.u32 %v7024_v0, 16 }
 0x118   : > { %v3095_v23 = vsel %vm1422_vm0, %v3090_v18, %v3094_v7  ;;  %v7025_v7 = vld [vmem:[#allocation2 + $0xc0] sm:$0xff]  }
 0x119   : > { %v2405_v40 = vshrl.u32 %v7025_v7, 16  ;;  %v3118_v14 = vrot.slane %v3116_v6, 1  ;;  %v2407_v24 = vshll.u32 %v7025_v7, 16  ;;  %v7036_v7 = vld [vmem:[#allocation2 + $0x8c] ss:$0 sps:$4 sm:$0x11]  }
 0x11a   : > { %4764 = vmatmul.mubr.bf16.gmra.mrb[92].mxu1 %v6997_v55 }
 0x11b   : > { %4659 = vmatmul.mubr.bf16.gmra.mrb[88].mxu0 %v2355_v21  ;;  %4771 = vmatprep.mubr.bf16.mxu1 %v3083_v2  ;;  %v2386_v21 = vor.u32 %v2385_v12, %v2381_v62  ;;  %v2669_v62 = vrot.slane %v7725_v57, 1  ;;  %v3119_v33 = vsel %vm1422_vm0, %v3114_v22, %v3118_v14 }
 0x11c   : > { %4666 = vmatprep.mubr.bf16.mxu0 %v2659_v16  ;;  %v7017_v16 = vld [vmem:[#allocation2 + $0xb4] sm:$0xff]  }
 0x11d   : > { %v2391_v30 = vsel %vm1422_vm0, %v2386_v21, %v2390_v19  ;;  %v2393_v31 = vshrl.u32 %v7017_v16, 16  ;;  %v2395_v32 = vshll.u32 %v7017_v16, 16  ;;  %v7028_v21 = vld [vmem:[#allocation2 + $0x78] sm:$0xff]   ;;  %v7029_v16 = vld [vmem:[#allocation2 + $0x80] ss:$0 sps:$4 sm:$0x11]  }
 0x11e   : > { %v3121_v25 = vshrl.u32 %v7028_v21, 16 }
 0x11f   : > { %v2397_v43 = vrot.slane %v2395_v32, 1  ;;  %v7030_v32 = vld [vmem:[#allocation2 + $0x18] sm:$0xfe]  }
 0x121   : > { %v2398_v53 = vor.u32 %v2397_v43, %v2393_v31  ;;  %v3128_v31 = vshll.u32 %v7029_v16, 16 }
 0x122   : > { %4772 = vmatmul.mubr.bf16.gmra.mrb[96].mxu1 %v7004_v17 }
 0x123   : > { %4667 = vmatmul.mubr.bf16.gmra.mrb[92].mxu0 %v2367_v48  ;;  %4779 = vmatprep.mubr.bf16.mxu1 %v3095_v23  ;;  %v2403_v2 = vsel %vm1422_vm0, %v2398_v53, %v2402_v44  ;;  %v3424_v44 = vrot.slane %v7030_v32, 1 }
 0x124   : > { %4674 = vmatprep.mubr.bf16.mxu0 %v2662_v51  ;;  %v6224_v42 = vpop.f32.mrb[0].mxu0  ;;  %v1012_v51 = vunpack.c.l.bf16 %v1009_v46  ;;  %v7033_v46 = vld [vmem:[#allocation2 + $0x24] sm:$0xfe]  }
 0x125   : > { %v6225_v28 = vpop.f32.mrb[1].mxu0 }
 0x126   : > { %v7722_v48 = vadd.f32 %v6225_v28, %v6224_v42  ;;  %v6227_v50 = vpop.f32.mrb[2].mxu0  ;;  %v1016_v60 = vmul.f32 %v7670_v38, %v1012_v51  ;;  %v3130_v42 = vrot.slane %v3128_v31, 1  ;;  %v7027_v51 = vld [vmem:[#allocation2 + $0x6c] sm:$0xff]   ;;  %v7041_v31 = vld [vmem:[#allocation2 + $0x44] ss:$0 sps:$4 sm:$0x11]  }
 0x127   : > { %v6228_v55 = vpop.f32.mrb[3].mxu0 }
 0x128   : > { %v6296_v34 = vpop.f32.mrb[0].mxu1  ;;  %v7729_v59 = vadd.f32 %v6228_v55, %v6227_v50 }
 0x129   : > { %v6297_v45 = vpop.f32.mrb[1].mxu1 }
 0x12a   : > { %v7720_v47 = vadd.f32 %v6297_v45, %v6296_v34  ;;  %v6299_v49 = vpop.f32.mrb[2].mxu1  ;;  %4780 = vmatmul.mubr.bf16.gmra.mrb[100].mxu1 %v7012_v35  ;;  %v7031_v34 = vld [vmem:[#allocation2 + $0x20] ss:$0 sps:$4 sm:$0x11]  }
 0x12b   : > { %4675 = vmatmul.mubr.bf16.gmra.mrb[96].mxu0 %v2379_v3  ;;  %v6300_v54 = vpop.f32.mrb[3].mxu1  ;;  %v1033_v3 = vadd.f32 %v1030_v61, %v1016_v60  ;;  %4787 = vmatprep.mubr.bf16.mxu1 %v3107_v1  ;;  %v3425_v55 = vrot.slane %v7031_v34, 1  ;;  %v7034_v60 = vld [vmem:[#allocation2 + $0x2c] ss:$0 sps:$4 sm:$0x11]  }
 0x12c   : > { %4682 = vmatprep.mubr.bf16.mxu0 %v2665_v9  ;;  %v7727_v58 = vadd.f32 %v6300_v54, %v6299_v49  ;;  %v6230_v9 = vpop.f32.mrb[4].mxu0  ;;  %v3428_v6 = vrot.slane %v7034_v60, 1 }
 0x12d   : > { %v5959_v38 = vpack.c.bf16 %v1033_v3, %v1033_v3  ;;  %v6231_v12 = vpop.f32.mrb[5].mxu0 }
 0x12e   : > { %v7738_v18 = vadd.f32 %v6231_v12, %v6230_v9  ;;  %v6233_v20 = vpop.f32.mrb[6].mxu0  ;;  %v3133_v9 = vshrl.u32 %v7035_v63, 16  ;;  %v3140_v12 = vshll.u32 %v7036_v7, 16 }
 0x12f   : > { %1050 = vst [vmem:[#allocation2 + $0xc8] sm:$0x1] %v5959_v38  ;;  %v6234_v27 = vpop.f32.mrb[7].mxu0  ;;  %v3135_v38 = vshll.u32 %v7035_v63, 16 }
 0x130   : > { %v7742_v23 = vadd.f32 %v6234_v27, %v6233_v20  ;;  %v7032_v20 = vld [vmem:[#allocation2 + $0x78] sm:$0xff]  }
 0x131   : > { %v3137_v14 = vrot.slane %v3135_v38, 1 }
 0x132   : > { %4788 = vmatmul.mubr.bf16.gmra.mrb[104].mxu1 %v7019_v13 }
 0x133   : > { %4683 = vmatmul.mubr.bf16.gmra.mrb[100].mxu0 %v2391_v30  ;;  %v6302_v8 = vpop.f32.mrb[4].mxu1  ;;  %v3123_v30 = vshll.u32 %v7028_v21, 16  ;;  %4795 = vmatprep.mubr.bf16.mxu1 %v3119_v33  ;;  %v3142_v21 = vrot.slane %v3140_v12, 1 }
 0x134   : > { %4690 = vmatprep.mubr.bf16.mxu0 %v2668_v37  ;;  %v6303_v11 = vpop.f32.mrb[5].mxu1  ;;  %v2409_v37 = vrot.slane %v2407_v24, 1  ;;  %v3138_v24 = vor.u32 %v3137_v14, %v3133_v9 }
 0x135   : > { %v7736_v17 = vadd.f32 %v6303_v11, %v6302_v8  ;;  %v6305_v19 = vpop.f32.mrb[6].mxu1  ;;  %v3125_v39 = vrot.slane %v3123_v30, 1  ;;  %v3426_v11 = vsel %vm1823_vm1, %v3424_v44, %v3425_v55 }
 0x136   : > { %v6306_v26 = vpop.f32.mrb[7].mxu1  ;;  %v7022_v50 = vld [vmem:[#allocation2 + $0xc8] ss:$0 sps:$4 sm:$0x11]   ;;  %v2410_v0 = vor.u32 %v2409_v37, %v2405_v40  ;;  %v3143_v37 = vsel %vm1422_vm0, %v3138_v24, %v3142_v21 }
 0x137   : > { %v7740_v15 = vadd.f32 %v6306_v26, %v6305_v19  ;;  %v3126_v52 = vor.u32 %v3125_v39, %v3121_v25  ;;  %v7026_v54 = vld [vmem:[#allocation2 + $0xc8] ss:$0 sps:$4 sm:$0x11]   ;;  %v2670_v57 = vrot.slane %v7022_v50, 1  ;;  %v7037_v19 = vld [vmem:[#allocation2 + $0x30] sm:$0xfe]  }
 0x138   : > { %v2412_v1 = vshll.u32 %v7026_v54, 16  ;;  %v3430_v26 = vrot.slane %v7037_v19, 1  ;;  %v7040_v25 = vld [vmem:[#allocation2 + $0x3c] sm:$0xfe]   ;;  %v7039_v54 = vld [vmem:[#allocation2 + $0x84] sm:$0xff]  }
 0x139   : > { %v6236_v36 = vpop.f32.mrb[8].mxu0  ;;  %v2671_v4 = vsel %vm1823_vm1, %v2669_v62, %v2670_v57  ;;  %v3131_v5 = vsel %vm1422_vm0, %v3126_v52, %v3130_v42  ;;  %v7038_v62 = vld [vmem:[#allocation2 + $0x38] ss:$0 sps:$4 sm:$0x11]   ;;  %v3433_v44 = vrot.slane %v7040_v25, 1 }
 0x13a   : > { %v6237_v28 = vpop.f32.mrb[9].mxu0  ;;  %v2414_v8 = vrot.slane %v2412_v1, 1  ;;  %4796 = vmatmul.mubr.bf16.gmra.mrb[108].mxu1 %v7027_v51  ;;  %v3431_v27 = vrot.slane %v7038_v62, 1  ;;  %v3434_v51 = vrot.slane %v7041_v31, 1  ;;  %v7049_v62 = vld [vmem:[#allocation2 + $0x9c] sm:$0xff]  }
 0x13b   : > { %4691 = vmatmul.mubr.bf16.gmra.mrb[104].mxu0 %v2403_v2  ;;  %v7747_v35 = vadd.f32 %v6237_v28, %v6236_v36  ;;  %v6239_v49 = vpop.f32.mrb[10].mxu0  ;;  %v3427_v2 = vrot.slane %v7033_v46, 1  ;;  %4803 = vmatprep.mubr.bf16.mxu1 %v3131_v5  ;;  %v7042_v36 = vld [vmem:[#allocation2 + $0x90] sm:$0xff]   ;;  %v7043_v46 = vld [vmem:[#allocation2 + $0x98] ss:$0 sps:$4 sm:$0x11]  }
 0x13c   : > { %v6240_v61 = vpop.f32.mrb[11].mxu0  ;;  %4698 = vmatprep.mubr.bf16.mxu0 %v2671_v4  ;;  %v2415_v13 = vsel %vm1422_vm0, %v2410_v0, %v2414_v8  ;;  %v3147_v50 = vshll.u32 %v7042_v36, 16  ;;  %v3152_v52 = vshll.u32 %v7043_v46, 16  ;;  %v7045_v57 = vld [vmem:[#allocation2 + $0x50] ss:$0 sps:$4 sm:$0x11]   ;;  %v3435_v9 = vsel %vm1823_vm1, %v3433_v44, %v3434_v51 }
 0x13d   : > { %v7751_v3 = vadd.f32 %v6240_v61, %v6239_v49  ;;  %v3145_v49 = vshrl.u32 %v7042_v36, 16  ;;  %v3437_v0 = vrot.slane %v7045_v57, 1  ;;  %v7048_v4 = vld [vmem:[#allocation2 + $0x5c] ss:$0 sps:$4 sm:$0x11]   ;;  %v3157_v25 = vshrl.u32 %v7049_v62, 16 }
 0x13e   : > { %v3149_v55 = vrot.slane %v3147_v50, 1  ;;  %v3154_v60 = vrot.slane %v3152_v52, 1  ;;  %v7051_v31 = vld [vmem:[#allocation2 + $0x60] sm:$0xfe]  }
 0x140   : > { %v6308_v29 = vpop.f32.mrb[8].mxu1  ;;  %v3150_v63 = vor.u32 %v3149_v55, %v3145_v49  ;;  %v7054_v49 = vld [vmem:[#allocation2 + $0x6c] sm:$0xfe]  }
 0x141   : > { %v6309_v43 = vpop.f32.mrb[9].mxu1 }
 0x142   : > { %v7745_v45 = vadd.f32 %v6309_v43, %v6308_v29  ;;  %v6311_v41 = vpop.f32.mrb[10].mxu1  ;;  %v3429_v43 = vsel %vm1823_vm1, %v3427_v2, %v3428_v6  ;;  %4804 = vmatmul.mubr.bf16.gmra.mrb[112].mxu1 %v7032_v20  ;;  %v7047_v2 = vld [vmem:[#allocation2 + $0x54] sm:$0xfe]   ;;  %v3155_v6 = vsel %vm1422_vm0, %v3150_v63, %v3154_v60  ;;  %v7050_v20 = vld [vmem:[#allocation2 + $0xa4] ss:$0 sps:$4 sm:$0x11]  }
 0x143   : > { %v6312_v53 = vpop.f32.mrb[11].mxu1  ;;  %4699 = vmatmul.mubr.bf16.gmra.mrb[108].mxu0 %v2415_v13  ;;  %4811 = vmatprep.mubr.bf16.mxu1 %v3143_v37  ;;  %v3439_v38 = vrot.slane %v7047_v2, 1  ;;  %v7056_v60 = vld [vmem:[#allocation2 + $0xa8] sm:$0xff]  }
 0x144   : > { %v7749_v56 = vadd.f32 %v6312_v53, %v6311_v41  ;;  %6696 = vmatprep.mubr.bf16.mxu0 %v3426_v11  ;;  %v3432_v41 = vsel %vm1823_vm1, %v3430_v26, %v3431_v27  ;;  %v7044_v53 = vld [vmem:[#allocation2 + $0x48] sm:$0xfe]   ;;  %v7046_v26 = vld [vmem:[#allocation2 + $0x90] sm:$0xff]   ;;  %v3440_v27 = vrot.slane %v7048_v4, 1  ;;  %v3445_v4 = vrot.slane %v7054_v49, 1 }
 0x145   : > { %v3436_v61 = vrot.slane %v7044_v53, 1  ;;  %v7063_v49 = vld [vmem:[#allocation2 + $0xb4] sm:$0xff]  }
 0x146   : > { %v6242_v40 = vpop.f32.mrb[12].mxu0  ;;  %v3441_v53 = vsel %vm1823_vm1, %v3439_v38, %v3440_v27  ;;  %v3171_v38 = vshll.u32 %v7056_v60, 16  ;;  %v7061_v27 = vld [vmem:[#allocation2 + $0x84] sm:$0xfe]  }
 0x147   : > { %v6243_v29 = vpop.f32.mrb[13].mxu0  ;;  %v3438_v13 = vsel %vm1823_vm1, %v3436_v61, %v3437_v0 }
 0x148   : > { %v7759_v32 = vadd.f32 %v6243_v29, %v6242_v40  ;;  %v6245_v33 = vpop.f32.mrb[14].mxu0  ;;  %v3159_v29 = vshll.u32 %v7049_v62, 16 }
 0x149   : > { %v6246_v42 = vpop.f32.mrb[15].mxu0 }
 0x14a   : > { %v7765_v28 = vadd.f32 %v6246_v42, %v6245_v33  ;;  %4812 = vmatmul.mubr.bf16.gmra.mrb[116].mxu1 %v7039_v54  ;;  %v3161_v37 = vrot.slane %v3159_v29, 1  ;;  %v7055_v54 = vld [vmem:[#allocation2 + $0x74] ss:$0 sps:$4 sm:$0x11]  }
 0x14b   : > { %6697 = vmatmul.mubr.bf16.vlgmr.msra.gmra.mrb[112].mxu0 %v3429_v43  ;;  %4819 = vmatprep.mubr.bf16.mxu1 %v3155_v6  ;;  %v7057_v6 = vld [vmem:[#allocation2 + $0xb0] ss:$0 sps:$4 sm:$0x11]  }
 0x14c   : > { %6700 = vmatprep.mubr.bf16.mxu0 %v3432_v41  ;;  %v3162_v41 = vor.u32 %v3161_v37, %v3157_v25  ;;  %v7062_v25 = vld [vmem:[#allocation2 + $0x8c] ss:$0 sps:$4 sm:$0x11]  }
 0x14d   : > { %v6314_v10 = vpop.f32.mrb[12].mxu1  ;;  %v3452_v37 = vrot.slane %v7062_v25, 1  ;;  %v7067_v25 = vld [vmem:[#allocation2 + $0xb4] sm:$0xff]  }
 0x14e   : > { %v6315_v22 = vpop.f32.mrb[13].mxu1 }
 0x14f   : > { %v7757_v16 = vadd.f32 %v6315_v22, %v6314_v10  ;;  %v6317_v30 = vpop.f32.mrb[14].mxu1 }
 0x150   : > { %v6318_v34 = vpop.f32.mrb[15].mxu1 }
 0x151   : > { %v7762_v39 = vadd.f32 %v6318_v34, %v6317_v30  ;;  %v3164_v30 = vshll.u32 %v7050_v20, 16  ;;  %v7052_v34 = vld [vmem:[#allocation2 + $0x68] ss:$0 sps:$4 sm:$0x11]  }
 0x152   : > { %v3443_v44 = vrot.slane %v7052_v34, 1  ;;  %4820 = vmatmul.mubr.bf16.gmra.mrb[120].mxu1 %v7046_v26 }
 0x153   : > { %6701 = vmatmul.mubr.bf16.gmra.mrb[116].mxu0 %v3435_v9  ;;  %v3166_v42 = vrot.slane %v3164_v30, 1  ;;  %v3169_v9 = vshrl.u32 %v7056_v60, 16 }
 0x154   : > { %6704 = vmatprep.mubr.bf16.mxu0 %v3438_v13  ;;  %v7059_v13 = vld [vmem:[#allocation2 + $0x80] ss:$0 sps:$4 sm:$0x11]  }
 0x155   : > { %v6336_v1 = vpop.f32.mrb[16].mxu1  ;;  %v3167_v61 = vsel %vm1422_vm0, %v3162_v41, %v3166_v42  ;;  %v3449_v20 = vrot.slane %v7059_v13, 1 }
 0x156   : > { %v6337_v7 = vpop.f32.mrb[17].mxu1  ;;  %4827 = vmatprep.mubr.bf16.mxu1 %v3167_v61  ;;  %v7065_v61 = vld [vmem:[#allocation2 + $0x90] sm:$0xfe]  }
 0x157   : > { %v6248_v5 = vpop.f32.mrb[16].mxu0  ;;  %v6338_v10 = vadd.f32 %v6337_v7, %v6336_v1  ;;  %v6339_v12 = vpop.f32.mrb[18].mxu1  ;;  %v7053_v7 = vld [vmem:[#allocation2 + $0x9c] sm:$0xff]  }
 0x158   : > { %v6249_v8 = vpop.f32.mrb[17].mxu0  ;;  %v6340_v14 = vpop.f32.mrb[19].mxu1 }
 0x159   : > { %v7770_v11 = vadd.f32 %v6249_v8, %v6248_v5  ;;  %v6251_v40 = vpop.f32.mrb[18].mxu0  ;;  %v7774_v21 = vadd.f32 %v6338_v10, %v7722_v48  ;;  %v6341_v22 = vadd.f32 %v6340_v14, %v6339_v12  ;;  %v3442_v48 = vrot.slane %v7051_v31, 1 }
 0x15a   : > { %v6252_v19 = vpop.f32.mrb[19].mxu0  ;;  %v3446_v10 = vrot.slane %v7055_v54, 1  ;;  %v3176_v12 = vshll.u32 %v7057_v6, 16  ;;  %4828 = vmatmul.mubr.bf16.gmra.mrb[124].mxu1 %v7053_v7  ;;  %v7060_v54 = vld [vmem:[#allocation2 + $0xa8] sm:$0xff]   ;;  %v3454_v7 = vrot.slane %v7065_v61, 1 }
 0x15b   : > { %v7776_v24 = vadd.f32 %v6252_v19, %v6251_v40  ;;  %v7779_v33 = vadd.f32 %v6341_v22, %v7729_v59  ;;  %v3444_v63 = vsel %vm1823_vm1, %v3442_v48, %v3443_v44  ;;  %6705 = vmatmul.mubr.bf16.gmra.mrb[120].mxu0 %v3441_v53  ;;  %v7058_v40 = vld [vmem:[#allocation2 + $0x78] sm:$0xfe]  }
 0x15c   : > { %6708 = vmatprep.mubr.bf16.mxu0 %v3444_v63  ;;  %v3178_v14 = vrot.slane %v3176_v12, 1  ;;  %v3448_v19 = vrot.slane %v7058_v40, 1  ;;  %v3447_v26 = vsel %vm1823_vm1, %v3445_v4, %v3446_v10  ;;  %v7068_v40 = vld [vmem:[#allocation2 + $0x9c] sm:$0xfe]   ;;  %v7075_v61 = vld [vmem:[#allocation2 + $0xb4] sm:$0xfe]  }
 0x15d   : > { %v6342_v36 = vpop.f32.mrb[20].mxu1 }
 0x15e   : > { %v6343_v46 = vpop.f32.mrb[21].mxu1  ;;  %v3450_v30 = vsel %vm1823_vm1, %v3448_v19, %v3449_v20 }
 0x15f   : > { %v6344_v50 = vadd.f32 %v6343_v46, %v6342_v36  ;;  %v6345_v52 = vpop.f32.mrb[22].mxu1  ;;  %v3451_v36 = vrot.slane %v7061_v27, 1 }
 0x160   : > { %v6346_v57 = vpop.f32.mrb[23].mxu1 }
 0x161   : > { %v7787_v0 = vadd.f32 %v6344_v50, %v7738_v18  ;;  %v6347_v1 = vadd.f32 %v6346_v57, %v6345_v52  ;;  %v3173_v18 = vrot.slane %v3171_v38, 1  ;;  %v7064_v50 = vld [vmem:[#allocation2 + $0xbc] ss:$0 sps:$4 sm:$0x11]   ;;  %v3183_v57 = vshll.u32 %v7063_v49, 16 }
 0x162   : > { %v6254_v43 = vpop.f32.mrb[20].mxu0  ;;  %v3188_v60 = vshll.u32 %v7064_v50, 16  ;;  %v7073_v50 = vld [vmem:[#allocation2 + $0xb0] ss:$0 sps:$4 sm:$0x11]  }
 0x163   : > { %v6255_v51 = vpop.f32.mrb[21].mxu0  ;;  %v7792_v8 = vadd.f32 %v6347_v1, %v7742_v23  ;;  %v3174_v62 = vor.u32 %v3173_v18, %v3169_v9  ;;  %6709 = vmatmul.mubr.bf16.gmra.mrb[124].mxu0 %v3447_v26  ;;  %v7066_v1 = vld [vmem:[#allocation2 + $0x98] ss:$0 sps:$4 sm:$0x11]   ;;  %v3185_v4 = vrot.slane %v3183_v57, 1  ;;  %v7070_v26 = vld [vmem:[#allocation2 + $0xc0] sm:$0xff]  }
 0x164   : > { %v7782_v55 = vadd.f32 %v6255_v51, %v6254_v43  ;;  %v6257_v59 = vpop.f32.mrb[22].mxu0  ;;  %6712 = vmatprep.mubr.bf16.mxu0 %v3450_v30  ;;  %v3190_v6 = vrot.slane %v3188_v60, 1  ;;  %v3455_v38 = vrot.slane %v7066_v1, 1  ;;  %v3461_v57 = vrot.slane %v7073_v50, 1 }
 0x165   : > { %v6258_v2 = vpop.f32.mrb[23].mxu0  ;;  %v6348_v22 = vpop.f32.mrb[24].mxu1  ;;  %v3179_v23 = vsel %vm1422_vm0, %v3174_v62, %v3178_v14  ;;  %v7076_v1 = vld [vmem:[#allocation2 + $0xbc] ss:$0 sps:$4 sm:$0x11]  }
 0x166   : > { %v7789_v5 = vadd.f32 %v6258_v2, %v6257_v59  ;;  %v6349_v31 = vpop.f32.mrb[25].mxu1  ;;  %4835 = vmatprep.mubr.bf16.mxu1 %v3179_v23  ;;  %v3181_v59 = vshrl.u32 %v7063_v49, 16  ;;  %v3456_v19 = vsel %vm1823_vm1, %v3454_v7, %v3455_v38  ;;  %v3464_v38 = vrot.slane %v7076_v1, 1  ;;  %v1060_v1 = vld [vmem:[%s1057_s14 + $0x8] sm:$0x1] }
 0x167   : > { %v6350_v42 = vadd.f32 %v6349_v31, %v6348_v22  ;;  %v6351_v43 = vpop.f32.mrb[26].mxu1  ;;  %4836 = vmatmul.mubr.bf16.gmra.mrb[128].mxu1 %v7060_v54 }
 0x168   : > { %v6352_v46 = vpop.f32.mrb[27].mxu1  ;;  %v3186_v12 = vor.u32 %v3185_v4, %v3181_v59 }
 0x169   : > { %v7800_v51 = vadd.f32 %v6350_v42, %v7747_v35  ;;  %v6353_v52 = vadd.f32 %v6352_v46, %v6351_v43  ;;  %v3453_v35 = vsel %vm1823_vm1, %v3451_v36, %v3452_v37  ;;  %v7071_v37 = vld [vmem:[#allocation2 + $0xc8] ss:$0 sps:$4 sm:$0x11]   ;;  %v3193_v43 = vshrl.u32 %v7070_v26, 16 }
 0x16a   : > { %v6260_v29 = vpop.f32.mrb[24].mxu0  ;;  %v3191_v27 = vsel %vm1422_vm0, %v3186_v12, %v3190_v6  ;;  %v3200_v46 = vshll.u32 %v7071_v37, 16  ;;  %v7074_v6 = vld [vmem:[#allocation2 + $0xc0] sm:$0xff]  }
 0x16b   : > { %v6261_v34 = vpop.f32.mrb[25].mxu0  ;;  %v7805_v63 = vadd.f32 %v6353_v52, %v7751_v3  ;;  %v7069_v3 = vld [vmem:[#allocation2 + $0xa4] ss:$0 sps:$4 sm:$0x11]   ;;  %6713 = vmatmul.mubr.bf16.gmra.mrb[128].mxu0 %v3453_v35  ;;  %4843 = vmatprep.mubr.bf16.mxu1 %v3191_v27  ;;  %v3463_v35 = vrot.slane %v7075_v61, 1 }
 0x16c   : > { %v7797_v48 = vadd.f32 %v6261_v34, %v6260_v29  ;;  %v6263_v44 = vpop.f32.mrb[26].mxu0  ;;  %v3457_v29 = vrot.slane %v7068_v40, 1  ;;  %6716 = vmatprep.mubr.bf16.mxu0 %v3456_v19  ;;  %v3458_v34 = vrot.slane %v7069_v3, 1  ;;  %v3202_v52 = vrot.slane %v3200_v46, 1  ;;  %v6110_v61 = vld [vmem:[%s1057_s14] sm:$0xff]  }
 0x16d   : > { %v6264_v41 = vpop.f32.mrb[27].mxu0  ;;  %v6354_v2 = vpop.f32.mrb[28].mxu1  ;;  %v7080_v27 = vld [vmem:[#allocation2 + $0xc8] ss:$0 sps:$4 sm:$0x11]  }
 0x16e   : > { %v7802_v53 = vadd.f32 %v6264_v41, %v6263_v44  ;;  %v6355_v10 = vpop.f32.mrb[29].mxu1  ;;  %v3195_v44 = vshll.u32 %v7070_v26, 16  ;;  %v7072_v41 = vld [vmem:[#allocation2 + $0xa8] sm:$0xfe]  }
 0x16f   : > { %v6356_v18 = vadd.f32 %v6355_v10, %v6354_v2  ;;  %v6357_v14 = vpop.f32.mrb[30].mxu1  ;;  %v3460_v54 = vrot.slane %v7072_v41, 1  ;;  %4844 = vmatmul.mubr.bf16.gmra.mrb[132].mxu1 %v7067_v25 }
 0x170   : > { %v6358_v22 = vpop.f32.mrb[31].mxu1  ;;  %v3197_v49 = vrot.slane %v3195_v44, 1  ;;  %v3467_v44 = vrot.slane %v7080_v27, 1 }
 0x171   : > { %v7813_v23 = vadd.f32 %v6356_v18, %v7759_v32  ;;  %v6359_v30 = vadd.f32 %v6358_v22, %v6357_v14  ;;  %v3459_v32 = vsel %vm1823_vm1, %v3457_v29, %v3458_v34  ;;  %v3462_v4 = vsel %vm1823_vm1, %v3460_v54, %v3461_v57  ;;  %v7079_v22 = vld [vmem:[#allocation2 + $0xc0] sm:$0xfe]  }
 0x172   : > { %v6266_v9 = vpop.f32.mrb[28].mxu0  ;;  %v3198_v59 = vor.u32 %v3197_v49, %v3193_v43  ;;  %v3466_v34 = vrot.slane %v7079_v22, 1  ;;  %v1064_v54 = vstv %s7825_s11 }
 0x173   : > { %v6267_v13 = vpop.f32.mrb[29].mxu0  ;;  %v7818_v42 = vadd.f32 %v6359_v30, %v7765_v28  ;;  %6717 = vmatmul.mubr.bf16.gmra.mrb[132].mxu0 %v3459_v32  ;;  %v3465_v30 = vsel %vm1823_vm1, %v3463_v35, %v3464_v38  ;;  %v1063_v35 = vunpack.c.l.bf16 %v1060_v1  ;;  %v5541_v38 = vld [vmem:[%s1057_s14 + $0x14] sm:$0x1] }
 0x174   : > { %v7809_v62 = vadd.f32 %v6267_v13, %v6266_v9  ;;  %v6269_v20 = vpop.f32.mrb[30].mxu0  ;;  %v3203_v28 = vsel %vm1422_vm0, %v3198_v59, %v3202_v52  ;;  %6720 = vmatprep.mubr.bf16.mxu0 %v3462_v4  ;;  %v3468_v59 = vsel %vm1823_vm1, %v3466_v34, %v3467_v44 }
 0x175   : > { %v6270_v31 = vpop.f32.mrb[31].mxu0  ;;  %v6360_v60 = vpop.f32.mrb[32].mxu1  ;;  %4851 = vmatprep.mubr.bf16.mxu1 %v3203_v28  ;;  %v1078_v28 = vstv %s7829_s12 }
 0x176   : > { %v7815_v36 = vadd.f32 %v6270_v31, %v6269_v20  ;;  %v6361_v7 = vpop.f32.mrb[33].mxu1 }
 0x177   : > { %v6362_v10 = vadd.f32 %v6361_v7, %v6360_v60  ;;  %v6363_v40 = vpop.f32.mrb[34].mxu1  ;;  %4852 = vmatmul.mubr.bf16.gmra.mrb[136].mxu1 %v7074_v6  ;;  %v6111_v7 = vunpack.c.l.bf16 %v6110_v61 }
 0x178   : > { %v6364_v13 = vpop.f32.mrb[35].mxu1 }
 0x179   : > { %v7832_v19 = vadd.f32 %v6362_v10, %v7770_v11  ;;  %v6365_v3 = vadd.f32 %v6364_v13, %v6363_v40  ;;  %v1077_v13 = vunpack.c.l.bf16 %v5541_v38 }
 0x17a   : > { %v6272_v2 = vpop.f32.mrb[32].mxu0 }
 0x17b   : > { %v6273_v9 = vpop.f32.mrb[33].mxu0  ;;  %v7838_v31 = vadd.f32 %v6365_v3, %v7776_v24  ;;  %6721 = vmatmul.mubr.bf16.gmra.mrb[136].mxu0 %v3465_v30  ;;  %v1081_v34 = vmul.f32 %v1078_v28, %v1077_v13 }
 0x17c   : > { %v7827_v12 = vadd.f32 %v6273_v9, %v6272_v2  ;;  %v6275_v18 = vpop.f32.mrb[34].mxu0  ;;  %v5539_v2 = vld [vmem:[%s1057_s14 + $0xc] sm:$0xff]   ;;  %6724 = vmatprep.mubr.bf16.mxu0 %v3468_v59  ;;  %v6112_v9 = vunpack.c.h.bf16 %v6110_v61 }
 0x17d   : > { %v6276_v14 = vpop.f32.mrb[35].mxu0  ;;  %v6366_v26 = vpop.f32.mrb[36].mxu1  ;;  %v1075_v10 = vunpack.c.l.bf16 %v5539_v2 }
 0x17e   : > { %v7834_v20 = vadd.f32 %v6276_v14, %v6275_v18  ;;  %v6367_v29 = vpop.f32.mrb[37].mxu1  ;;  %v1076_v18 = vunpack.c.h.bf16 %v5539_v2  ;;  %v1066_v27 = vmul.f32 %v6112_v9, %v1064_v54 }
 0x17f   : > { %v6368_v37 = vadd.f32 %v6367_v29, %v6366_v26  ;;  %v6369_v11 = vpop.f32.mrb[38].mxu1  ;;  %v1065_v26 = vmul.f32 %v6111_v7, %v1064_v54 }
 0x180   : > { %v6370_v49 = vpop.f32.mrb[39].mxu1  ;;  %v1080_v30 = vmul.f32 %v1078_v28, %v1076_v18 }
 0x181   : > { %v7844_v50 = vadd.f32 %v6368_v37, %v7782_v55  ;;  %v6371_v32 = vadd.f32 %v6370_v49, %v6369_v11 }
 0x182   : > { %v6278_v25 = vpop.f32.mrb[36].mxu0  ;;  %v1083_v49 = vadd.f32 %v1080_v30, %v1066_v27 }
 0x183   : > { %v6279_v43 = vpop.f32.mrb[37].mxu0  ;;  %v7853_v4 = vadd.f32 %v6371_v32, %v7789_v5  ;;  %v1079_v5 = vmul.f32 %v1078_v28, %v1075_v10 }
 0x184   : > { %v7841_v46 = vadd.f32 %v6279_v43, %v6278_v25  ;;  %v6281_v41 = vpop.f32.mrb[38].mxu0  ;;  %v1067_v25 = vmul.f32 %v1064_v54, %v1063_v35  ;;  %v5962_v61 = vpack.c.bf16 %v1083_v49, %v1083_v49 }
 0x185   : > { %v6282_v24 = vpop.f32.mrb[39].mxu0  ;;  %v6372_v52 = vpop.f32.mrb[40].mxu1  ;;  %v1082_v44 = vadd.f32 %v1079_v5, %v1065_v26 }
 0x186   : > { %v7849_v57 = vadd.f32 %v6282_v24, %v6281_v41  ;;  %v6373_v60 = vpop.f32.mrb[41].mxu1  ;;  %v1084_v32 = vadd.f32 %v1081_v34, %v1067_v25  ;;  %1100 = vst [vmem:[#allocation2 + $0xd0] sm:$0xf] %v5962_v61 }
 0x187   : > { %v6374_v55 = vadd.f32 %v6373_v60, %v6372_v52  ;;  %v6375_v6 = vpop.f32.mrb[42].mxu1  ;;  %v5961_v59 = vpack.c.bf16 %v1082_v44, %v1082_v44 }
 0x188   : > { %v6376_v40 = vpop.f32.mrb[43].mxu1  ;;  %v5963_v1 = vpack.c.bf16 %v1084_v32, %v1084_v32 }
 0x189   : > { %v7856_v14 = vadd.f32 %v6374_v55, %v7797_v48  ;;  %v6377_v3 = vadd.f32 %v6376_v40, %v6375_v6  ;;  %1099 = vst [vmem:[#allocation2 + $0xcc] sm:$0xf] %v5961_v59 }
 0x18a   : > { %1101 = vst [vmem:[#allocation2 + $0xd4] sm:$0x1] %v5963_v1 }
 0x18b   : > { %v7859_v37 = vadd.f32 %v6377_v3, %v7802_v53 }
 0x18d   : > { %v6378_v22 = vpop.f32.mrb[44].mxu1 }
 0x18e   : > { %v6379_v29 = vpop.f32.mrb[45].mxu1  ;;  %v6284_v54 = vpop.f32.mrb[40].mxu0 }
 0x18f   : > { %v6380_v43 = vadd.f32 %v6379_v29, %v6378_v22  ;;  %v6381_v11 = vpop.f32.mrb[46].mxu1  ;;  %v6285_v2 = vpop.f32.mrb[41].mxu0 }
 0x190   : > { %v6382_v41 = vpop.f32.mrb[47].mxu1  ;;  %v6286_v6 = vadd.f32 %v6285_v2, %v6284_v54  ;;  %v6287_v7 = vpop.f32.mrb[42].mxu0  ;;  %v7077_v18 = vld [vmem:[#allocation2 + $0xcc] sm:$0xff]  }
 0x191   : > { %v7862_v48 = vadd.f32 %v6380_v43, %v7809_v62  ;;  %v6383_v24 = vadd.f32 %v6382_v41, %v6381_v11  ;;  %v6288_v62 = vpop.f32.mrb[43].mxu0  ;;  %v7078_v13 = vld [vmem:[#allocation2 + $0xd4] ss:$0 sps:$4 sm:$0x11]   ;;  %v3205_v3 = vshrl.u32 %v7077_v18, 16  ;;  %v3207_v22 = vshll.u32 %v7077_v18, 16 }
 0x192   : > { %v6289_v10 = vadd.f32 %v6288_v62, %v6287_v7  ;;  %v3212_v26 = vshll.u32 %v7078_v13, 16  ;;  %v7082_v27 = vld [vmem:[#allocation2 + $0xcc] sm:$0xfe]   ;;  %v7083_v25 = vld [vmem:[#allocation2 + $0xd4] ss:$0 sps:$4 sm:$0x11]  }
 0x193   : > { %v7865_v53 = vadd.f32 %v6383_v24, %v7815_v36  ;;  %v3209_v5 = vrot.slane %v3207_v22, 1  ;;  %v3469_v43 = vrot.slane %v7082_v27, 1 }
 0x194   : > { %v3214_v34 = vrot.slane %v3212_v26, 1 }
 0x195   : > { %v6384_v52 = vpop.f32.mrb[48].mxu1  ;;  %v3210_v49 = vor.u32 %v3209_v5, %v3205_v3 }
 0x196   : > { %v6385_v60 = vpop.f32.mrb[49].mxu1  ;;  %v6290_v29 = vpop.f32.mrb[44].mxu0 }
 0x197   : > { %v6386_v28 = vadd.f32 %v6385_v60, %v6384_v52  ;;  %v6387_v55 = vpop.f32.mrb[50].mxu1  ;;  %v6291_v11 = vpop.f32.mrb[45].mxu0  ;;  %v3215_v1 = vsel %vm1422_vm0, %v3210_v49, %v3214_v34 }
 0x198   : > { %v6388_v9 = vpop.f32.mrb[51].mxu1  ;;  %v6292_v32 = vadd.f32 %v6291_v11, %v6290_v29  ;;  %v6293_v24 = vpop.f32.mrb[46].mxu0  ;;  %4859 = vmatprep.mubr.bf16.mxu1 %v3215_v1 }
 0x199   : > { %v7868_v35 = vadd.f32 %v6386_v28, %v7827_v12  ;;  %v6389_v38 = vadd.f32 %v6388_v9, %v6387_v55  ;;  %v3470_v12 = vrot.slane %v7083_v25, 1  ;;  %v6294_v54 = vpop.f32.mrb[47].mxu0 }
 0x19a   : > { %v6295_v2 = vadd.f32 %v6294_v54, %v6293_v24 }
 0x19b   : > { %v7871_v40 = vadd.f32 %v6389_v38, %v7834_v20  ;;  %v7081_v20 = vld [vmem:[#allocation2 + $0xcc] sm:$0xff]   ;;  %v3471_v59 = vsel %vm1823_vm1, %v3469_v43, %v3470_v12 }
 0x19c   : > { %6725 = vmatmul.mubr.bf16.gmra.mrb[140].mxu0 %v3471_v59  ;;  %4860 = vmatmul.mubr.bf16.gmra.mrb[140].mxu1 %v7081_v20 }
 0x19d   : > { %v6390_v36 = vpop.f32.mrb[52].mxu1 }
 0x19e   : > { %v6391_v30 = vpop.f32.mrb[53].mxu1  ;;  %v6448_v28 = vpop.f32.mrb[48].mxu0 }
 0x19f   : > { %v6392_v44 = vadd.f32 %v6391_v30, %v6390_v36  ;;  %v6393_v41 = vpop.f32.mrb[54].mxu1  ;;  %v6449_v9 = vpop.f32.mrb[49].mxu0 }
 0x1a0   : > { %v6394_v52 = vpop.f32.mrb[55].mxu1  ;;  %v6450_v38 = vadd.f32 %v6449_v9, %v6448_v28  ;;  %v6451_v18 = vpop.f32.mrb[50].mxu0 }
 0x1a1   : > { %v7875_v60 = vadd.f32 %v6392_v44, %v7841_v46  ;;  %v6395_v61 = vadd.f32 %v6394_v52, %v6393_v41  ;;  %v6452_v46 = vpop.f32.mrb[51].mxu0 }
 0x1a2   : > { %v7882_v22 = vadd.f32 %v6450_v38, %v7774_v21  ;;  %v6453_v26 = vadd.f32 %v6452_v46, %v6451_v18 }
 0x1a3   : > { %v7879_v55 = vadd.f32 %v6395_v61, %v7849_v57 }
 0x1a4   : > { %v7887_v57 = vadd.f32 %v6453_v26, %v7779_v33 }
 0x1a5   : > { %v6396_v7 = vpop.f32.mrb[56].mxu1 }
 0x1a6   : > { %v6397_v62 = vpop.f32.mrb[57].mxu1  ;;  %v6454_v29 = vpop.f32.mrb[52].mxu0 }
 0x1a7   : > { %v6398_v36 = vadd.f32 %v6397_v62, %v6396_v7  ;;  %v6399_v13 = vpop.f32.mrb[58].mxu1  ;;  %v6455_v30 = vpop.f32.mrb[53].mxu0 }
 0x1a8   : > { %v6400_v3 = vpop.f32.mrb[59].mxu1  ;;  %v6456_v43 = vadd.f32 %v6455_v30, %v6454_v29  ;;  %v6457_v12 = vpop.f32.mrb[54].mxu0 }
 0x1a9   : > { %v7884_v27 = vadd.f32 %v6398_v36, %v6286_v6  ;;  %v6401_v25 = vadd.f32 %v6400_v3, %v6399_v13  ;;  %v6458_v44 = vpop.f32.mrb[55].mxu0 }
 0x1aa   : > { %v7892_v21 = vadd.f32 %v6456_v43, %v7787_v0  ;;  %v6459_v6 = vadd.f32 %v6458_v44, %v6457_v12 }
 0x1ab   : > { %v7889_v5 = vadd.f32 %v6401_v25, %v6289_v10 }
 0x1ac   : > { %v7897_v10 = vadd.f32 %v6459_v6, %v7792_v8 }
 0x1ad   : > { %v6402_v34 = vpop.f32.mrb[60].mxu1 }
 0x1ae   : > { %v6403_v11 = vpop.f32.mrb[61].mxu1  ;;  %v6460_v59 = vpop.f32.mrb[56].mxu0 }
 0x1af   : > { %v6404_v41 = vadd.f32 %v6403_v11, %v6402_v34  ;;  %v6405_v49 = vpop.f32.mrb[62].mxu1  ;;  %v6461_v54 = vpop.f32.mrb[57].mxu0 }
 0x1b0   : > { %v6406_v20 = vpop.f32.mrb[63].mxu1  ;;  %v6462_v1 = vadd.f32 %v6461_v54, %v6460_v59  ;;  %v6463_v28 = vpop.f32.mrb[58].mxu0 }
 0x1b1   : > { %v7894_v24 = vadd.f32 %v6404_v41, %v6292_v32  ;;  %v6407_v33 = vadd.f32 %v6406_v20, %v6405_v49  ;;  %v6464_v9 = vpop.f32.mrb[59].mxu0 }
 0x1b2   : > { %v7902_v38 = vadd.f32 %v6462_v1, %v7800_v51  ;;  %v6465_v32 = vadd.f32 %v6464_v9, %v6463_v28 }
 0x1b3   : > { %v7899_v52 = vadd.f32 %v6407_v33, %v6295_v2 }
 0x1b4   : > { %v7908_v2 = vadd.f32 %v6465_v32, %v7805_v63 }
 0x1b5   : > { %v6408_v61 = vpop.f32.mrb[64].mxu1 }
 0x1b6   : > { %v6409_v7 = vpop.f32.mrb[65].mxu1  ;;  %v6466_v46 = vpop.f32.mrb[60].mxu0 }
 0x1b7   : > { %v6410_v62 = vadd.f32 %v6409_v7, %v6408_v61  ;;  %v6411_v0 = vpop.f32.mrb[66].mxu1  ;;  %v6467_v3 = vpop.f32.mrb[61].mxu0 }
 0x1b8   : > { %v6412_v18 = vpop.f32.mrb[67].mxu1  ;;  %v6468_v26 = vadd.f32 %v6467_v3, %v6466_v46  ;;  %v6469_v25 = vpop.f32.mrb[62].mxu0 }
 0x1b9   : > { %v7905_v36 = vadd.f32 %v6410_v62, %v7720_v47  ;;  %v6413_v8 = vadd.f32 %v6412_v18, %v6411_v0  ;;  %v6470_v30 = vpop.f32.mrb[63].mxu0 }
 0x1ba   : > { %v7914_v34 = vadd.f32 %v6468_v26, %v7813_v23  ;;  %v6471_v43 = vadd.f32 %v6470_v30, %v6469_v25 }
 0x1bb   : > { %v7911_v13 = vadd.f32 %v6413_v8, %v7727_v58 }
 0x1bc   : > { %v7917_v63 = vadd.f32 %v6471_v43, %v7818_v42 }
 0x1bd   : > { %v6414_v29 = vpop.f32.mrb[68].mxu1 }
 0x1be   : > { %v6415_v51 = vpop.f32.mrb[69].mxu1  ;;  %v6472_v41 = vpop.f32.mrb[64].mxu0 }
 0x1bf   : > { %v6416_v47 = vadd.f32 %v6415_v51, %v6414_v29  ;;  %v6417_v12 = vpop.f32.mrb[70].mxu1  ;;  %v6473_v6 = vpop.f32.mrb[65].mxu0 }
 0x1c0   : > { %v6418_v11 = vpop.f32.mrb[71].mxu1  ;;  %v6474_v20 = vadd.f32 %v6473_v6, %v6472_v41  ;;  %v6475_v33 = vpop.f32.mrb[66].mxu0 }
 0x1c1   : > { %v7920_v58 = vadd.f32 %v6416_v47, %v7736_v17  ;;  %v6419_v44 = vadd.f32 %v6418_v11, %v6417_v12  ;;  %v6476_v59 = vpop.f32.mrb[67].mxu0 }
 0x1c2   : > { %v7926_v61 = vadd.f32 %v6474_v20, %v7832_v19  ;;  %v6477_v1 = vadd.f32 %v6476_v59, %v6475_v33 }
 0x1c3   : > { %v7923_v49 = vadd.f32 %v6419_v44, %v7740_v15 }
 0x1c4   : > { %v7929_v17 = vadd.f32 %v6477_v1, %v7838_v31 }
 0x1c5   : > { %v6420_v23 = vpop.f32.mrb[72].mxu1 }
 0x1c6   : > { %v6421_v54 = vpop.f32.mrb[73].mxu1  ;;  %v6478_v62 = vpop.f32.mrb[68].mxu0 }
 0x1c7   : > { %v6422_v42 = vadd.f32 %v6421_v54, %v6420_v23  ;;  %v6423_v28 = vpop.f32.mrb[74].mxu1  ;;  %v6479_v32 = vpop.f32.mrb[69].mxu0 }
 0x1c8   : > { %v6424_v7 = vpop.f32.mrb[75].mxu1  ;;  %v6480_v18 = vadd.f32 %v6479_v32, %v6478_v62  ;;  %v6481_v8 = vpop.f32.mrb[70].mxu0 }
 0x1c9   : > { %v7932_v9 = vadd.f32 %v6422_v42, %v7745_v45  ;;  %v6425_v15 = vadd.f32 %v6424_v7, %v6423_v28  ;;  %v6482_v19 = vpop.f32.mrb[71].mxu0 }
 0x1ca   : > { %v7938_v46 = vadd.f32 %v6480_v18, %v7844_v50  ;;  %v6483_v3 = vadd.f32 %v6482_v19, %v6481_v8 }
 0x1cb   : > { %v7935_v0 = vadd.f32 %v6425_v15, %v7749_v56 }
 0x1cc   : > { %v7941_v26 = vadd.f32 %v6483_v3, %v7853_v4 }
 0x1cd   : > { %v6426_v6 = vpop.f32.mrb[76].mxu1 }
 0x1ce   : > { %v6484_v31 = vpop.f32.mrb[72].mxu0  ;;  %v6427_v33 = vpop.f32.mrb[77].mxu1 }
 0x1cf   : > { %v6485_v25 = vpop.f32.mrb[73].mxu0  ;;  %v6429_v23 = vpop.f32.mrb[78].mxu1 }
 0x1d0   : > { %v6486_v45 = vadd.f32 %v6485_v25, %v6484_v31  ;;  %v6487_v29 = vpop.f32.mrb[74].mxu0  ;;  %v6430_v54 = vpop.f32.mrb[79].mxu1 }
 0x1d1   : > { %v6488_v30 = vpop.f32.mrb[75].mxu0  ;;  %v6431_v42 = vadd.f32 %v6430_v54, %v6429_v23 }
 0x1d2   : > { %v7944_v51 = vadd.f32 %v6486_v45, %v7856_v14  ;;  %v6489_v56 = vadd.f32 %v6488_v30, %v6487_v29  ;;  %v6428_v14 = vadd.f32 %v6427_v33, %v6426_v6 }
 0x1d4   : > { %v7947_v43 = vadd.f32 %v6489_v56, %v7859_v37  ;;  %v7956_v1 = vadd.f32 %v6428_v14, %v7757_v16 }
 0x1d5   : > { %v6560_v32 = vpop.f32.mrb[80].mxu1 }
 0x1d6   : > { %v6490_v47 = vpop.f32.mrb[76].mxu0  ;;  %v6561_v8 = vpop.f32.mrb[81].mxu1 }
 0x1d7   : > { %v6491_v12 = vpop.f32.mrb[77].mxu0  ;;  %v6562_v19 = vadd.f32 %v6561_v8, %v6560_v32  ;;  %v6563_v3 = vpop.f32.mrb[82].mxu1 }
 0x1d8   : > { %v6492_v50 = vadd.f32 %v6491_v12, %v6490_v47  ;;  %v6493_v11 = vpop.f32.mrb[78].mxu0  ;;  %v6564_v31 = vpop.f32.mrb[83].mxu1 }
 0x1d9   : > { %v6494_v44 = vpop.f32.mrb[79].mxu0  ;;  %v6565_v45 = vadd.f32 %v6564_v31, %v6563_v3 }
 0x1da   : > { %v7950_v4 = vadd.f32 %v6492_v50, %v7862_v48  ;;  %v6495_v41 = vadd.f32 %v6494_v44, %v6493_v11  ;;  %v7959_v48 = vadd.f32 %v6431_v42, %v7762_v39  ;;  %v7968_v39 = vadd.f32 %v6562_v19, %v7882_v22 }
 0x1dc   : > { %v7953_v20 = vadd.f32 %v6495_v41, %v7865_v53 }
 0x1dd   : > { %v6566_v12 = vpop.f32.mrb[84].mxu1 }
 0x1de   : > { %v6496_v59 = vpop.f32.mrb[80].mxu0  ;;  %v6567_v11 = vpop.f32.mrb[85].mxu1 }
 0x1df   : > { %v6497_v37 = vpop.f32.mrb[81].mxu0  ;;  %v6568_v44 = vadd.f32 %v6567_v11, %v6566_v12  ;;  %v6569_v41 = vpop.f32.mrb[86].mxu1 }
 0x1e0   : > { %v6498_v28 = vadd.f32 %v6497_v37, %v6496_v59  ;;  %v6499_v7 = vpop.f32.mrb[82].mxu0  ;;  %v6570_v33 = vpop.f32.mrb[87].mxu1 }
 0x1e1   : > { %v6500_v15 = vpop.f32.mrb[83].mxu0  ;;  %v6571_v22 = vadd.f32 %v6570_v33, %v6569_v41 }
 0x1e2   : > { %v7962_v62 = vadd.f32 %v6498_v28, %v7868_v35  ;;  %v6501_v53 = vadd.f32 %v6500_v15, %v6499_v7 }
 0x1e4   : > { %v7965_v18 = vadd.f32 %v6501_v53, %v7871_v40  ;;  %v7974_v40 = vadd.f32 %v6565_v45, %v7887_v57 }
 0x1e5   : > { %v6572_v42 = vpop.f32.mrb[88].mxu1 }
 0x1e6   : > { %v6502_v16 = vpop.f32.mrb[84].mxu0  ;;  %v6573_v7 = vpop.f32.mrb[89].mxu1 }
 0x1e7   : > { %v6503_v25 = vpop.f32.mrb[85].mxu0  ;;  %v6574_v15 = vadd.f32 %v6573_v7, %v6572_v42  ;;  %v6575_v53 = vpop.f32.mrb[90].mxu1 }
 0x1e8   : > { %v6504_v29 = vadd.f32 %v6503_v25, %v6502_v16  ;;  %v6505_v30 = vpop.f32.mrb[86].mxu0  ;;  %v6576_v8 = vpop.f32.mrb[91].mxu1 }
 0x1e9   : > { %v6506_v56 = vpop.f32.mrb[87].mxu0 }
 0x1ea   : > { %v7971_v35 = vadd.f32 %v6504_v29, %v7875_v60  ;;  %v6507_v47 = vadd.f32 %v6506_v56, %v6505_v30  ;;  %v7980_v60 = vadd.f32 %v6568_v44, %v7892_v21  ;;  %v6577_v21 = vadd.f32 %v6576_v8, %v6575_v53 }
 0x1ec   : > { %v7977_v50 = vadd.f32 %v6507_v47, %v7879_v55  ;;  %v7986_v55 = vadd.f32 %v6571_v22, %v7897_v10 }
 0x1ed   : > { %v6578_v45 = vpop.f32.mrb[92].mxu1 }
 0x1ee   : > { %v6508_v6 = vpop.f32.mrb[88].mxu0  ;;  %v6579_v30 = vpop.f32.mrb[93].mxu1 }
 0x1ef   : > { %v6509_v14 = vpop.f32.mrb[89].mxu0  ;;  %v6580_v56 = vadd.f32 %v6579_v30, %v6578_v45  ;;  %v6581_v47 = vpop.f32.mrb[94].mxu1 }
 0x1f0   : > { %v6510_v23 = vadd.f32 %v6509_v14, %v6508_v6  ;;  %v6511_v59 = vpop.f32.mrb[90].mxu0  ;;  %v6582_v11 = vpop.f32.mrb[95].mxu1 }
 0x1f1   : > { %v6512_v54 = vpop.f32.mrb[91].mxu0 }
 0x1f2   : > { %v7983_v57 = vadd.f32 %v6510_v23, %v7884_v27  ;;  %v6513_v37 = vadd.f32 %v6512_v54, %v6511_v59  ;;  %v7992_v27 = vadd.f32 %v6574_v15, %v7902_v38  ;;  %v6583_v38 = vadd.f32 %v6582_v11, %v6581_v47 }
 0x1f4   : > { %v7989_v28 = vadd.f32 %v6513_v37, %v7889_v5  ;;  %v7998_v5 = vadd.f32 %v6577_v21, %v7908_v2 }
 0x1f5   : > { %v6584_v22 = vpop.f32.mrb[96].mxu1 }
 0x1f6   : > { %v6514_v32 = vpop.f32.mrb[92].mxu0  ;;  %v6585_v59 = vpop.f32.mrb[97].mxu1 }
 0x1f7   : > { %v6515_v19 = vpop.f32.mrb[93].mxu0  ;;  %v6586_v54 = vadd.f32 %v6585_v59, %v6584_v22  ;;  %v6587_v37 = vpop.f32.mrb[98].mxu1 }
 0x1f8   : > { %v6516_v3 = vadd.f32 %v6515_v19, %v6514_v32  ;;  %v6517_v16 = vpop.f32.mrb[94].mxu0  ;;  %v6588_v7 = vpop.f32.mrb[99].mxu1 }
 0x1f9   : > { %v6518_v31 = vpop.f32.mrb[95].mxu0 }
 0x1fa   : > { %v7995_v10 = vadd.f32 %v6516_v3, %v7894_v24  ;;  %v6519_v25 = vadd.f32 %v6518_v31, %v6517_v16  ;;  %v8004_v24 = vadd.f32 %v6580_v56, %v7914_v34  ;;  %v6589_v34 = vadd.f32 %v6588_v7, %v6587_v37 }
 0x1fc   : > { %v8001_v29 = vadd.f32 %v6519_v25, %v7899_v52  ;;  %v8010_v52 = vadd.f32 %v6583_v38, %v7917_v63 }
 0x1fd   : > { %v6590_v21 = vpop.f32.mrb[100].mxu1 }
 0x1fe   : > { %v6520_v12 = vpop.f32.mrb[96].mxu0  ;;  %v6591_v16 = vpop.f32.mrb[101].mxu1 }
 0x1ff   : > { %v6521_v44 = vpop.f32.mrb[97].mxu0  ;;  %v6592_v31 = vadd.f32 %v6591_v16, %v6590_v21  ;;  %v6593_v25 = vpop.f32.mrb[102].mxu1 }
 0x200   : > { %v6522_v41 = vadd.f32 %v6521_v44, %v6520_v12  ;;  %v6523_v6 = vpop.f32.mrb[98].mxu0  ;;  %v6594_v30 = vpop.f32.mrb[103].mxu1 }
 0x201   : > { %v6524_v33 = vpop.f32.mrb[99].mxu0 }
 0x202   : > { %v8007_v2 = vadd.f32 %v6522_v41, %v7905_v36  ;;  %v6525_v14 = vadd.f32 %v6524_v33, %v6523_v6  ;;  %v8016_v36 = vadd.f32 %v6586_v54, %v7926_v61  ;;  %v6595_v61 = vadd.f32 %v6594_v30, %v6593_v25 }
 0x204   : > { %v8013_v23 = vadd.f32 %v6525_v14, %v7911_v13  ;;  %v8022_v13 = vadd.f32 %v6589_v34, %v7929_v17 }
 0x205   : > { %v6596_v38 = vpop.f32.mrb[104].mxu1 }
 0x206   : > { %v6526_v42 = vpop.f32.mrb[100].mxu0  ;;  %v6597_v6 = vpop.f32.mrb[105].mxu1 }
 0x207   : > { %v6527_v15 = vpop.f32.mrb[101].mxu0  ;;  %v6598_v33 = vadd.f32 %v6597_v6, %v6596_v38  ;;  %v6599_v14 = vpop.f32.mrb[106].mxu1 }
 0x208   : > { %v6528_v53 = vadd.f32 %v6527_v15, %v6526_v42  ;;  %v6529_v32 = vpop.f32.mrb[102].mxu0  ;;  %v6600_v22 = vpop.f32.mrb[107].mxu1 }
 0x209   : > { %v6530_v8 = vpop.f32.mrb[103].mxu0  ;;  %v6601_v59 = vadd.f32 %v6600_v22, %v6599_v14 }
 0x20a   : > { %v8019_v63 = vadd.f32 %v6528_v53, %v7920_v58  ;;  %v6531_v19 = vadd.f32 %v6530_v8, %v6529_v32  ;;  %v8028_v58 = vadd.f32 %v6592_v31, %v7938_v46  ;;  %v8040_v46 = vadd.f32 %v6598_v33, %v7944_v51 }
 0x20b   : > { %v8043_v54 = vadd.f32 %v6601_v59, %v7947_v43 }
 0x20c   : > { %v8025_v3 = vadd.f32 %v6531_v19, %v7923_v49  ;;  %v8034_v49 = vadd.f32 %v6595_v61, %v7941_v26 }
 0x20e   : > { %v6532_v45 = vpop.f32.mrb[104].mxu0 }
 0x20f   : > { %v6533_v56 = vpop.f32.mrb[105].mxu0 }
 0x210   : > { %v6534_v47 = vadd.f32 %v6533_v56, %v6532_v45  ;;  %v6535_v12 = vpop.f32.mrb[106].mxu0 }
 0x211   : > { %v6536_v11 = vpop.f32.mrb[107].mxu0 }
 0x212   : > { %v8031_v17 = vadd.f32 %v6534_v47, %v7932_v9  ;;  %v6537_v44 = vadd.f32 %v6536_v11, %v6535_v12  ;;  %v6602_v9 = vpop.f32.mrb[108].mxu1 }
 0x213   : > { %v6603_v37 = vpop.f32.mrb[109].mxu1 }
 0x214   : > { %v8037_v41 = vadd.f32 %v6537_v44, %v7935_v0  ;;  %v6604_v26 = vadd.f32 %v6603_v37, %v6602_v9  ;;  %v6605_v7 = vpop.f32.mrb[110].mxu1 }
 0x215   : > { %v6606_v34 = vpop.f32.mrb[111].mxu1 }
 0x216   : > { %v6538_v42 = vpop.f32.mrb[108].mxu0  ;;  %v6607_v32 = vadd.f32 %v6606_v34, %v6605_v7  ;;  %v8046_v8 = vadd.f32 %v6604_v26, %v7950_v4  ;;  %v6608_v31 = vpop.f32.mrb[112].mxu1 }
 0x217   : > { %v6539_v15 = vpop.f32.mrb[109].mxu0  ;;  %v6609_v25 = vpop.f32.mrb[113].mxu1 }
 0x218   : > { %v6540_v0 = vadd.f32 %v6539_v15, %v6538_v42  ;;  %v6541_v53 = vpop.f32.mrb[110].mxu0  ;;  %v8052_v21 = vadd.f32 %v6607_v32, %v7953_v20  ;;  %v6610_v30 = vadd.f32 %v6609_v25, %v6608_v31  ;;  %v6611_v56 = vpop.f32.mrb[114].mxu1 }
 0x219   : > { %v6542_v19 = vpop.f32.mrb[111].mxu0  ;;  %v6612_v47 = vpop.f32.mrb[115].mxu1 }
 0x21a   : > { %v8049_v51 = vadd.f32 %v6540_v0, %v7956_v1  ;;  %v6543_v43 = vadd.f32 %v6542_v19, %v6541_v53  ;;  %v6613_v11 = vadd.f32 %v6612_v47, %v6611_v56  ;;  %v8061_v20 = vadd.f32 %v6610_v30, %v7962_v62 }
 0x21c   : > { %v8055_v16 = vadd.f32 %v6543_v43, %v7959_v48  ;;  %v8071_v38 = vadd.f32 %v6613_v11, %v7965_v18 }
 0x21d   : > { %v6614_v33 = vpop.f32.mrb[116].mxu1 }
 0x21e   : > { %v6698_v45 = vpop.f32.mrb[112].mxu0  ;;  %v6615_v62 = vpop.f32.mrb[117].mxu1 }
 0x21f   : > { %v4911_v61 = vadd.f32 %v6698_v45, %v7980_v60  ;;  %v4902_v4 = vpop.f32.mrb[113].mxu0  ;;  %v6616_v14 = vadd.f32 %v6615_v62, %v6614_v33  ;;  %v6617_v22 = vpop.f32.mrb[118].mxu1 }
 0x220   : > { %v4903_v1 = vadd.f32 %v4902_v4, %v7968_v39  ;;  %v6699_v12 = vpop.f32.mrb[114].mxu0  ;;  %v6618_v37 = vpop.f32.mrb[119].mxu1 }
 0x221   : > { %v4914_v48 = vadd.f32 %v6699_v12, %v7986_v55  ;;  %v4905_v44 = vpop.f32.mrb[115].mxu0  ;;  %v6619_v18 = vadd.f32 %v6618_v37, %v6617_v22  ;;  %v4814_v26 = vadd.f32 %v6616_v14, %v7971_v35 }
 0x222   : > { %v4906_v60 = vadd.f32 %v4905_v44, %v7974_v40 }
 0x223   : > { %v6121_v39 = vpack.c.bf16 %v4914_v48, %v4911_v61  ;;  %v4817_v0 = vadd.f32 %v6619_v18, %v7977_v50 }
 0x224   : > { %v6116_v6 = vpack.c.bf16 %v4906_v60, %v4903_v1 }
 0x225   : > { %6193 = vst [vmem:[%s8067_s17 + $0x8] sm:$0xff] %v6121_v39   ;;  %v6620_v19 = vpop.f32.mrb[120].mxu1 }
 0x226   : > { %6117 = vst [vmem:[%s8067_s17] sm:$0xff] %v6116_v6   ;;  %v6702_v55 = vpop.f32.mrb[116].mxu0 }
 0x227   : > { %v4927_v59 = vadd.f32 %v6702_v55, %v8004_v24  ;;  %v4918_v9 = vpop.f32.mrb[117].mxu0  ;;  %v6621_v24 = vpop.f32.mrb[121].mxu1 }
 0x228   : > { %v4919_v40 = vadd.f32 %v4918_v9, %v7992_v27  ;;  %v6703_v42 = vpop.f32.mrb[118].mxu0  ;;  %v6622_v31 = vadd.f32 %v6621_v24, %v6620_v19  ;;  %v6623_v27 = vpop.f32.mrb[122].mxu1 }
 0x229   : > { %v4930_v7 = vadd.f32 %v6703_v42, %v8010_v52  ;;  %v4921_v15 = vpop.f32.mrb[119].mxu0  ;;  %v6624_v52 = vpop.f32.mrb[123].mxu1 }
 0x22a   : > { %v4922_v34 = vadd.f32 %v4921_v15, %v7998_v5  ;;  %v6625_v30 = vadd.f32 %v6624_v52, %v6623_v27  ;;  %v4822_v50 = vadd.f32 %v6622_v31, %v7983_v57 }
 0x22b   : > { %v6131_v53 = vpack.c.bf16 %v4930_v7, %v4927_v59 }
 0x22c   : > { %v6126_v32 = vpack.c.bf16 %v4922_v34, %v4919_v40  ;;  %v4825_v47 = vadd.f32 %v6625_v30, %v7989_v28 }
 0x22d   : > { %6195 = vst [vmem:[%s8067_s17 + $0x18] sm:$0xff] %v6131_v53   ;;  %v6626_v11 = vpop.f32.mrb[124].mxu1 }
 0x22e   : > { %6194 = vst [vmem:[%s8067_s17 + $0x10] sm:$0xff] %v6126_v32   ;;  %v6706_v43 = vpop.f32.mrb[120].mxu0 }
 0x22f   : > { %v4943_v25 = vadd.f32 %v6706_v43, %v8028_v58  ;;  %v4934_v35 = vpop.f32.mrb[121].mxu0  ;;  %v6627_v58 = vpop.f32.mrb[125].mxu1 }
 0x230   : > { %v4935_v45 = vadd.f32 %v4934_v35, %v8016_v36  ;;  %v6707_v5 = vpop.f32.mrb[122].mxu0  ;;  %v6628_v44 = vadd.f32 %v6627_v58, %v6626_v11  ;;  %v6629_v36 = vpop.f32.mrb[126].mxu1 }
 0x231   : > { %v4946_v56 = vadd.f32 %v6707_v5, %v8034_v49  ;;  %v4937_v61 = vpop.f32.mrb[123].mxu0  ;;  %v6630_v49 = vpop.f32.mrb[127].mxu1 }
 0x232   : > { %v4938_v4 = vadd.f32 %v4937_v61, %v8022_v13  ;;  %v6631_v6 = vadd.f32 %v6630_v49, %v6629_v36  ;;  %v4830_v28 = vadd.f32 %v6628_v44, %v7995_v10 }
 0x233   : > { %v6141_v1 = vpack.c.bf16 %v4946_v56, %v4943_v25 }
 0x234   : > { %v6136_v12 = vpack.c.bf16 %v4938_v4, %v4935_v45  ;;  %v4833_v14 = vadd.f32 %v6631_v6, %v8001_v29 }
 0x235   : > { %6197 = vst [vmem:[%s8067_s17 + $0x28] sm:$0xff] %v6141_v1  }
 0x236   : > { %6196 = vst [vmem:[%s8067_s17 + $0x20] sm:$0xff] %v6136_v12   ;;  %v6710_v48 = vpop.f32.mrb[124].mxu0 }
 0x237   : > { %v4959_v60 = vadd.f32 %v6710_v48, %v8046_v8  ;;  %v4950_v57 = vpop.f32.mrb[125].mxu0 }
 0x238   : > { %v4951_v39 = vadd.f32 %v4950_v57, %v8040_v46  ;;  %v6711_v13 = vpop.f32.mrb[126].mxu0 }
 0x239   : > { %v4962_v33 = vadd.f32 %v6711_v13, %v8052_v21  ;;  %v4953_v62 = vpop.f32.mrb[127].mxu0 }
 0x23a   : > { %v4954_v55 = vadd.f32 %v4953_v62, %v8043_v54  ;;  %v6632_v9 = vpop.f32.mrb[128].mxu1 }
 0x23b   : > { %v6151_v22 = vpack.c.bf16 %v4962_v33, %v4959_v60  ;;  %v6633_v8 = vpop.f32.mrb[129].mxu1 }
 0x23c   : > { %v6146_v59 = vpack.c.bf16 %v4954_v55, %v4951_v39  ;;  %v6634_v40 = vadd.f32 %v6633_v8, %v6632_v9  ;;  %v6635_v46 = vpop.f32.mrb[130].mxu1 }
 0x23d   : > { %6199 = vst [vmem:[%s8067_s17 + $0x38] sm:$0xff] %v6151_v22   ;;  %v6636_v18 = vpop.f32.mrb[131].mxu1 }
 0x23e   : > { %6198 = vst [vmem:[%s8067_s17 + $0x30] sm:$0xff] %v6146_v59   ;;  %v6714_v37 = vpop.f32.mrb[128].mxu0  ;;  %v6637_v54 = vadd.f32 %v6636_v18, %v6635_v46  ;;  %v4838_v29 = vadd.f32 %v6634_v40, %v8007_v2 }
 0x23f   : > { %v4975_v42 = vadd.f32 %v6714_v37, %v4814_v26  ;;  %v4966_v10 = vpop.f32.mrb[129].mxu0 }
 0x240   : > { %v4967_v21 = vadd.f32 %v4966_v10, %v8061_v20  ;;  %v6715_v7 = vpop.f32.mrb[130].mxu0  ;;  %v4841_v32 = vadd.f32 %v6637_v54, %v8013_v23 }
 0x241   : > { %v4978_v15 = vadd.f32 %v6715_v7, %v4817_v0  ;;  %v4969_v34 = vpop.f32.mrb[131].mxu0 }
 0x242   : > { %v4970_v53 = vadd.f32 %v4969_v34, %v8071_v38  ;;  %v6638_v43 = vpop.f32.mrb[132].mxu1 }
 0x243   : > { %v6161_v19 = vpack.c.bf16 %v4978_v15, %v4975_v42  ;;  %v6639_v26 = vpop.f32.mrb[133].mxu1 }
 0x244   : > { %v6156_v24 = vpack.c.bf16 %v4970_v53, %v4967_v21  ;;  %v6640_v27 = vadd.f32 %v6639_v26, %v6638_v43  ;;  %v6641_v20 = vpop.f32.mrb[134].mxu1 }
 0x245   : > { %6201 = vst [vmem:[%s8067_s17 + $0x48] sm:$0xff] %v6161_v19   ;;  %v6642_v2 = vpop.f32.mrb[135].mxu1 }
 0x246   : > { %6200 = vst [vmem:[%s8067_s17 + $0x40] sm:$0xff] %v6156_v24   ;;  %v6718_v31 = vpop.f32.mrb[132].mxu0  ;;  %v6643_v45 = vadd.f32 %v6642_v2, %v6641_v20  ;;  %v4846_v38 = vadd.f32 %v6640_v27, %v8019_v63 }
 0x247   : > { %v4991_v25 = vadd.f32 %v6718_v31, %v4830_v28  ;;  %v4982_v35 = vpop.f32.mrb[133].mxu0 }
 0x248   : > { %v4983_v0 = vadd.f32 %v4982_v35, %v4822_v50  ;;  %v6719_v52 = vpop.f32.mrb[134].mxu0  ;;  %v4849_v56 = vadd.f32 %v6643_v45, %v8025_v3 }
 0x249   : > { %v4994_v23 = vadd.f32 %v6719_v52, %v4833_v14  ;;  %v4985_v5 = vpop.f32.mrb[135].mxu0 }
 0x24a   : > { %v4986_v30 = vadd.f32 %v4985_v5, %v4825_v47  ;;  %v6644_v1 = vpop.f32.mrb[136].mxu1 }
 0x24b   : > { %v6171_v61 = vpack.c.bf16 %v4994_v23, %v4991_v25  ;;  %v6645_v12 = vpop.f32.mrb[137].mxu1 }
 0x24c   : > { %v6166_v4 = vpack.c.bf16 %v4986_v30, %v4983_v0  ;;  %v6646_v58 = vadd.f32 %v6645_v12, %v6644_v1  ;;  %v6647_v50 = vpop.f32.mrb[138].mxu1 }
 0x24d   : > { %6203 = vst [vmem:[%s8067_s17 + $0x58] sm:$0xff] %v6171_v61   ;;  %v6648_v36 = vpop.f32.mrb[139].mxu1 }
 0x24e   : > { %6202 = vst [vmem:[%s8067_s17 + $0x50] sm:$0xff] %v6166_v4   ;;  %v6722_v11 = vpop.f32.mrb[136].mxu0  ;;  %v6649_v57 = vadd.f32 %v6648_v36, %v6647_v50  ;;  %v4854_v47 = vadd.f32 %v6646_v58, %v8031_v17 }
 0x24f   : > { %v5007_v48 = vadd.f32 %v6722_v11, %v4846_v38  ;;  %v4998_v44 = vpop.f32.mrb[137].mxu0 }
 0x250   : > { %v4999_v63 = vadd.f32 %v4998_v44, %v4838_v29  ;;  %v6723_v60 = vpop.f32.mrb[138].mxu0  ;;  %v4857_v13 = vadd.f32 %v6649_v57, %v8037_v41 }
 0x251   : > { %v5010_v3 = vadd.f32 %v6723_v60, %v4849_v56  ;;  %v5001_v49 = vpop.f32.mrb[139].mxu0 }
 0x252   : > { %v5002_v39 = vadd.f32 %v5001_v49, %v4841_v32 }
 0x253   : > { %v6181_v6 = vpack.c.bf16 %v5010_v3, %v5007_v48 }
 0x254   : > { %v6176_v28 = vpack.c.bf16 %v5002_v39, %v4999_v63 }
 0x255   : > { %6205 = vst [vmem:[%s8067_s17 + $0x68] sm:$0xff] %v6181_v6  }
 0x256   : > { %6204 = vst [vmem:[%s8067_s17 + $0x60] sm:$0xff] %v6176_v28  }
 0x26f   : > { %v6726_v33 = vpop.f32.mrb[140].mxu0  ;;  %v6650_v55 = vpop.f32.mrb[140].mxu1 }
 0x270   : > { %v5014_v62 = vpop.f32.mrb[141].mxu0  ;;  %v6651_v59 = vpop.f32.mrb[141].mxu1 }
 0x271   : > { %v5015_v14 = vadd.f32 %v5014_v62, %v4854_v47  ;;  %v6727_v22 = vpop.f32.mrb[142].mxu0  ;;  %v6652_v8 = vadd.f32 %v6651_v59, %v6650_v55  ;;  %v6653_v17 = vpop.f32.mrb[142].mxu1 }
 0x272   : > { %v5017_v9 = vpop.f32.mrb[143].mxu0  ;;  %v6654_v40 = vpop.f32.mrb[143].mxu1 }
 0x273   : > { %v5018_v37 = vadd.f32 %v5017_v9, %v4857_v13  ;;  %v4862_v46 = vadd.f32 %v6652_v8, %v8049_v51  ;;  %v6655_v41 = vadd.f32 %v6654_v40, %v6653_v17 }
 0x275   : > { %v6186_v42 = vpack.c.bf16 %v5018_v37, %v5015_v14  ;;  %v5023_v10 = vadd.f32 %v6726_v33, %v4862_v46  ;;  %v4865_v18 = vadd.f32 %v6655_v41, %v8055_v16 }
 0x277   : > { %6206 = vst [vmem:[%s8067_s17 + $0x70] sm:$0xff] %v6186_v42   ;;  %v5026_v21 = vadd.f32 %v6727_v22, %v4865_v18 }
 0x279   : > { %v6191_v7 = vpack.c.bf16 %v5026_v21, %v5023_v10 }
 0x27b   : > { %6207 = vst [vmem:[%s8067_s17 + $0x78] sm:$0xff] %v6191_v7  }
 0x27c PF: > { %s29_s8 = sadd.s32 1, %s7144_s8   ;;  %s8132_s6 = smov %s7140_s7 }
 0x27d   : > { %p26_p6 = scmp.ge.s32.totalorder %s29_s8, 4   ;;  %s8133_s7 = smov %s8135_s2 }
 0x27f   :  { %28 = sbr.rel (!%p26_p6) target bundleno = 37 (0x25), region = 111 }

</bundles_post_ra>
